<compile_context>
chip_gen: v7x
topology: tpu7x:2x2x1
jax: 0.10.0
libtpu: 0.0.40
codegen_flags: <defaults>
</compile_context>

<pallas_src>
import jax
import jax.numpy as jnp
from jax import lax
from jax.experimental import pallas as pl
from jax.experimental.pallas import tpu as pltpu


def _round_up(x, m):
    return ((x + m - 1) // m) * m


def attn_net_kernel(x_ref, w1_ref, b1_ref, w2t_ref, b2_ref, out_ref):
    """One grid step: attention logits for `tile_n` rows of x.

    x_ref   : (tile_n, L)      bf16  streamed input tile
    w1_ref  : (L, D)           bf16  resident layer-1 weight (pre-transposed)
    b1_ref  : (1, D)           f32   layer-1 bias
    w2t_ref : (C_pad, D)       bf16  resident layer-2 weight (PyTorch (C,D) layout, padded)
    b2_ref  : (C_pad, 1)       f32   layer-2 bias (padded)
    out_ref : (C_pad, tile_n)  f32   lane-dense (transposed) logits
    """
    # Layer 1 on the MXU with f32 accumulation; bias + tanh in f32 (VPU/EUP).
    h = jnp.tanh(
        jnp.dot(x_ref[...], w1_ref[...], preferred_element_type=jnp.float32)
        + b1_ref[...]
    )
    # Layer 2: (C_pad, D) contracted against (tile_n, D) -> (C_pad, tile_n),
    # so the store is lane-dense even for n_classes == 1.
    scores = lax.dot_general(
        w2t_ref[...],
        h.astype(w2t_ref.dtype),
        dimension_numbers=(((1,), (1,)), ((), ())),
        preferred_element_type=jnp.float32,
    )
    out_ref[...] = (scores + b2_ref[...]).astype(out_ref.dtype)


def attn_net_forward(x, w1, b1, w2, b2, *, tile_n=512):
    """Pallas implementation of Attn_Net.forward.

    x:  (N, L)  float32
    w1: (L, D)  float32   (PyTorch Linear(L,D).weight, transposed)
    b1: (D,) or (1, D)
    w2: (D, C)  float32   (PyTorch Linear(D,C).weight, transposed)
    b2: (C,) or (1, C)
    returns (A, x) with A: (N, C)
    """
    N, L = x.shape
    D = w1.shape[1]
    C = w2.shape[1]

    # --- host-side layout / dtype prep --------------------------------------
    # Stream x and weights as bf16; keep biases / accumulation / tanh in f32.
    x_bf = x.astype(jnp.bfloat16)
    w1_bf = w1.astype(jnp.bfloat16)

    c_pad = _round_up(C, 8)  # pad class dim to a full sublane group
    w2t_bf = jnp.pad(w2.T.astype(jnp.bfloat16), ((0, c_pad - C), (0, 0)))  # (C_pad, D)
    b1_f = jnp.asarray(b1, jnp.float32).reshape(1, D)
    b2_f = jnp.pad(jnp.asarray(b2, jnp.float32).reshape(C, 1), ((0, c_pad - C), (0, 0)))

    # Large row tiles; pad N up so arbitrary bag sizes work (padded rows sliced off).
    tile_n = max(8, min(int(tile_n), _round_up(N, 256)))
    tile_n = _round_up(tile_n, 8)
    n_pad = _round_up(N, tile_n)
    if n_pad != N:
        x_bf = jnp.pad(x_bf, ((0, n_pad - N), (0, 0)))

    grid = (n_pad // tile_n,)

    # Rough VMEM budget (double-buffered streamed/output tiles + residents + h),
    # capped at 48 MiB so it is valid on v7x's 64 MiB VMEM as well as v5e/v6e.
    vmem_needed = (
        2 * tile_n * L * 2            # x tile (bf16, double-buffered)
        + 2 * L * D * 2               # W1 resident (2 buffers allocated)
        + 2 * c_pad * max(D, 128) * 2 # W2^T resident
        + 2 * 8 * max(D, 128) * 4     # b1 (padded f32 tile)
        + 2 * 8 * 128 * 4             # b2 (padded f32 tile)
        + 2 * c_pad * tile_n * 4      # output tile (f32, double-buffered)
        + tile_n * D * 4              # h intermediate (f32)
    )
    vmem_limit = int(min(48 * 1024 * 1024,
                         max(32 * 1024 * 1024, 2 * vmem_needed)))

    a_t = pl.pallas_call(
        attn_net_kernel,
        out_shape=jax.ShapeDtypeStruct((c_pad, n_pad), jnp.float32),
        grid_spec=pltpu.PrefetchScalarGridSpec(
            num_scalar_prefetch=0,
            grid=grid,
            in_specs=[
                pl.BlockSpec((tile_n, L), lambda i: (i, 0)),   # x tile (streamed)
                pl.BlockSpec((L, D), lambda i: (0, 0)),        # W1 (resident)
                pl.BlockSpec((1, D), lambda i: (0, 0)),        # b1
                pl.BlockSpec((c_pad, D), lambda i: (0, 0)),    # W2^T (resident)
                pl.BlockSpec((c_pad, 1), lambda i: (0, 0)),    # b2
            ],
            out_specs=pl.BlockSpec((c_pad, tile_n), lambda i: (0, i)),
        ),
        compiler_params=pltpu.CompilerParams(
            dimension_semantics=("parallel",),   # shards across both TCs on v7x
            vmem_limit_bytes=vmem_limit,
        ),
    )(x_bf, w1_bf, b1_f, w2t_bf, b2_f)

    a = a_t[:C, :N].T.astype(x.dtype)   # back to (N, C)
    # Module returns (attention_logits, x) — x is just passed through.
    return a, x


def init_params(key, L, D, C, dtype=jnp.float32):
    # Deterministic synthetic init (PyTorch-Linear-style uniform bounds).
    k1, k2, k3, k4 = jax.random.split(key, 4)
    bound1 = 1.0 / jnp.sqrt(L)
    bound2 = 1.0 / jnp.sqrt(D)
    w1 = jax.random.uniform(k1, (L, D), dtype, -bound1, bound1)
    b1 = jax.random.uniform(k2, (1, D), dtype, -bound1, bound1)
    w2 = jax.random.uniform(k3, (D, C), dtype, -bound2, bound2)
    b2 = jax.random.uniform(k4, (1, C), dtype, -bound2, bound2)
    return w1, b1, w2, b2


if __name__ == "__main__":
    # Module defaults: Attn_Net(L=1024, D=256, n_classes=1); N = bag of tokens
    # (deliberately not a multiple of the tile to exercise the padding path).
    N, L, D, C = 1000, 1024, 256, 1

    key = jax.random.PRNGKey(0)
    kx, kp = jax.random.split(key)
    x = jax.random.normal(kx, (N, L), jnp.float32)
    w1, b1, w2, b2 = init_params(kp, L, D, C)

    a, x_out = attn_net_forward(x, w1, b1, w2, b2, tile_n=512)
    jax.block_until_ready((a, x_out))

    # Mixed-precision reference mirroring the kernel's dtype recipe
    # (bf16 operands, f32 accumulation, f32 bias + tanh).
    xb = x.astype(jnp.bfloat16).astype(jnp.float32)
    w1b = w1.astype(jnp.bfloat16).astype(jnp.float32)
    w2b = w2.astype(jnp.bfloat16).astype(jnp.float32)
    h_ref = jnp.tanh(xb @ w1b + b1)
    a_ref = h_ref.astype(jnp.bfloat16).astype(jnp.float32) @ w2b + b2

    assert a.shape == (N, C)
    assert x_out.shape == (N, L)
    assert jnp.allclose(a, a_ref, atol=2e-3, rtol=2e-3), float(
        jnp.max(jnp.abs(a - a_ref))
    )
    assert jnp.array_equal(x_out, x)

    # NOTE: dropout branch of Attn_Net is off by default (dropout=False) and is
    # therefore not part of the forward pass implemented here.
    print("KERNEL_OK")
</pallas_src>

<mosaic_0001>
module attributes {stable_mosaic.version = 11 : i64} {
  func.func @attn_net_kernel(%arg0: i32, %arg1: memref<512x1024xbf16, #tpu.memory_space<vmem>>, %arg2: memref<1024x256xbf16, #tpu.memory_space<vmem>>, %arg3: memref<1x256xf32, #tpu.memory_space<vmem>>, %arg4: memref<8x256xbf16, #tpu.memory_space<vmem>>, %arg5: memref<8x1xf32, #tpu.memory_space<vmem>>, %arg6: memref<8x512xf32, #tpu.memory_space<vmem>>) attributes {dimension_semantics = [#tpu.dimension_semantics<parallel>], iteration_bounds = array<i64: 2>, scalar_prefetch = 0 : i64, scratch_operands = 0 : i64, tpu.core_type = #tpu.core_type<tc>, window_params = [{transform_indices = @transform_0, window_bounds = array<i64: 512, 1024>}, {pipeline_mode = #tpu.pipeline_mode<synchronous>, transform_indices = @transform_1, window_bounds = array<i64: 1024, 256>}, {pipeline_mode = #tpu.pipeline_mode<synchronous>, transform_indices = @transform_2, window_bounds = array<i64: 1, 256>}, {pipeline_mode = #tpu.pipeline_mode<synchronous>, transform_indices = @transform_3, window_bounds = array<i64: 8, 256>}, {pipeline_mode = #tpu.pipeline_mode<synchronous>, transform_indices = @transform_4, window_bounds = array<i64: 8, 1>}, {transform_indices = @transform_5, window_bounds = array<i64: 8, 512>}]} {
    %c0 = arith.constant 0 : index
    %c0_0 = arith.constant 0 : index
    %0 = vector.load %arg1[%c0, %c0_0] : memref<512x1024xbf16, #tpu.memory_space<vmem>>, vector<512x1024xbf16>
    %c0_1 = arith.constant 0 : index
    %c0_2 = arith.constant 0 : index
    %1 = vector.load %arg2[%c0_1, %c0_2] : memref<1024x256xbf16, #tpu.memory_space<vmem>>, vector<1024x256xbf16>
    %cst = arith.constant dense<0.000000e+00> : vector<512x256xf32>
    %2 = tpu.matmul %0, %1, %cst {dimension_numbers = #tpu.dot_dimension_numbers<[1], [0], [0], [1], [0, 0, 1, 1], [], []>} : vector<512x1024xbf16>, vector<1024x256xbf16>, vector<512x256xf32> -> vector<512x256xf32>
    %c0_3 = arith.constant 0 : index
    %c0_4 = arith.constant 0 : index
    %3 = vector.load %arg3[%c0_3, %c0_4] : memref<1x256xf32, #tpu.memory_space<vmem>>, vector<1x256xf32>
    %4 = vector.broadcast %3 : vector<1x256xf32> to vector<512x256xf32>
    %5 = arith.addf %2, %4 : vector<512x256xf32>
    %6 = math.tanh %5 : vector<512x256xf32>
    %c0_5 = arith.constant 0 : index
    %c0_6 = arith.constant 0 : index
    %7 = vector.load %arg4[%c0_5, %c0_6] : memref<8x256xbf16, #tpu.memory_space<vmem>>, vector<8x256xbf16>
    %8 = arith.truncf %6 : vector<512x256xf32> to vector<512x256xbf16>
    %cst_7 = arith.constant dense<0.000000e+00> : vector<8x512xf32>
    %9 = tpu.matmul %7, %8, %cst_7 {dimension_numbers = #tpu.dot_dimension_numbers<[1], [1], [0], [0], [0, 0, 1, 0], [], []>} : vector<8x256xbf16>, vector<512x256xbf16>, vector<8x512xf32> -> vector<8x512xf32>
    %c0_8 = arith.constant 0 : index
    %c0_9 = arith.constant 0 : index
    %10 = vector.load %arg5[%c0_8, %c0_9] : memref<8x1xf32, #tpu.memory_space<vmem>>, vector<8x1xf32>
    %11 = vector.broadcast %10 : vector<8x1xf32> to vector<8x512xf32>
    %12 = arith.addf %9, %11 : vector<8x512xf32>
    %c0_10 = arith.constant 0 : index
    %c0_11 = arith.constant 0 : index
    %13 = vector.load %arg6[%c0_10, %c0_11] : memref<8x512xf32, #tpu.memory_space<vmem>>, vector<8x512xf32>
    tpu.vector_store %arg6[%c0_10, %c0_11], %12 {strides = array<i32>} : memref<8x512xf32, #tpu.memory_space<vmem>>, vector<8x512xf32>,
    return
  }
  func.func @transform_0(%arg0: i32) -> (i32, i32) {
    %c0_i32 = arith.constant 0 : i32
    %c0_i32_0 = arith.constant 0 : i32
    return %arg0, %c0_i32 : i32, i32
  }
  func.func @transform_1(%arg0: i32) -> (i32, i32) {
    %c0_i32 = arith.constant 0 : i32
    %c0_i32_0 = arith.constant 0 : i32
    %c0_i32_1 = arith.constant 0 : i32
    return %c0_i32, %c0_i32_0 : i32, i32
  }
  func.func @transform_2(%arg0: i32) -> (i32, i32) {
    %c0_i32 = arith.constant 0 : i32
    %c0_i32_0 = arith.constant 0 : i32
    %c0_i32_1 = arith.constant 0 : i32
    return %c0_i32, %c0_i32_0 : i32, i32
  }
  func.func @transform_3(%arg0: i32) -> (i32, i32) {
    %c0_i32 = arith.constant 0 : i32
    %c0_i32_0 = arith.constant 0 : i32
    %c0_i32_1 = arith.constant 0 : i32
    return %c0_i32, %c0_i32_0 : i32, i32
  }
  func.func @transform_4(%arg0: i32) -> (i32, i32) {
    %c0_i32 = arith.constant 0 : i32
    %c0_i32_0 = arith.constant 0 : i32
    %c0_i32_1 = arith.constant 0 : i32
    return %c0_i32, %c0_i32_0 : i32, i32
  }
  func.func @transform_5(%arg0: i32) -> (i32, i32) {
    %c0_i32 = arith.constant 0 : i32
    %c0_i32_0 = arith.constant 0 : i32
    return %c0_i32, %arg0 : i32, i32
  }
}

</mosaic_0001>

<bundles_post_ra>
// kernel: tpu_custom_call.1
= control target key start
LH: loop header
LB: loop body
LE: loop exit
PB: predicated region body
PF: predicated region fallthrough
CT: control target
= control target key end

     0   :  { %10 = vsyncpa [#allocation3], 0  ;;  %s7322_s0 = inlined_call_operand.hbm [shape: bf16[1024,1024], index: 0, kind: input, shape index: {}]   ;;  %s7323_s1 = inlined_call_operand.hbm [shape: bf16[1024,256], index: 1, kind: input, shape index: {}]   ;;  %s7324_s2 = inlined_call_operand.hbm [shape: f32[1,256], index: 2, kind: input, shape index: {}]   ;;  %s7325_s3 = inlined_call_operand.hbm [shape: bf16[8,256], index: 3, kind: input, shape index: {}]   ;;  %s7326_s4 = inlined_call_operand.vmem [shape: f32[8,1], index: 4, kind: input, shape index: {}]   ;;  %s7327_s5 = inlined_call_operand.hbm [shape: f32[8,1024], index: 5, kind: output, shape index: {}]  }
   0x1   :  { %12 = vsyncpa [#allocation3 + $0x1], 0 }
   0x2   :  { %13 = vsyncpa [#allocation6], 0 }
   0x3   :  { %14 = vsyncpa [#allocation9], 0 }
   0x4   :  { %15 = vsyncpa [#allocation4], 0 }
   0x5   :  { %17 = vsyncpa [#allocation4 + $0x1], 0  ;;  %s6137_s18 = smov 0   ;;  %s6139_s19 = smov 0  }
   0x6   :  { %s6141_s20 = smov 0   ;;  %s6143_s21 = smov 0  }
   0x7 LB: > { %s6158_s22 = sadd.s32 4294967295, %s6095_s21   ;;  %s4420_s23 = sadd.s32 4294967294, %s6095_s21   ;;  %s6095_s21 = sphi %s6143_s21, %s7433_s21   ;;  %s6091_s20 = sphi %s6141_s20, %s7432_s20   ;;  %s6087_s19 = sphi %s6139_s19, %s7431_s19   ;;  %s6083_s18 = sphi %s6137_s18, %s7430_s18  }
   0x8   : > { %p43_p0 = scmp.ne.s32.totalorder %s6087_s19, %s6083_s18  ;;  %p7328_p1 = scmp.eq.s32.totalorder %s6158_s22, 0 }
   0x9   : > { %p157_p3 = scmp.eq.s32.totalorder %s4420_s23, 1  ;;  %p4421_p5 = scmp.ge.s32.totalorder %s6095_s21, 1 }
   0xa   : > { %p6167_p4 = por %p7328_p1, %p43_p0  ;;  %p164_p7 = scmp.lt.s32.totalorder %s6095_s21, 3 }
   0xb   : > { %p6172_p6 = por %p157_p3, %p43_p0  ;;  %s6097_s27 = smov [#allocation5]  }
   0xc   : > { %s7332_s24 = scalar_select %p6167_p4, 1, 0 }
   0xd   : > { %s7333_s25 = scalar_select %p6172_p6, 1, 0 }
   0xe   : > { %p6177_p8 = pnand %p4421_p5, %p164_p7  ;;  %s176_s28 = sshll.u32 %s6097_s27, 4  ;;  %s6181_s28 = int_to_ptr.vmem [resolvable:$true] %s176_s28 }
   0xf   : > { %s6098_s30 = smov [#allocation7]   ;;  %s6099_s7 = smov [#allocation8]  }
  0x10   : > { %s7334_s26 = scalar_select %p6177_p8, 1, 0 }
  0x11   : > { %p5390_p9 = pneg %p6177_p8  ;;  %s190_s6 = sshll.u32 %s6098_s30, 4  ;;  %s6192_s6 = int_to_ptr.vmem [resolvable:$true] %s190_s6 }
  0x12   : > { %s6194_s8 = sshll.u32 %s6099_s7, 4  ;;  %s5907_s11 = scalar_lea.hbm %s7323_s1, 16384  ;;  %s202_s8 = int_to_ptr.vmem [resolvable:$true] %s6194_s8 }
  0x13   : > { %p6188_p11 = pnand %p5390_p9, %p7328_p1  ;;  %p5908_p12 = scmp.ne.s32.totalorder %s7323_s1, %s5907_s11 }
  0x14   : > { %p5914_p5 = scmp.lt.u32.totalorder %s5907_s11, %s7323_s1 }
  0x15   : > { %p6204_p13 = pneg %p6188_p11 }
  0x17   : > { %p5910_p0 = pnand %p6204_p13, %p5908_p12 }
  0x19   : > { %p5911_p3 = pneg %p5910_p0 }
  0x1b   : > { %p5916_p7 = pnand %p5914_p5, %p5911_p3 }
  0x1d   : > { %5919 = shalt.err (!%p5916_p7)
}
  0x1e   : > { %s5920_s17 = scalar_lea.vmem %s6181_s28, 16384  ;;  %p5928_p2 = scmp.lt.s32.totalorder %s6181_s28, %s6181_s28 }
  0x1f   : > { %p5921_p9 = scmp.ne.s32.totalorder %s6181_s28, %s5920_s17  ;;  %p5929_p6 = scmp.lt.s32.totalorder %s5920_s17, %s5920_s17 }
  0x21   : > { %p5923_p10 = pnand %p5921_p9, %p6204_p13  ;;  %p5930_p12 = por %p5929_p6, %p5928_p2 }
  0x23   : > { %p5924_p1 = pneg %p5923_p10 }
  0x25   : > { %p5931_p0 = pnand %p5930_p12, %p5924_p1 }
  0x27   : > { %5934 = shalt.err (!%p5931_p0)
}
  0x28   : > { %s6100_s23 = smov 128   ;;  %s6101_s27 = smov 8  }
  0x29   : > { %5393 = dma.hbm_to_vmem [thread:$0]  (!%p6188_p11), %s7323_s1, 16384, %s6181_s28, [#allocation6], %s6100_s23, %s6100_s23, %s6101_s27  }
  0x2a   : > { %s5935_s11 = scalar_lea.hbm %s7324_s2, 32 }
  0x2b   : > { %p5936_p2 = scmp.ne.s32.totalorder %s7324_s2, %s5935_s11  ;;  %p5942_p10 = scmp.lt.u32.totalorder %s5935_s11, %s7324_s2 }
  0x2d   : > { %p5938_p1 = pnand %p5936_p2, %p6204_p13 }
  0x2f   : > { %p5939_p6 = pneg %p5938_p1 }
  0x31   : > { %p5944_p3 = pnand %p5942_p10, %p5939_p6 }
  0x33   : > { %5947 = shalt.err (!%p5944_p3)
}
  0x34   : > { %s5948_s28 = scalar_lea.vmem %s6192_s6, 32  ;;  %p5956_p12 = scmp.lt.s32.totalorder %s6192_s6, %s6192_s6 }
  0x35   : > { %p5949_p5 = scmp.ne.s32.totalorder %s6192_s6, %s5948_s28  ;;  %p5957_p0 = scmp.lt.s32.totalorder %s5948_s28, %s5948_s28 }
  0x37   : > { %p5951_p7 = pnand %p5949_p5, %p6204_p13  ;;  %p5958_p2 = por %p5957_p0, %p5956_p12 }
  0x39   : > { %p5952_p9 = pneg %p5951_p7 }
  0x3b   : > { %p5959_p1 = pnand %p5958_p2, %p5952_p9 }
  0x3d   : > { %5962 = shalt.err (!%p5959_p1)
}
  0x3e   : > { %5396 = dma.hbm_to_vmem [thread:$0]  (!%p6188_p11), %s7324_s2, 32, %s6192_s6, [#allocation6]  }
  0x3f   : > { %s5963_s7 = scalar_lea.hbm %s7325_s3, 128 }
  0x40   : > { %p5964_p6 = scmp.ne.s32.totalorder %s7325_s3, %s5963_s7  ;;  %p5970_p5 = scmp.lt.u32.totalorder %s5963_s7, %s7325_s3 }
  0x42   : > { %p5966_p10 = pnand %p5964_p6, %p6204_p13 }
  0x44   : > { %p5967_p3 = pneg %p5966_p10 }
  0x46   : > { %p5972_p7 = pnand %p5970_p5, %p5967_p3 }
  0x48   : > { %5975 = shalt.err (!%p5972_p7)
}
  0x49   : > { %s5976_s13 = scalar_lea.vmem %s202_s8, 128  ;;  %p5984_p2 = scmp.lt.s32.totalorder %s202_s8, %s202_s8 }
  0x4a   : > { %p5977_p9 = scmp.ne.s32.totalorder %s202_s8, %s5976_s13  ;;  %p5985_p1 = scmp.lt.s32.totalorder %s5976_s13, %s5976_s13 }
  0x4c   : > { %p5979_p12 = pnand %p5977_p9, %p6204_p13  ;;  %p5986_p4 = por %p5985_p1, %p5984_p2 }
  0x4e   : > { %p5980_p0 = pneg %p5979_p12 }
  0x50   : > { %p5987_p8 = pnand %p5986_p4, %p5980_p0 }
  0x52   : > { %5990 = shalt.err (!%p5987_p8)
}
  0x53   : > { %5399 = dma.hbm_to_vmem [thread:$0]  (!%p6188_p11), %s7325_s3, 128, %s202_s8, [#allocation9]  }
  0x54   : > { %s6268_s14 = sadd.s32 1, %s6095_s21   ;;  %s30_s29 = sadd.s32 1, %s6091_s20 }
  0x55   : > { %s27_s16 = ssub.s32 %s6095_s21, %s6268_s14  ;;  %p37_p8 = scmp.ne.s32.totalorder %s6091_s20, %s6087_s19 }
  0x56   : > { %p28_p4 = scmp.eq.s32.totalorder %s27_s16, 0  ;;  %p38_p13 = scmp.eq.s32.totalorder %s6095_s21, 0 }
  0x57   : > { %p5411_p6 = scmp.lt.s32.totalorder %s6095_s21, 2  ;;  %p7337_p3 = scmp.eq.s32.totalorder %s6158_s22, 1 }
  0x58   : > { %s6278_s28 = scalar_select %p28_p4, %s6091_s20, %s30_s29  }
  0x59   : > { %p39_p10 = por %p38_p13, %p37_p8  ;;  %p6282_p5 = por %p7337_p3, %p37_p8 }
  0x5a   : > { %s215_s23 = sand.u32 1, %s6091_s20   ;;  %s4828_s27 = sshll.u32 %s6095_s21, 15 }
  0x5b   : > { %s4426_s8 = sshll.u32 %s215_s23, 11  ;;  %s6291_s9 = scalar_lea.hbm %s7322_s0, %s4828_s27 }
  0x5c   : > { %s219_s10 = scalar_lea.vmem [#allocation2], %s4426_s8  ;;  %p6293_p11 = pnand %p5411_p6, %p39_p10 }
  0x5d   : > { %s227_s11 = sshll.u32 %s219_s10, 4  ;;  %s6299_s13 = scalar_lea.sflag [#allocation3], %s215_s23  ;;  %s6297_s11 = int_to_ptr.vmem [resolvable:$true] %s227_s11 }
  0x5e   : > { %s5991_s6 = scalar_lea.hbm %s6291_s9, 32768  ;;  %p5993_p9 = pneg %p6293_p11 }
  0x5f   : > { %p5992_p7 = scmp.ne.s32.totalorder %s6291_s9, %s5991_s6  ;;  %s5996_s29 = scalar_lea.hbm %s7322_s0, 65536 }
  0x60   : > { %p5997_p2 = scmp.lt.u32.totalorder %s6291_s9, %s7322_s0  ;;  %p5998_p1 = scmp.lt.u32.totalorder %s5996_s29, %s5991_s6 }
  0x61   : > { %p5994_p12 = pnand %p5993_p9, %p5992_p7  ;;  %p6000_p8 = scmp.lt.u32.totalorder %s5991_s6, %s6291_s9 }
  0x62   : > { %p5999_p4 = por %p5998_p1, %p5997_p2 }
  0x63   : > { %p5995_p0 = pneg %p5994_p12 }
  0x64   : > { %p6001_p13 = por %p6000_p8, %p5999_p4 }
  0x66   : > { %p6002_p6 = pnand %p6001_p13, %p5995_p0 }
  0x68   : > { %6005 = shalt.err (!%p6002_p6)
}
  0x69   : > { %s6006_s23 = scalar_lea.vmem %s6297_s11, 32768  ;;  %s6102_s30 = smov [#allocation2]  }
  0x6a   : > { %p6007_p10 = scmp.ne.s32.totalorder %s6297_s11, %s6006_s23  ;;  %s6011_s7 = sshll.u32 %s6102_s30, 4  ;;  %s6012_s7 = int_to_ptr.vmem [resolvable:$false] %s6011_s7 }
  0x6b   : > { %s6013_s10 = scalar_lea.vmem %s6012_s7, 65536  ;;  %p6014_p12 = scmp.lt.s32.totalorder %s6297_s11, %s6012_s7 }
  0x6c   : > { %p6009_p3 = pnand %p6007_p10, %p5993_p9  ;;  %p6015_p2 = scmp.lt.s32.totalorder %s6013_s10, %s6006_s23 }
  0x6e   : > { %p6010_p7 = pneg %p6009_p3  ;;  %p6016_p1 = por %p6015_p2, %p6014_p12 }
  0x70   : > { %p6017_p4 = pnand %p6016_p1, %p6010_p7 }
  0x72   : > { %6020 = shalt.err (!%p6017_p4)
}
  0x73   : > { %s6103_s6 = smov 512   ;;  %s6104_s15 = smov 32  }
  0x74   : > { %5403 = dma.hbm_to_vmem [thread:$0]  (!%p6293_p11), %s6291_s9, 32768, %s6297_s11, %s6299_s13, %s6103_s6, %s6103_s6, %s6104_s15  }
  0x75   : > { %p7340_p9 = scmp.ne.s32.totalorder %s7334_s26, 0 }
  0x77   : > { %239 = sbr.rel (%p7340_p9) target bundleno = 1238 (0x4d6), region = 40 }
  0x7e   : > { %s6330_s16 = sand.u32 1, %s6087_s19   ;;  %p7341_p0 = scmp.ne.s32.totalorder %s7332_s24, 0 }
  0x7f   : > { %s4431_s29 = sshll.u32 %s6330_s16, 11  ;;  %s242_s27 = scalar_lea.sflag [#allocation3], %s6330_s16 }
  0x80   : > { %s6334_s8 = scalar_lea.vmem [#allocation2], %s4431_s29 }
  0x81   : > { %6066 = dma.done.wait (%p7341_p0), %s242_s27, 32768  }
  0x82   : > { %6068 = vsyncadd (%p7341_p0), %s242_s27, 4294934528  ;;  %p7342_p11 = scmp.eq.s32.totalorder %s6158_s22, 0 }
  0x84   : > { %6070 = dma.done.wait (%p7342_p11), [#allocation6], 16416   ;;  %p7343_p8 = pmov %p7342_p11 }
  0x86   : > { %6072 = vsyncadd (%p7343_p8), [#allocation6], 4294950880  ;;  %p7344_p13 = pmov %p7343_p8 }
  0x87   : > { %p7345_p6 = pmov %p7343_p8 }
  0x88   : > { %6074 = dma.done.wait (%p7344_p13), [#allocation9], 128  }
  0x89   : > { %6076 = vsyncadd (%p7345_p6), [#allocation9], 4294967168  ;;  %v5457_v0 = vld [vmem:[#allocation5 + $0x4] ss:$8 sps:$4 sm:$0xff]   ;;  %v5461_v2 = vld [vmem:[#allocation5] ss:$8 sps:$4 sm:$0xff]  }
  0x8a   : > { %v6348_v1 = vld [vmem:[#allocation5 + $0x104] ss:$8 sps:$4 sm:$0xff]   ;;  %2602 = vmatprep.subr.bf16.mxu1 %v5457_v0  ;;  %v6350_v3 = vld [vmem:[#allocation5 + $0x100] ss:$8 sps:$4 sm:$0xff]   ;;  %v5463_v4 = vld [vmem:[#allocation5 + $0x14] ss:$8 sps:$4 sm:$0xff]  }
  0x8b   : > { %2955 = vmatprep.subr.bf16.mxu0 %v6348_v1  ;;  %2603 = vmatpush1.bf16.msra.mxu1 %v5461_v2  ;;  %v6354_v5 = vld [vmem:[#allocation5 + $0x114] ss:$8 sps:$4 sm:$0xff]   ;;  %v5467_v6 = vld [vmem:[#allocation5 + $0x10] ss:$8 sps:$4 sm:$0xff]   ;;  %v5469_v8 = vld [vmem:[#allocation5 + $0x24] ss:$8 sps:$4 sm:$0xff]  }
  0x8c   : > { %2956 = vmatpush1.bf16.msra.mxu0 %v6350_v3  ;;  %2604 = vmatprep.subr.bf16.mxu1 %v5463_v4  ;;  %v6356_v7 = vld [vmem:[#allocation5 + $0x110] ss:$8 sps:$4 sm:$0xff]   ;;  %v6359_v9 = vld [vmem:[#allocation5 + $0x124] ss:$8 sps:$4 sm:$0xff]   ;;  %v5473_v10 = vld [vmem:[#allocation5 + $0x20] ss:$8 sps:$4 sm:$0xff]  }
  0x8d   : > { %2957 = vmatprep.subr.bf16.mxu0 %v6354_v5  ;;  %v6361_v11 = vld [vmem:[#allocation5 + $0x120] ss:$8 sps:$4 sm:$0xff]   ;;  %v5475_v12 = vld [vmem:[#allocation5 + $0x34] ss:$8 sps:$4 sm:$0xff]   ;;  %v5479_v14 = vld [vmem:[#allocation5 + $0x30] ss:$8 sps:$4 sm:$0xff]  }
  0x8e   : > { %v6365_v13 = vld [vmem:[#allocation5 + $0x134] ss:$8 sps:$4 sm:$0xff]   ;;  %v6368_v15 = vld [vmem:[#allocation5 + $0x130] ss:$8 sps:$4 sm:$0xff]   ;;  %v5481_v16 = vld [vmem:[#allocation5 + $0x44] ss:$8 sps:$4 sm:$0xff]  }
  0x8f   : > { %2605 = vmatpush1.bf16.msra.mxu1 %v5467_v6  ;;  %v6371_v17 = vld [vmem:[#allocation5 + $0x144] ss:$8 sps:$4 sm:$0xff]   ;;  %v5485_v18 = vld [vmem:[#allocation5 + $0x40] ss:$8 sps:$4 sm:$0xff]   ;;  %v5487_v20 = vld [vmem:[#allocation5 + $0x54] ss:$8 sps:$4 sm:$0xff]  }
  0x90   : > { %2958 = vmatpush1.bf16.msra.mxu0 %v6356_v7  ;;  %2606 = vmatprep.subr.bf16.mxu1 %v5469_v8  ;;  %v6373_v19 = vld [vmem:[#allocation5 + $0x140] ss:$8 sps:$4 sm:$0xff]   ;;  %v6377_v21 = vld [vmem:[#allocation5 + $0x154] ss:$8 sps:$4 sm:$0xff]   ;;  %v5491_v22 = vld [vmem:[#allocation5 + $0x50] ss:$8 sps:$4 sm:$0xff]  }
  0x91   : > { %2959 = vmatprep.subr.bf16.mxu0 %v6359_v9  ;;  %v6380_v23 = vld [vmem:[#allocation5 + $0x150] ss:$8 sps:$4 sm:$0xff]   ;;  %v5493_v24 = vld [vmem:[#allocation5 + $0x64] ss:$8 sps:$4 sm:$0xff]   ;;  %v5497_v26 = vld [vmem:[#allocation5 + $0x60] ss:$8 sps:$4 sm:$0xff]  }
  0x92   : > { %v6383_v25 = vld [vmem:[#allocation5 + $0x164] ss:$8 sps:$4 sm:$0xff]   ;;  %v6385_v27 = vld [vmem:[#allocation5 + $0x160] ss:$8 sps:$4 sm:$0xff]   ;;  %v5499_v28 = vld [vmem:[#allocation5 + $0x74] ss:$8 sps:$4 sm:$0xff]  }
  0x93   : > { %2607 = vmatpush1.bf16.msra.mxu1 %v5473_v10  ;;  %v6389_v29 = vld [vmem:[#allocation5 + $0x174] ss:$8 sps:$4 sm:$0xff]   ;;  %v5503_v30 = vld [vmem:[#allocation5 + $0x70] ss:$8 sps:$4 sm:$0xff]   ;;  %v5505_v32 = vld [vmem:[#allocation5 + $0x84] ss:$8 sps:$4 sm:$0xff]  }
  0x94   : > { %2960 = vmatpush1.bf16.msra.mxu0 %v6361_v11  ;;  %2608 = vmatprep.subr.bf16.mxu1 %v5475_v12  ;;  %v6392_v31 = vld [vmem:[#allocation5 + $0x170] ss:$8 sps:$4 sm:$0xff]   ;;  %v6395_v33 = vld [vmem:[#allocation5 + $0x184] ss:$8 sps:$4 sm:$0xff]   ;;  %v5509_v34 = vld [vmem:[#allocation5 + $0x80] ss:$8 sps:$4 sm:$0xff]  }
  0x95   : > { %2961 = vmatprep.subr.bf16.mxu0 %v6365_v13  ;;  %v6397_v35 = vld [vmem:[#allocation5 + $0x180] ss:$8 sps:$4 sm:$0xff]   ;;  %v5511_v36 = vld [vmem:[#allocation5 + $0x94] ss:$8 sps:$4 sm:$0xff]   ;;  %v5515_v38 = vld [vmem:[#allocation5 + $0x90] ss:$8 sps:$4 sm:$0xff]  }
  0x96   : > { %v6401_v37 = vld [vmem:[#allocation5 + $0x194] ss:$8 sps:$4 sm:$0xff]   ;;  %v6404_v39 = vld [vmem:[#allocation5 + $0x190] ss:$8 sps:$4 sm:$0xff]   ;;  %v5517_v40 = vld [vmem:[#allocation5 + $0xa4] ss:$8 sps:$4 sm:$0xff]  }
  0x97   : > { %2609 = vmatpush1.bf16.msra.mxu1 %v5479_v14  ;;  %v6407_v41 = vld [vmem:[#allocation5 + $0x1a4] ss:$8 sps:$4 sm:$0xff]   ;;  %v5521_v42 = vld [vmem:[#allocation5 + $0xa0] ss:$8 sps:$4 sm:$0xff]   ;;  %v5523_v44 = vld [vmem:[#allocation5 + $0xb4] ss:$8 sps:$4 sm:$0xff]  }
  0x98   : > { %2962 = vmatpush1.bf16.msra.mxu0 %v6368_v15  ;;  %2610 = vmatprep.subr.bf16.mxu1 %v5481_v16  ;;  %v6409_v43 = vld [vmem:[#allocation5 + $0x1a0] ss:$8 sps:$4 sm:$0xff]   ;;  %v6413_v45 = vld [vmem:[#allocation5 + $0x1b4] ss:$8 sps:$4 sm:$0xff]   ;;  %v5527_v46 = vld [vmem:[#allocation5 + $0xb0] ss:$8 sps:$4 sm:$0xff]  }
  0x99   : > { %2963 = vmatprep.subr.bf16.mxu0 %v6371_v17  ;;  %v6415_v47 = vld [vmem:[#allocation5 + $0x1b0] ss:$8 sps:$4 sm:$0xff]   ;;  %v286_v48 = vld [vmem:[%s6334_s8] sm:$0xff]  ;;  %v287_v50 = vld [vmem:[%s6334_s8 + $0x8] sm:$0xff]  ;;  %s4435_s9 = sshll.u32 %s6330_s16, 5  ;;  %s4829_s12 = sshll.u32 %s6158_s22, 9 }
  0x9a   : > { %v290_v49 = vld [vmem:[%s6334_s8 + $0x20] sm:$0xff]  ;;  %v291_v51 = vld [vmem:[%s6334_s8 + $0x28] sm:$0xff]  ;;  %v5535_v58 = vld [vmem:[#allocation5 + $0xd4] ss:$8 sps:$4 sm:$0xff]   ;;  %s283_s11 = scalar_lea.vmem [#allocation10], %s4435_s9  ;;  %s7278_s7 = scalar_lea.hbm %s7327_s5, %s4829_s12 }
  0x9b   : > { %2611 = vmatpush1.bf16.msra.mxu1 %v5485_v18  ;;  %v5529_v52 = vld [vmem:[#allocation5 + $0xc4] ss:$8 sps:$4 sm:$0xff]   ;;  %v4437_v53 = vcombine.high %v286_v48, %v290_v49  ;;  %v4439_v55 = vcombine.high %v287_v50, %v291_v51  ;;  %v5533_v56 = vld [vmem:[#allocation5 + $0xc0] ss:$8 sps:$4 sm:$0xff]   ;;  %v6429_v59 = vld [vmem:[#allocation5 + $0x1d4] ss:$8 sps:$4 sm:$0xff]  }
  0x9c   : > { %2964 = vmatpush1.bf16.msra.mxu0 %v6373_v19  ;;  %2612 = vmatprep.subr.bf16.mxu1 %v5487_v20  ;;  %v6423_v54 = vld [vmem:[#allocation5 + $0x1c4] ss:$8 sps:$4 sm:$0xff]   ;;  %v6425_v57 = vld [vmem:[#allocation5 + $0x1c0] ss:$8 sps:$4 sm:$0xff]   ;;  %v5539_v60 = vld [vmem:[#allocation5 + $0xd0] ss:$8 sps:$4 sm:$0xff]  }
  0x9d   : > { %2965 = vmatprep.subr.bf16.mxu0 %v6377_v21  ;;  %2634 = vmatprep.mubr.bf16.mxu1 %v4437_v53  ;;  %v6431_v61 = vld [vmem:[#allocation5 + $0x1d0] ss:$8 sps:$4 sm:$0xff]   ;;  %v5541_v62 = vld [vmem:[#allocation5 + $0xe4] ss:$8 sps:$4 sm:$0xff]   ;;  %v5545_v0 = vld [vmem:[#allocation5 + $0xe0] ss:$8 sps:$4 sm:$0xff]  }
  0x9e   : > { %2987 = vmatprep.mubr.bf16.mxu0 %v4439_v55  ;;  %v6435_v63 = vld [vmem:[#allocation5 + $0x1e4] ss:$8 sps:$4 sm:$0xff]   ;;  %v6437_v2 = vld [vmem:[#allocation5 + $0x1e0] ss:$8 sps:$4 sm:$0xff]   ;;  %v5547_v4 = vld [vmem:[#allocation5 + $0xf4] ss:$8 sps:$4 sm:$0xff]  }
  0x9f   : > { %2613 = vmatpush1.bf16.msra.mxu1 %v5491_v22  ;;  %v6441_v6 = vld [vmem:[#allocation5 + $0x1f4] ss:$8 sps:$4 sm:$0xff]   ;;  %v5551_v8 = vld [vmem:[#allocation5 + $0xf0] ss:$8 sps:$4 sm:$0xff]   ;;  %v5555_v12 = vld [vmem:[#allocation5 + $0x204] ss:$8 sps:$4 sm:$0xff]   ;;  %v4436_v22 = vcombine.low %v286_v48, %v290_v49 }
  0xa0   : > { %2966 = vmatpush1.bf16.msra.mxu0 %v6380_v23  ;;  %2614 = vmatprep.subr.bf16.mxu1 %v5493_v24  ;;  %v6443_v10 = vld [vmem:[#allocation5 + $0x1f0] ss:$8 sps:$4 sm:$0xff]   ;;  %v294_v14 = vld [vmem:[%s6334_s8 + $0x40] sm:$0xff]  ;;  %v295_v18 = vld [vmem:[%s6334_s8 + $0x48] sm:$0xff]  ;;  %v4438_v24 = vcombine.low %v287_v50, %v291_v51  ;;  %s4321_s13 = sshll.u32 %s283_s11, 4  ;;  %s4307_s22 = scalar_lea.sflag [#allocation4], %s6330_s16  ;;  %s7280_s13 = int_to_ptr.vmem [resolvable:$true] %s4321_s13 }
  0xa1   : > { %2967 = vmatprep.subr.bf16.mxu0 %v6383_v25  ;;  %v298_v16 = vld [vmem:[%s6334_s8 + $0x60] sm:$0xff]  ;;  %v299_v20 = vld [vmem:[%s6334_s8 + $0x68] sm:$0xff]  ;;  %v5564_v50 = vld [vmem:[#allocation5 + $0x234] ss:$8 sps:$4 sm:$0xff]   ;;  %s6021_s10 = scalar_lea.vmem %s7280_s13, 512  ;;  %s6106_s6 = smov [#allocation10]  }
  0xa2   : > { %v4446_v48 = vcombine.low %v295_v18, %v299_v20  ;;  %v314_v53 = vld [vmem:[%s6334_s8 + $0xe0] sm:$0xff]  ;;  %v311_v55 = vld [vmem:[%s6334_s8 + $0xc8] sm:$0xff]  ;;  %p6022_p10 = scmp.ne.s32.totalorder %s7280_s13, %s6021_s10  ;;  %s6025_s15 = sshll.u32 %s6106_s6, 4  ;;  %s6026_s15 = int_to_ptr.vmem [resolvable:$false] %s6025_s15 }
  0xa3   : > { %2615 = vmatpush1.bf16.msra.mxu1 %v5497_v26  ;;  %v5553_v26 = vld [vmem:[#allocation5 + $0x200] ss:$8 sps:$4 sm:$0xff]   ;;  %s6027_s29 = scalar_lea.vmem %s6026_s15, 1024  ;;  %p6028_p12 = scmp.lt.s32.totalorder %s7280_s13, %s6026_s15 }
  0xa4   : > { %2968 = vmatpush1.bf16.msra.mxu0 %v6385_v27  ;;  %2616 = vmatprep.subr.bf16.mxu1 %v5499_v28  ;;  %v4445_v28 = vcombine.high %v294_v14, %v298_v16  ;;  %p6023_p3 = pnand %p6022_p10, %p6282_p5  ;;  %p6029_p2 = scmp.lt.s32.totalorder %s6027_s29, %s6021_s10 }
  0xa5   : > { %2969 = vmatprep.subr.bf16.mxu0 %v6389_v29 }
  0xa6   : > { %p6024_p7 = pneg %p6023_p3  ;;  %p6030_p1 = por %p6029_p2, %p6028_p12 }
  0xa7   : > { %2617 = vmatpush1.bf16.msra.mxu1 %v5503_v30  ;;  %v5558_v30 = vld [vmem:[#allocation5 + $0x214] ss:$8 sps:$4 sm:$0xff]  }
  0xa8   : > { %2970 = vmatpush1.bf16.msra.mxu0 %v6392_v31  ;;  %2618 = vmatprep.subr.bf16.mxu1 %v5505_v32  ;;  %v4447_v32 = vcombine.high %v295_v18, %v299_v20  ;;  %p6031_p4 = pnand %p6030_p1, %p6024_p7 }
  0xa9   : > { %2971 = vmatprep.subr.bf16.mxu0 %v6395_v33 }
  0xab   : > { %2619 = vmatpush1.bf16.msra.mxu1 %v5509_v34  ;;  %v5556_v34 = vld [vmem:[#allocation5 + $0x210] ss:$8 sps:$4 sm:$0xff]  }
  0xac   : > { %2972 = vmatpush1.bf16.msra.mxu0 %v6397_v35  ;;  %2620 = vmatprep.subr.bf16.mxu1 %v5511_v36  ;;  %v5561_v36 = vld [vmem:[#allocation5 + $0x224] ss:$8 sps:$4 sm:$0xff]  }
  0xad   : > { %2973 = vmatprep.subr.bf16.mxu0 %v6401_v37 }
  0xaf   : > { %2621 = vmatpush1.bf16.msra.mxu1 %v5515_v38  ;;  %v302_v38 = vld [vmem:[%s6334_s8 + $0x80] sm:$0xff] }
  0xb0   : > { %2974 = vmatpush1.bf16.msra.mxu0 %v6404_v39  ;;  %2622 = vmatprep.subr.bf16.mxu1 %v5517_v40  ;;  %v306_v40 = vld [vmem:[%s6334_s8 + $0xa0] sm:$0xff] }
  0xb1   : > { %2975 = vmatprep.subr.bf16.mxu0 %v6407_v41  ;;  %v4453_v49 = vcombine.high %v302_v38, %v306_v40 }
  0xb3   : > { %2623 = vmatpush1.bf16.msra.mxu1 %v5521_v42  ;;  %v303_v42 = vld [vmem:[%s6334_s8 + $0x88] sm:$0xff] }
  0xb4   : > { %2976 = vmatpush1.bf16.msra.mxu0 %v6409_v43  ;;  %2624 = vmatprep.subr.bf16.mxu1 %v5523_v44  ;;  %v307_v44 = vld [vmem:[%s6334_s8 + $0xa8] sm:$0xff] }
  0xb5   : > { %2977 = vmatprep.subr.bf16.mxu0 %v6413_v45  ;;  %v4455_v51 = vcombine.high %v303_v42, %v307_v44 }
  0xb7   : > { %2625 = vmatpush1.bf16.msra.mxu1 %v5527_v46  ;;  %v4444_v46 = vcombine.low %v294_v14, %v298_v16  ;;  %v319_v14 = vld [vmem:[%s6334_s8 + $0x108] sm:$0xff] }
  0xb8   : > { %2978 = vmatpush1.bf16.msra.mxu0 %v6415_v47  ;;  %2626 = vmatprep.subr.bf16.mxu1 %v5529_v52  ;;  %v310_v52 = vld [vmem:[%s6334_s8 + $0xc0] sm:$0xff]  ;;  %v323_v16 = vld [vmem:[%s6334_s8 + $0x128] sm:$0xff] }
  0xb9   : > { %2979 = vmatprep.subr.bf16.mxu0 %v6423_v54  ;;  %v4460_v18 = vcombine.low %v310_v52, %v314_v53 }
  0xbb   : > { %2627 = vmatpush1.bf16.msra.mxu1 %v5533_v56  ;;  %v315_v56 = vld [vmem:[%s6334_s8 + $0xe8] sm:$0xff] }
  0xbc   : > { %2980 = vmatpush1.bf16.msra.mxu0 %v6425_v57  ;;  %2628 = vmatprep.subr.bf16.mxu1 %v5535_v58  ;;  %v4452_v58 = vcombine.low %v302_v38, %v306_v40  ;;  %v4462_v20 = vcombine.low %v311_v55, %v315_v56  ;;  %v4470_v38 = vcombine.low %v319_v14, %v323_v16  ;;  %v5577_v40 = vld [vmem:[#allocation5 + $0x280] ss:$8 sps:$4 sm:$0xff]  }
  0xbd   : > { %2981 = vmatprep.subr.bf16.mxu0 %v6429_v59 }
  0xbf   : > { %2629 = vmatpush1.bf16.msra.mxu1 %v5539_v60  ;;  %v4454_v60 = vcombine.low %v303_v42, %v307_v44 }
  0xc0   : > { %2982 = vmatpush1.bf16.msra.mxu0 %v6431_v61  ;;  %2630 = vmatprep.subr.bf16.mxu1 %v5541_v62  ;;  %v4461_v62 = vcombine.high %v310_v52, %v314_v53  ;;  %v5586_v53 = vld [vmem:[#allocation5 + $0x2b0] ss:$8 sps:$4 sm:$0xff]  }
  0xc1   : > { %2983 = vmatprep.subr.bf16.mxu0 %v6435_v63 }
  0xc3   : > { %2631 = vmatpush1.bf16.msra.mxu1 %v5545_v0  ;;  %v5570_v0 = vld [vmem:[#allocation5 + $0x254] ss:$8 sps:$4 sm:$0xff]  }
  0xc4   : > { %2984 = vmatpush1.bf16.msra.mxu0 %v6437_v2  ;;  %2632 = vmatprep.subr.bf16.mxu1 %v5547_v4  ;;  %v4463_v4 = vcombine.high %v311_v55, %v315_v56  ;;  %v342_v55 = vld [vmem:[%s6334_s8 + $0x1c0] sm:$0xff] }
  0xc5   : > { %2985 = vmatprep.subr.bf16.mxu0 %v6441_v6  ;;  %v346_v56 = vld [vmem:[%s6334_s8 + $0x1e0] sm:$0xff] }
  0xc7   : > { %2633 = vmatpush1.bf16.msra.mxu1 %v5551_v8  ;;  %v318_v8 = vld [vmem:[%s6334_s8 + $0x100] sm:$0xff] }
  0xc8   : > { %2986 = vmatpush1.bf16.msra.mxu0 %v6443_v10  ;;  %4830 = vmatprep.subr.bf16.mxu1 %v6348_v1  ;;  %v5559_v1 = vld [vmem:[#allocation5 + $0x220] ss:$8 sps:$4 sm:$0xff]  }
  0xc9   : > { %3308 = vmatprep.subr.bf16.mxu0 %v5555_v12  ;;  %v322_v12 = vld [vmem:[%s6334_s8 + $0x120] sm:$0xff] }
  0xca   : > { %2635 = vmatmul.mubr.bf16.vlgmr.msra.gmra.mrb[0].mxu1 %v4436_v22  ;;  %v4469_v22 = vcombine.high %v318_v8, %v322_v12 }
  0xcb   : > { %2988 = vmatmul.mubr.bf16.vlgmr.msra.gmra.mrb[0].mxu0 %v4438_v24  ;;  %2644 = vmatprep.mubr.bf16.mxu1 %v4445_v28  ;;  %v5576_v24 = vld [vmem:[#allocation5 + $0x274] ss:$8 sps:$4 sm:$0xff]   ;;  %v326_v28 = vld [vmem:[%s6334_s8 + $0x140] sm:$0xff] }
  0xcc   : > { %3309 = vmatpush1.bf16.msra.mxu0 %v5553_v26  ;;  %2997 = vmatprep.mubr.bf16.mxu0 %v4447_v32  ;;  %v4471_v26 = vcombine.high %v319_v14, %v323_v16  ;;  %v327_v32 = vld [vmem:[%s6334_s8 + $0x148] sm:$0xff]  ;;  %v4492_v14 = vcombine.low %v342_v55, %v346_v56 }
  0xcd   : > { %3310 = vmatprep.subr.bf16.mxu0 %v5558_v30  ;;  %4846 = vmatpush1.bf16.msra.mxu1 %v6350_v3  ;;  %v5562_v3 = vld [vmem:[#allocation5 + $0x230] ss:$8 sps:$4 sm:$0xff]   ;;  %v330_v30 = vld [vmem:[%s6334_s8 + $0x160] sm:$0xff] }
  0xce   : > { %4831 = vmatprep.subr.bf16.mxu1 %v6354_v5  ;;  %v5567_v5 = vld [vmem:[#allocation5 + $0x244] ss:$8 sps:$4 sm:$0xff]   ;;  %v4477_v42 = vcombine.high %v326_v28, %v330_v30  ;;  %v5595_v16 = vld [vmem:[#allocation5 + $0x2e0] ss:$8 sps:$4 sm:$0xff]  }
  0xd0   : > { %3311 = vmatpush1.bf16.msra.mxu0 %v5556_v34  ;;  %v331_v34 = vld [vmem:[%s6334_s8 + $0x168] sm:$0xff] }
  0xd1   : > { %3312 = vmatprep.subr.bf16.mxu0 %v5561_v36  ;;  %4847 = vmatpush1.bf16.msra.mxu1 %v6356_v7  ;;  %v5565_v7 = vld [vmem:[#allocation5 + $0x240] ss:$8 sps:$4 sm:$0xff]   ;;  %v4468_v36 = vcombine.low %v318_v8, %v322_v12  ;;  %v4479_v44 = vcombine.high %v327_v32, %v331_v34  ;;  %v288_v8 = vld [vmem:[%s6334_s8 + $0x10] sm:$0xff] }
  0xd2   : > { %2645 = vmatmul.mubr.bf16.gmra.mrb[4].mxu1 %v4444_v46  ;;  %4832 = vmatprep.subr.bf16.mxu1 %v6359_v9  ;;  %v5568_v9 = vld [vmem:[#allocation5 + $0x250] ss:$8 sps:$4 sm:$0xff]  }
  0xd3   : > { %2998 = vmatmul.mubr.bf16.gmra.mrb[4].mxu0 %v4446_v48  ;;  %2654 = vmatprep.mubr.bf16.mxu1 %v4453_v49  ;;  %v5580_v46 = vld [vmem:[#allocation5 + $0x290] ss:$8 sps:$4 sm:$0xff]   ;;  %v5585_v48 = vld [vmem:[#allocation5 + $0x2a4] ss:$8 sps:$4 sm:$0xff]  }
  0xd4   : > { %3313 = vmatpush1.bf16.msra.mxu0 %v5559_v1  ;;  %3007 = vmatprep.mubr.bf16.mxu0 %v4455_v51  ;;  %v338_v1 = vld [vmem:[%s6334_s8 + $0x1a0] sm:$0xff]  ;;  %v335_v49 = vld [vmem:[%s6334_s8 + $0x188] sm:$0xff]  ;;  %v292_v12 = vld [vmem:[%s6334_s8 + $0x30] sm:$0xff] }
  0xd5   : > { %3314 = vmatprep.subr.bf16.mxu0 %v5564_v50  ;;  %4848 = vmatpush1.bf16.msra.mxu1 %v6361_v11  ;;  %v5573_v11 = vld [vmem:[#allocation5 + $0x264] ss:$8 sps:$4 sm:$0xff]   ;;  %v5583_v51 = vld [vmem:[#allocation5 + $0x2a0] ss:$8 sps:$4 sm:$0xff]  }
  0xd6   : > { %4833 = vmatprep.subr.bf16.mxu1 %v6365_v13  ;;  %v5571_v13 = vld [vmem:[#allocation5 + $0x260] ss:$8 sps:$4 sm:$0xff]  }
  0xd7   : > { %v339_v50 = vld [vmem:[%s6334_s8 + $0x1a8] sm:$0xff] }
  0xd8   : > { %3315 = vmatpush1.bf16.msra.mxu0 %v5562_v3  ;;  %v4478_v3 = vcombine.low %v327_v32, %v331_v34  ;;  %v4487_v52 = vcombine.high %v335_v49, %v339_v50  ;;  %v5601_v32 = vld [vmem:[#allocation5 + $0x300] ss:$8 sps:$4 sm:$0xff]   ;;  %v5606_v34 = vld [vmem:[#allocation5 + $0x314] ss:$8 sps:$4 sm:$0xff]  }
  0xd9   : > { %3316 = vmatprep.subr.bf16.mxu0 %v5567_v5  ;;  %4849 = vmatpush1.bf16.msra.mxu1 %v6368_v15  ;;  %v5574_v15 = vld [vmem:[#allocation5 + $0x270] ss:$8 sps:$4 sm:$0xff]  }
  0xda   : > { %2655 = vmatmul.mubr.bf16.gmra.mrb[8].mxu1 %v4452_v58  ;;  %4834 = vmatprep.subr.bf16.mxu1 %v6371_v17  ;;  %v5579_v17 = vld [vmem:[#allocation5 + $0x284] ss:$8 sps:$4 sm:$0xff]  }
  0xdb   : > { %3008 = vmatmul.mubr.bf16.gmra.mrb[8].mxu0 %v4454_v60  ;;  %2664 = vmatprep.mubr.bf16.mxu1 %v4461_v62  ;;  %v343_v58 = vld [vmem:[%s6334_s8 + $0x1c8] sm:$0xff]  ;;  %v4493_v62 = vcombine.high %v342_v55, %v346_v56 }
  0xdc   : > { %3317 = vmatpush1.bf16.msra.mxu0 %v5565_v7  ;;  %3017 = vmatprep.mubr.bf16.mxu0 %v4463_v4  ;;  %v4486_v7 = vcombine.low %v335_v49, %v339_v50  ;;  %v316_v49 = vld [vmem:[%s6334_s8 + $0xf0] sm:$0xff] }
  0xdd   : > { %3318 = vmatprep.subr.bf16.mxu0 %v5570_v0  ;;  %4850 = vmatpush1.bf16.msra.mxu1 %v6373_v19  ;;  %v5582_v19 = vld [vmem:[#allocation5 + $0x294] ss:$8 sps:$4 sm:$0xff]   ;;  %v5610_v50 = vld [vmem:[#allocation5 + $0x330] ss:$8 sps:$4 sm:$0xff]  }
  0xde   : > { %4835 = vmatprep.subr.bf16.mxu1 %v6377_v21  ;;  %v334_v21 = vld [vmem:[%s6334_s8 + $0x180] sm:$0xff]  ;;  %v5594_v0 = vld [vmem:[#allocation5 + $0x2d4] ss:$8 sps:$4 sm:$0xff]  }
  0xdf   : > { %v4485_v5 = vcombine.high %v334_v21, %v338_v1  ;;  %v4484_v60 = vcombine.low %v334_v21, %v338_v1  ;;  %v5612_v21 = vld [vmem:[#allocation5 + $0x334] ss:$8 sps:$4 sm:$0xff]  }
  0xe0   : > { %3319 = vmatpush1.bf16.msra.mxu0 %v5568_v9  ;;  %v350_v9 = vld [vmem:[%s6334_s8 + $0x200] sm:$0xff]  ;;  %v312_v1 = vld [vmem:[%s6334_s8 + $0xd0] sm:$0xff] }
  0xe1   : > { %3320 = vmatprep.subr.bf16.mxu0 %v5573_v11  ;;  %4851 = vmatpush1.bf16.msra.mxu1 %v6380_v23  ;;  %v4476_v23 = vcombine.low %v326_v28, %v330_v30  ;;  %v354_v11 = vld [vmem:[%s6334_s8 + $0x220] sm:$0xff]  ;;  %v4464_v56 = vcombine.low %v312_v1, %v316_v49 }
  0xe2   : > { %2665 = vmatmul.mubr.bf16.gmra.mrb[12].mxu1 %v4460_v18  ;;  %4836 = vmatprep.subr.bf16.mxu1 %v6383_v25  ;;  %v5588_v25 = vld [vmem:[#allocation5 + $0x2b4] ss:$8 sps:$4 sm:$0xff]   ;;  %v4501_v18 = vcombine.high %v350_v9, %v354_v11  ;;  %v4500_v28 = vcombine.low %v350_v9, %v354_v11  ;;  %v398_v11 = vld [vmem:[%s6334_s8 + $0x380] sm:$0xff] }
  0xe3   : > { %3018 = vmatmul.mubr.bf16.gmra.mrb[12].mxu0 %v4462_v20  ;;  %2674 = vmatprep.mubr.bf16.mxu1 %v4469_v22  ;;  %v5600_v20 = vld [vmem:[#allocation5 + $0x2f4] ss:$8 sps:$4 sm:$0xff]   ;;  %v358_v22 = vld [vmem:[%s6334_s8 + $0x240] sm:$0xff] }
  0xe4   : > { %3321 = vmatpush1.bf16.msra.mxu0 %v5571_v13  ;;  %3027 = vmatprep.mubr.bf16.mxu0 %v4471_v26  ;;  %v4441_v13 = vcombine.high %v288_v8, %v292_v12  ;;  %v300_v26 = vld [vmem:[%s6334_s8 + $0x70] sm:$0xff] }
  0xe5   : > { %3322 = vmatprep.subr.bf16.mxu0 %v5576_v24  ;;  %4852 = vmatpush1.bf16.msra.mxu1 %v6385_v27  ;;  %v5591_v27 = vld [vmem:[#allocation5 + $0x2c4] ss:$8 sps:$4 sm:$0xff]  }
  0xe6   : > { %4837 = vmatprep.subr.bf16.mxu1 %v6389_v29  ;;  %v347_v29 = vld [vmem:[%s6334_s8 + $0x1e8] sm:$0xff]  ;;  %v362_v24 = vld [vmem:[%s6334_s8 + $0x260] sm:$0xff] }
  0xe7   : > { %v4495_v4 = vcombine.high %v343_v58, %v347_v29 }
  0xe8   : > { %3323 = vmatpush1.bf16.msra.mxu0 %v5574_v15  ;;  %v5603_v15 = vld [vmem:[#allocation5 + $0x304] ss:$8 sps:$4 sm:$0xff]  }
  0xe9   : > { %3324 = vmatprep.subr.bf16.mxu0 %v5579_v17  ;;  %4853 = vmatpush1.bf16.msra.mxu1 %v6392_v31  ;;  %v5589_v31 = vld [vmem:[#allocation5 + $0x2c0] ss:$8 sps:$4 sm:$0xff]   ;;  %v4440_v17 = vcombine.low %v288_v8, %v292_v12  ;;  %v336_v12 = vld [vmem:[%s6334_s8 + $0x190] sm:$0xff] }
  0xea   : > { %2675 = vmatmul.mubr.bf16.gmra.mrb[16].mxu1 %v4468_v36  ;;  %4838 = vmatprep.subr.bf16.mxu1 %v6395_v33  ;;  %v5592_v33 = vld [vmem:[#allocation5 + $0x2d0] ss:$8 sps:$4 sm:$0xff]   ;;  %v370_v36 = vld [vmem:[%s6334_s8 + $0x2a0] sm:$0xff] }
  0xeb   : > { %3028 = vmatmul.mubr.bf16.gmra.mrb[16].mxu0 %v4470_v38  ;;  %2684 = vmatprep.mubr.bf16.mxu1 %v4477_v42  ;;  %v304_v38 = vld [vmem:[%s6334_s8 + $0x90] sm:$0xff]  ;;  %v402_v8 = vld [vmem:[%s6334_s8 + $0x3a0] sm:$0xff] }
  0xec   : > { %3325 = vmatpush1.bf16.msra.mxu0 %v5577_v40  ;;  %3037 = vmatprep.mubr.bf16.mxu0 %v4479_v44  ;;  %v308_v40 = vld [vmem:[%s6334_s8 + $0xb0] sm:$0xff] }
  0xed   : > { %3326 = vmatprep.subr.bf16.mxu0 %v5582_v19  ;;  %4854 = vmatpush1.bf16.msra.mxu1 %v6397_v35  ;;  %v5597_v35 = vld [vmem:[#allocation5 + $0x2e4] ss:$8 sps:$4 sm:$0xff]   ;;  %v5604_v19 = vld [vmem:[#allocation5 + $0x310] ss:$8 sps:$4 sm:$0xff]  }
  0xee   : > { %4839 = vmatprep.subr.bf16.mxu1 %v6401_v37  ;;  %v4494_v37 = vcombine.low %v343_v58, %v347_v29  ;;  %v390_v29 = vld [vmem:[%s6334_s8 + $0x340] sm:$0xff] }
  0xf0   : > { %3327 = vmatpush1.bf16.msra.mxu0 %v5580_v46  ;;  %v4457_v46 = vcombine.high %v304_v38, %v308_v40 }
  0xf1   : > { %3328 = vmatprep.subr.bf16.mxu0 %v5585_v48  ;;  %4855 = vmatpush1.bf16.msra.mxu1 %v6404_v39  ;;  %v5598_v39 = vld [vmem:[#allocation5 + $0x2f0] ss:$8 sps:$4 sm:$0xff]   ;;  %v5607_v48 = vld [vmem:[#allocation5 + $0x320] ss:$8 sps:$4 sm:$0xff]  }
  0xf2   : > { %2685 = vmatmul.mubr.bf16.gmra.mrb[20].mxu1 %v4476_v23  ;;  %4840 = vmatprep.subr.bf16.mxu1 %v6407_v41  ;;  %v296_v41 = vld [vmem:[%s6334_s8 + $0x50] sm:$0xff] }
  0xf3   : > { %3038 = vmatmul.mubr.bf16.gmra.mrb[20].mxu0 %v4478_v3  ;;  %2694 = vmatprep.mubr.bf16.mxu1 %v4485_v5  ;;  %v4449_v30 = vcombine.high %v296_v41, %v300_v26  ;;  %v4448_v42 = vcombine.low %v296_v41, %v300_v26  ;;  %v4465_v3 = vcombine.high %v312_v1, %v316_v49  ;;  %v5618_v5 = vld [vmem:[#allocation5 + $0x354] ss:$8 sps:$4 sm:$0xff]   ;;  %v430_v49 = vld [vmem:[%s6334_s8 + $0x480] sm:$0xff] }
  0xf4   : > { %3329 = vmatpush1.bf16.msra.mxu0 %v5583_v51  ;;  %3047 = vmatprep.mubr.bf16.mxu0 %v4487_v52  ;;  %v5615_v51 = vld [vmem:[#allocation5 + $0x344] ss:$8 sps:$4 sm:$0xff]   ;;  %v348_v41 = vld [vmem:[%s6334_s8 + $0x1f0] sm:$0xff] }
  0xf5   : > { %3330 = vmatprep.subr.bf16.mxu0 %v5588_v25  ;;  %4856 = vmatpush1.bf16.msra.mxu1 %v6409_v43  ;;  %v4509_v43 = vcombine.high %v358_v22, %v362_v24  ;;  %v5613_v25 = vld [vmem:[#allocation5 + $0x340] ss:$8 sps:$4 sm:$0xff]   ;;  %v5624_v26 = vld [vmem:[#allocation5 + $0x374] ss:$8 sps:$4 sm:$0xff]  }
  0xf6   : > { %4841 = vmatprep.subr.bf16.mxu1 %v6413_v45  ;;  %v366_v45 = vld [vmem:[%s6334_s8 + $0x280] sm:$0xff] }
  0xf7   : > { %v4517_v44 = vcombine.high %v366_v45, %v370_v36  ;;  %v386_v52 = vld [vmem:[%s6334_s8 + $0x320] sm:$0xff] }
  0xf8   : > { %3331 = vmatpush1.bf16.msra.mxu0 %v5586_v53  ;;  %v324_v53 = vld [vmem:[%s6334_s8 + $0x130] sm:$0xff] }
  0xf9   : > { %3332 = vmatprep.subr.bf16.mxu0 %v5591_v27  ;;  %4857 = vmatpush1.bf16.msra.mxu1 %v6415_v47  ;;  %v5609_v47 = vld [vmem:[#allocation5 + $0x324] ss:$8 sps:$4 sm:$0xff]   ;;  %v5616_v27 = vld [vmem:[#allocation5 + $0x350] ss:$8 sps:$4 sm:$0xff]  }
  0xfa   : > { %2695 = vmatmul.mubr.bf16.gmra.mrb[24].mxu1 %v4484_v60  ;;  %4842 = vmatprep.subr.bf16.mxu1 %v6423_v54  ;;  %v4508_v54 = vcombine.low %v358_v22, %v362_v24  ;;  %v394_v60 = vld [vmem:[%s6334_s8 + $0x360] sm:$0xff]  ;;  %v5622_v22 = vld [vmem:[#allocation5 + $0x370] ss:$8 sps:$4 sm:$0xff]  }
  0xfb   : > { %3048 = vmatmul.mubr.bf16.gmra.mrb[24].mxu0 %v4486_v7  ;;  %2704 = vmatprep.mubr.bf16.mxu1 %v4493_v62  ;;  %v5619_v7 = vld [vmem:[#allocation5 + $0x360] ss:$8 sps:$4 sm:$0xff]   ;;  %v332_v62 = vld [vmem:[%s6334_s8 + $0x170] sm:$0xff] }
  0xfc   : > { %3333 = vmatpush1.bf16.msra.mxu0 %v5589_v31  ;;  %3057 = vmatprep.mubr.bf16.mxu0 %v4495_v4  ;;  %v328_v31 = vld [vmem:[%s6334_s8 + $0x150] sm:$0xff] }
  0xfd   : > { %3334 = vmatprep.subr.bf16.mxu0 %v5594_v0  ;;  %4858 = vmatpush1.bf16.msra.mxu1 %v6425_v57  ;;  %v374_v57 = vld [vmem:[%s6334_s8 + $0x2c0] sm:$0xff]  ;;  %v4481_v9 = vcombine.high %v328_v31, %v332_v62  ;;  %v344_v24 = vld [vmem:[%s6334_s8 + $0x1d0] sm:$0xff] }
  0xfe   : > { %4843 = vmatprep.subr.bf16.mxu1 %v6429_v59  ;;  %v378_v59 = vld [vmem:[%s6334_s8 + $0x2e0] sm:$0xff] }
  0xff   : > { %v4525_v23 = vcombine.high %v374_v57, %v378_v59  ;;  %v4524_v55 = vcombine.low %v374_v57, %v378_v59  ;;  %v5621_v0 = vld [vmem:[#allocation5 + $0x364] ss:$8 sps:$4 sm:$0xff]  }
 0x100   : > { %3335 = vmatpush1.bf16.msra.mxu0 %v5592_v33 }
 0x101   : > { %3336 = vmatprep.subr.bf16.mxu0 %v5597_v35  ;;  %4859 = vmatpush1.bf16.msra.mxu1 %v6431_v61  ;;  %v4516_v61 = vcombine.low %v366_v45, %v370_v36  ;;  %v4541_v35 = vcombine.high %v390_v29, %v394_v60  ;;  %v356_v45 = vld [vmem:[%s6334_s8 + $0x230] sm:$0xff] }
 0x102   : > { %2705 = vmatmul.mubr.bf16.gmra.mrb[28].mxu1 %v4492_v14  ;;  %4844 = vmatprep.subr.bf16.mxu1 %v6435_v63  ;;  %v4456_v63 = vcombine.low %v304_v38, %v308_v40  ;;  %v340_v14 = vld [vmem:[%s6334_s8 + $0x1b0] sm:$0xff]  ;;  %v4496_v38 = vcombine.low %v344_v24, %v348_v41 }
 0x103   : > { %3058 = vmatmul.mubr.bf16.gmra.mrb[28].mxu0 %v4494_v37  ;;  %2714 = vmatprep.mubr.bf16.mxu1 %v4501_v18  ;;  %v4540_v37 = vcombine.low %v390_v29, %v394_v60  ;;  %v4549_v18 = vcombine.high %v398_v11, %v402_v8  ;;  %v446_v29 = vld [vmem:[%s6334_s8 + $0x500] sm:$0xff] }
 0x104   : > { %3337 = vmatpush1.bf16.msra.mxu0 %v5595_v16  ;;  %3340 = vmatprep.mubr.bf16.mxu0 %v4441_v13  ;;  %v4480_v16 = vcombine.low %v328_v31, %v332_v62  ;;  %v406_v13 = vld [vmem:[%s6334_s8 + $0x3c0] sm:$0xff]  ;;  %v388_v31 = vld [vmem:[%s6334_s8 + $0x330] sm:$0xff] }
 0x105   : > { %3338 = vmatprep.subr.bf16.mxu0 %v5600_v20  ;;  %4860 = vmatpush1.bf16.msra.mxu1 %v6437_v2  ;;  %v382_v2 = vld [vmem:[%s6334_s8 + $0x300] sm:$0xff]  ;;  %v4489_v20 = vcombine.high %v336_v12, %v340_v14 }
 0x106   : > { %4845 = vmatprep.subr.bf16.mxu1 %v6441_v6  ;;  %v320_v6 = vld [vmem:[%s6334_s8 + $0x110] sm:$0xff]  ;;  %v4532_v4 = vcombine.low %v382_v2, %v386_v52  ;;  %v450_v60 = vld [vmem:[%s6334_s8 + $0x520] sm:$0xff] }
 0x107   : > { %v4473_v58 = vcombine.high %v320_v6, %v324_v53  ;;  %v4472_v33 = vcombine.low %v320_v6, %v324_v53  ;;  %v376_v6 = vld [vmem:[%s6334_s8 + $0x2d0] sm:$0xff] }
 0x108   : > { %3339 = vmatpush1.bf16.msra.mxu0 %v5598_v39  ;;  %v410_v39 = vld [vmem:[%s6334_s8 + $0x3e0] sm:$0xff]  ;;  %v380_v53 = vld [vmem:[%s6334_s8 + $0x2f0] sm:$0xff] }
 0x109   : > { %3661 = vmatprep.subr.bf16.mxu0 %v5603_v15  ;;  %4861 = vmatpush1.bf16.msra.mxu1 %v6443_v10  ;;  %v4533_v10 = vcombine.high %v382_v2, %v386_v52  ;;  %v4548_v15 = vcombine.low %v398_v11, %v402_v8  ;;  %v4556_v36 = vcombine.low %v406_v13, %v410_v39  ;;  %v442_v2 = vld [vmem:[%s6334_s8 + $0x4e0] sm:$0xff]  ;;  %v5628_v52 = vld [vmem:[#allocation5 + $0x390] ss:$8 sps:$4 sm:$0xff]  }
 0x10a   : > { %2715 = vmatmul.mubr.bf16.gmra.mrb[32].mxu1 %v4500_v28  ;;  %v4557_v28 = vcombine.high %v406_v13, %v410_v39  ;;  %v5631_v11 = vld [vmem:[#allocation5 + $0x3a0] ss:$8 sps:$4 sm:$0xff]   ;;  %v392_v8 = vld [vmem:[%s6334_s8 + $0x350] sm:$0xff] }
 0x10b   : > { %3341 = vmatmul.mubr.bf16.vlgmr.msra.gmra.mrb[0].mxu0 %v4440_v17  ;;  %2724 = vmatprep.mubr.bf16.mxu1 %v4509_v43  ;;  %v4488_v17 = vcombine.low %v336_v12, %v340_v14  ;;  %v4497_v43 = vcombine.high %v344_v24, %v348_v41  ;;  %v396_v12 = vld [vmem:[%s6334_s8 + $0x370] sm:$0xff]  ;;  %v5633_v14 = vld [vmem:[#allocation5 + $0x3a4] ss:$8 sps:$4 sm:$0xff]  }
 0x10c   : > { %3350 = vmatprep.mubr.bf16.mxu0 %v4449_v30  ;;  %3662 = vmatpush1.bf16.msra.mxu0 %v5601_v32  ;;  %v414_v30 = vld [vmem:[%s6334_s8 + $0x400] sm:$0xff]  ;;  %v404_v24 = vld [vmem:[%s6334_s8 + $0x3b0] sm:$0xff] }
 0x10d   : > { %3663 = vmatprep.subr.bf16.mxu0 %v5606_v34  ;;  %v418_v32 = vld [vmem:[%s6334_s8 + $0x420] sm:$0xff]  ;;  %v352_v34 = vld [vmem:[%s6334_s8 + $0x210] sm:$0xff] }
 0x10e   : > { %v4565_v40 = vcombine.high %v414_v30, %v418_v32  ;;  %v4504_v57 = vcombine.low %v352_v34, %v356_v45  ;;  %v462_v13 = vld [vmem:[%s6334_s8 + $0x580] sm:$0xff] }
 0x10f   : > { %v466_v39 = vld [vmem:[%s6334_s8 + $0x5a0] sm:$0xff] }
 0x110   : > { %3664 = vmatpush1.bf16.msra.mxu0 %v5604_v19  ;;  %v4505_v19 = vcombine.high %v352_v34, %v356_v45  ;;  %v408_v34 = vld [vmem:[%s6334_s8 + $0x3d0] sm:$0xff] }
 0x111   : > { %3665 = vmatprep.subr.bf16.mxu0 %v5609_v47  ;;  %v422_v47 = vld [vmem:[%s6334_s8 + $0x440] sm:$0xff]  ;;  %v412_v45 = vld [vmem:[%s6334_s8 + $0x3f0] sm:$0xff] }
 0x112   : > { %2725 = vmatmul.mubr.bf16.gmra.mrb[36].mxu1 %v4508_v54  ;;  %v426_v54 = vld [vmem:[%s6334_s8 + $0x460] sm:$0xff] }
 0x113   : > { %3351 = vmatmul.mubr.bf16.gmra.mrb[4].mxu0 %v4448_v42  ;;  %2734 = vmatprep.mubr.bf16.mxu1 %v4517_v44  ;;  %v5625_v42 = vld [vmem:[#allocation5 + $0x380] ss:$8 sps:$4 sm:$0xff]   ;;  %v360_v44 = vld [vmem:[%s6334_s8 + $0x250] sm:$0xff]  ;;  %v4573_v59 = vcombine.high %v422_v47, %v426_v54 }
 0x114   : > { %3360 = vmatprep.mubr.bf16.mxu0 %v4457_v46  ;;  %3666 = vmatpush1.bf16.msra.mxu0 %v5607_v48  ;;  %v364_v46 = vld [vmem:[%s6334_s8 + $0x270] sm:$0xff]  ;;  %v5627_v48 = vld [vmem:[#allocation5 + $0x384] ss:$8 sps:$4 sm:$0xff]  }
 0x115   : > { %3667 = vmatprep.subr.bf16.mxu0 %v5612_v21  ;;  %v4564_v21 = vcombine.low %v414_v30, %v418_v32  ;;  %v4513_v1 = vcombine.high %v360_v44, %v364_v46  ;;  %v470_v30 = vld [vmem:[%s6334_s8 + $0x5c0] sm:$0xff] }
 0x116   : > { %v474_v32 = vld [vmem:[%s6334_s8 + $0x5e0] sm:$0xff] }
 0x118   : > { %3668 = vmatpush1.bf16.msra.mxu0 %v5610_v50  ;;  %v434_v50 = vld [vmem:[%s6334_s8 + $0x4a0] sm:$0xff] }
 0x119   : > { %3669 = vmatprep.subr.bf16.mxu0 %v5615_v51  ;;  %v368_v51 = vld [vmem:[%s6334_s8 + $0x290] sm:$0xff] }
 0x11a   : > { %2735 = vmatmul.mubr.bf16.gmra.mrb[40].mxu1 %v4516_v61  ;;  %v372_v61 = vld [vmem:[%s6334_s8 + $0x2b0] sm:$0xff] }
 0x11b   : > { %3361 = vmatmul.mubr.bf16.gmra.mrb[8].mxu0 %v4456_v63  ;;  %2744 = vmatprep.mubr.bf16.mxu1 %v4525_v23  ;;  %v4572_v63 = vcombine.low %v422_v47, %v426_v54  ;;  %v4512_v23 = vcombine.low %v360_v44, %v364_v46  ;;  %v5639_v47 = vld [vmem:[#allocation5 + $0x3c4] ss:$8 sps:$4 sm:$0xff]   ;;  %v5637_v54 = vld [vmem:[#allocation5 + $0x3c0] ss:$8 sps:$4 sm:$0xff]  }
 0x11c   : > { %3370 = vmatprep.mubr.bf16.mxu0 %v4465_v3  ;;  %3670 = vmatpush1.bf16.msra.mxu0 %v5613_v25  ;;  %v4581_v3 = vcombine.high %v430_v49, %v434_v50  ;;  %v4521_v25 = vcombine.high %v368_v51, %v372_v61  ;;  %v478_v44 = vld [vmem:[%s6334_s8 + $0x600] sm:$0xff] }
 0x11d   : > { %3671 = vmatprep.subr.bf16.mxu0 %v5618_v5  ;;  %v438_v5 = vld [vmem:[%s6334_s8 + $0x4c0] sm:$0xff] }
 0x11e   : > { %v4588_v62 = vcombine.low %v438_v5, %v442_v2  ;;  %v482_v46 = vld [vmem:[%s6334_s8 + $0x620] sm:$0xff] }
 0x120   : > { %3672 = vmatpush1.bf16.msra.mxu0 %v5616_v27  ;;  %v5630_v27 = vld [vmem:[#allocation5 + $0x394] ss:$8 sps:$4 sm:$0xff]  }
 0x121   : > { %3673 = vmatprep.subr.bf16.mxu0 %v5621_v0  ;;  %v4528_v0 = vcombine.low %v376_v6, %v380_v53 }
 0x122   : > { %2745 = vmatmul.mubr.bf16.gmra.mrb[44].mxu1 %v4524_v55  ;;  %v4580_v55 = vcombine.low %v430_v49, %v434_v50  ;;  %v4629_v49 = vcombine.high %v478_v44, %v482_v46 }
 0x123   : > { %3371 = vmatmul.mubr.bf16.gmra.mrb[12].mxu0 %v4464_v56  ;;  %2754 = vmatprep.mubr.bf16.mxu1 %v4533_v10  ;;  %v4520_v56 = vcombine.low %v368_v51, %v372_v61  ;;  %v4589_v10 = vcombine.high %v438_v5, %v442_v2  ;;  %v5645_v51 = vld [vmem:[#allocation5 + $0x3e4] ss:$8 sps:$4 sm:$0xff]   ;;  %v5643_v61 = vld [vmem:[#allocation5 + $0x3e0] ss:$8 sps:$4 sm:$0xff]   ;;  %v428_v5 = vld [vmem:[%s6334_s8 + $0x470] sm:$0xff] }
 0x124   : > { %3380 = vmatprep.mubr.bf16.mxu0 %v4473_v58  ;;  %3674 = vmatpush1.bf16.msra.mxu0 %v5619_v7  ;;  %v4529_v58 = vcombine.high %v376_v6, %v380_v53  ;;  %v384_v7 = vld [vmem:[%s6334_s8 + $0x310] sm:$0xff] }
 0x125   : > { %3675 = vmatprep.subr.bf16.mxu0 %v5624_v26  ;;  %v4544_v26 = vcombine.low %v392_v8, %v396_v12  ;;  %v5646_v2 = vld [vmem:[#allocation5 + $0x3f0] ss:$8 sps:$4 sm:$0xff]  }
 0x128   : > { %3676 = vmatpush1.bf16.msra.mxu0 %v5622_v22  ;;  %v400_v22 = vld [vmem:[%s6334_s8 + $0x390] sm:$0xff] }
 0x129   : > { %3677 = vmatprep.subr.bf16.mxu0 %v5627_v48  ;;  %v416_v48 = vld [vmem:[%s6334_s8 + $0x410] sm:$0xff] }
 0x12a   : > { %2755 = vmatmul.mubr.bf16.gmra.mrb[48].mxu1 %v4532_v4  ;;  %v4597_v4 = vcombine.high %v446_v29, %v450_v60 }
 0x12b   : > { %3381 = vmatmul.mubr.bf16.gmra.mrb[16].mxu0 %v4472_v33  ;;  %2764 = vmatprep.mubr.bf16.mxu1 %v4541_v35  ;;  %v4537_v33 = vcombine.high %v384_v7, %v388_v31  ;;  %v454_v35 = vld [vmem:[%s6334_s8 + $0x540] sm:$0xff] }
 0x12c   : > { %3390 = vmatprep.mubr.bf16.mxu0 %v4481_v9  ;;  %3678 = vmatpush1.bf16.msra.mxu0 %v5625_v42  ;;  %v458_v9 = vld [vmem:[%s6334_s8 + $0x560] sm:$0xff]  ;;  %v5642_v42 = vld [vmem:[#allocation5 + $0x3d4] ss:$8 sps:$4 sm:$0xff]  }
 0x12d   : > { %3679 = vmatprep.subr.bf16.mxu0 %v5630_v27  ;;  %v4604_v41 = vcombine.low %v454_v35, %v458_v9 }
 0x130   : > { %3680 = vmatpush1.bf16.msra.mxu0 %v5628_v52  ;;  %v4628_v52 = vcombine.low %v478_v44, %v482_v46  ;;  %v468_v44 = vld [vmem:[%s6334_s8 + $0x5b0] sm:$0xff] }
 0x131   : > { %3681 = vmatprep.subr.bf16.mxu0 %v5633_v14  ;;  %v514_v14 = vld [vmem:[%s6334_s8 + $0x720] sm:$0xff] }
 0x132   : > { %2765 = vmatmul.mubr.bf16.gmra.mrb[52].mxu1 %v4540_v37  ;;  %v4596_v37 = vcombine.low %v446_v29, %v450_v60 }
 0x133   : > { %3391 = vmatmul.mubr.bf16.gmra.mrb[20].mxu0 %v4480_v16  ;;  %2774 = vmatprep.mubr.bf16.mxu1 %v4549_v18  ;;  %v4536_v16 = vcombine.low %v384_v7, %v388_v31  ;;  %v4605_v18 = vcombine.high %v454_v35, %v458_v9 }
 0x134   : > { %3400 = vmatprep.mubr.bf16.mxu0 %v4489_v20  ;;  %v4545_v20 = vcombine.high %v392_v8, %v396_v12  ;;  %3682 = vmatpush1.bf16.msra.mxu0 %v5631_v11  ;;  %v510_v12 = vld [vmem:[%s6334_s8 + $0x700] sm:$0xff] }
 0x13a   : > { %2775 = vmatmul.mubr.bf16.gmra.mrb[56].mxu1 %v4548_v15  ;;  %v4613_v15 = vcombine.high %v462_v13, %v466_v39 }
 0x13b   : > { %3401 = vmatmul.mubr.bf16.gmra.mrb[24].mxu0 %v4488_v17  ;;  %2784 = vmatprep.mubr.bf16.mxu1 %v4557_v28  ;;  %v4553_v17 = vcombine.high %v400_v22, %v404_v24  ;;  %v5634_v28 = vld [vmem:[#allocation5 + $0x3b0] ss:$8 sps:$4 sm:$0xff]  }
 0x13c   : > { %3410 = vmatprep.mubr.bf16.mxu0 %v4497_v43  ;;  %v5636_v43 = vld [vmem:[#allocation5 + $0x3b4] ss:$8 sps:$4 sm:$0xff]  }
 0x13d   : > { %3683 = vmatprep.subr.bf16.mxu0 %v5636_v43  ;;  %v460_v43 = vld [vmem:[%s6334_s8 + $0x570] sm:$0xff] }
 0x13e   : > { %3684 = vmatpush1.bf16.msra.mxu0 %v5634_v28  ;;  %v456_v28 = vld [vmem:[%s6334_s8 + $0x550] sm:$0xff] }
 0x13f   : > { %3685 = vmatprep.subr.bf16.mxu0 %v5639_v47  ;;  %v526_v47 = vld [vmem:[%s6334_s8 + $0x780] sm:$0xff] }
 0x142   : > { %2785 = vmatmul.mubr.bf16.gmra.mrb[60].mxu1 %v4556_v36  ;;  %v4612_v36 = vcombine.low %v462_v13, %v466_v39  ;;  %3686 = vmatpush1.bf16.msra.mxu0 %v5637_v54  ;;  %v530_v54 = vld [vmem:[%s6334_s8 + $0x7a0] sm:$0xff] }
 0x143   : > { %3411 = vmatmul.mubr.bf16.gmra.mrb[28].mxu0 %v4496_v38  ;;  %2794 = vmatprep.mubr.bf16.mxu1 %v4565_v40  ;;  %v4552_v38 = vcombine.low %v400_v22, %v404_v24  ;;  %v4621_v40 = vcombine.high %v470_v30, %v474_v32  ;;  %v4661_v22 = vcombine.high %v510_v12, %v514_v14 }
 0x144   : > { %3420 = vmatprep.mubr.bf16.mxu0 %v4505_v19  ;;  %v4561_v19 = vcombine.high %v408_v34, %v412_v45  ;;  %3687 = vmatprep.subr.bf16.mxu0 %v5642_v42  ;;  %v464_v42 = vld [vmem:[%s6334_s8 + $0x590] sm:$0xff] }
 0x14a   : > { %2795 = vmatmul.mubr.bf16.gmra.mrb[64].mxu1 %v4564_v21  ;;  %v420_v21 = vld [vmem:[%s6334_s8 + $0x430] sm:$0xff] }
 0x14b   : > { %3421 = vmatmul.mubr.bf16.gmra.mrb[32].mxu0 %v4504_v57  ;;  %2804 = vmatprep.mubr.bf16.mxu1 %v4573_v59  ;;  %v5640_v57 = vld [vmem:[#allocation5 + $0x3d0] ss:$8 sps:$4 sm:$0xff]   ;;  %v4620_v59 = vcombine.low %v470_v30, %v474_v32  ;;  %v4569_v50 = vcombine.high %v416_v48, %v420_v21  ;;  %v4568_v6 = vcombine.low %v416_v48, %v420_v21 }
 0x14c   : > { %3430 = vmatprep.mubr.bf16.mxu0 %v4513_v1  ;;  %v4560_v1 = vcombine.low %v408_v34, %v412_v45  ;;  %3688 = vmatpush1.bf16.msra.mxu0 %v5640_v57  ;;  %v4660_v32 = vcombine.low %v510_v12, %v514_v14  ;;  %v4608_v21 = vcombine.low %v456_v28, %v460_v43 }
 0x14d   : > { %3689 = vmatprep.subr.bf16.mxu0 %v5645_v51  ;;  %v534_v51 = vld [vmem:[%s6334_s8 + $0x7c0] sm:$0xff] }
 0x150   : > { %3690 = vmatpush1.bf16.msra.mxu0 %v5643_v61  ;;  %v538_v61 = vld [vmem:[%s6334_s8 + $0x7e0] sm:$0xff] }
 0x152   : > { %2805 = vmatmul.mubr.bf16.gmra.mrb[68].mxu1 %v4572_v63  ;;  %v5648_v63 = vld [vmem:[#allocation5 + $0x3f4] ss:$8 sps:$4 sm:$0xff]  }
 0x153   : > { %3431 = vmatmul.mubr.bf16.gmra.mrb[36].mxu0 %v4512_v23  ;;  %2814 = vmatprep.mubr.bf16.mxu1 %v4581_v3  ;;  %v486_v23 = vld [vmem:[%s6334_s8 + $0x640] sm:$0xff] }
 0x154   : > { %3440 = vmatprep.mubr.bf16.mxu0 %v4521_v25  ;;  %v490_v3 = vld [vmem:[%s6334_s8 + $0x660] sm:$0xff]  ;;  %v424_v25 = vld [vmem:[%s6334_s8 + $0x450] sm:$0xff]  ;;  %3691 = vmatprep.subr.bf16.mxu0 %v5648_v63 }
 0x155   : > { %v4637_v53 = vcombine.high %v486_v23, %v490_v3  ;;  %v4577_v27 = vcombine.high %v424_v25, %v428_v5  ;;  %3692 = vmatpush1.bf16.msra.mxu0 %v5646_v2  ;;  %v4636_v29 = vcombine.low %v486_v23, %v490_v3  ;;  %v4576_v60 = vcombine.low %v424_v25, %v428_v5  ;;  %v472_v63 = vld [vmem:[%s6334_s8 + $0x5d0] sm:$0xff] }
 0x156   : > { %v476_v23 = vld [vmem:[%s6334_s8 + $0x5f0] sm:$0xff]  ;;  %v4676_v25 = vcombine.low %v526_v47, %v530_v54  ;;  %v4616_v5 = vcombine.low %v464_v42, %v468_v44 }
 0x15a   : > { %2815 = vmatmul.mubr.bf16.gmra.mrb[72].mxu1 %v4580_v55  ;;  %v494_v55 = vld [vmem:[%s6334_s8 + $0x680] sm:$0xff] }
 0x15b   : > { %3441 = vmatmul.mubr.bf16.gmra.mrb[40].mxu0 %v4520_v56  ;;  %2824 = vmatprep.mubr.bf16.mxu1 %v4589_v10  ;;  %v498_v56 = vld [vmem:[%s6334_s8 + $0x6a0] sm:$0xff]  ;;  %v432_v10 = vld [vmem:[%s6334_s8 + $0x490] sm:$0xff] }
 0x15c   : > { %3450 = vmatprep.mubr.bf16.mxu0 %v4529_v58  ;;  %v436_v58 = vld [vmem:[%s6334_s8 + $0x4b0] sm:$0xff]  ;;  %v4645_v7 = vcombine.high %v494_v55, %v498_v56  ;;  %v4644_v35 = vcombine.low %v494_v55, %v498_v56  ;;  %v351_v55 = vld [vmem:[%s6334_s8 + $0x208] sm:$0xff] }
 0x15d   : > { %v4585_v31 = vcombine.high %v432_v10, %v436_v58  ;;  %v4584_v9 = vcombine.low %v432_v10, %v436_v58  ;;  %v355_v56 = vld [vmem:[%s6334_s8 + $0x228] sm:$0xff]  ;;  %v480_v10 = vld [vmem:[%s6334_s8 + $0x610] sm:$0xff] }
 0x15e   : > { %v484_v58 = vld [vmem:[%s6334_s8 + $0x630] sm:$0xff]  ;;  %v4502_v14 = vcombine.low %v351_v55, %v355_v56 }
 0x162   : > { %2825 = vmatmul.mubr.bf16.gmra.mrb[76].mxu1 %v4588_v62  ;;  %v502_v62 = vld [vmem:[%s6334_s8 + $0x6c0] sm:$0xff] }
 0x163   : > { %3451 = vmatmul.mubr.bf16.gmra.mrb[44].mxu0 %v4528_v0  ;;  %2834 = vmatprep.mubr.bf16.mxu1 %v4597_v4  ;;  %v506_v0 = vld [vmem:[%s6334_s8 + $0x6e0] sm:$0xff]  ;;  %v440_v4 = vld [vmem:[%s6334_s8 + $0x4d0] sm:$0xff] }
 0x164   : > { %3460 = vmatprep.mubr.bf16.mxu0 %v4537_v33  ;;  %v444_v33 = vld [vmem:[%s6334_s8 + $0x4f0] sm:$0xff]  ;;  %v4653_v11 = vcombine.high %v502_v62, %v506_v0 }
 0x165   : > { %v4593_v8 = vcombine.high %v440_v4, %v444_v33  ;;  %v4592_v13 = vcombine.low %v440_v4, %v444_v33 }
 0x16a   : > { %2835 = vmatmul.mubr.bf16.gmra.mrb[80].mxu1 %v4596_v37  ;;  %v448_v37 = vld [vmem:[%s6334_s8 + $0x510] sm:$0xff] }
 0x16b   : > { %3461 = vmatmul.mubr.bf16.gmra.mrb[48].mxu0 %v4536_v16  ;;  %2844 = vmatprep.mubr.bf16.mxu1 %v4605_v18  ;;  %v452_v16 = vld [vmem:[%s6334_s8 + $0x530] sm:$0xff] }
 0x16c   : > { %3470 = vmatprep.mubr.bf16.mxu0 %v4545_v20  ;;  %v4652_v20 = vcombine.low %v502_v62, %v506_v0  ;;  %v4601_v24 = vcombine.high %v448_v37, %v452_v16  ;;  %v4600_v34 = vcombine.low %v448_v37, %v452_v16  ;;  %v4503_v62 = vcombine.high %v351_v55, %v355_v56  ;;  %v383_v55 = vld [vmem:[%s6334_s8 + $0x308] sm:$0xff] }
 0x16d   : > { %v4633_v0 = vcombine.high %v480_v10, %v484_v58  ;;  %v4632_v37 = vcombine.low %v480_v10, %v484_v58  ;;  %v387_v56 = vld [vmem:[%s6334_s8 + $0x328] sm:$0xff]  ;;  %v512_v10 = vld [vmem:[%s6334_s8 + $0x710] sm:$0xff] }
 0x16e   : > { %v516_v58 = vld [vmem:[%s6334_s8 + $0x730] sm:$0xff] }
 0x172   : > { %2845 = vmatmul.mubr.bf16.gmra.mrb[84].mxu1 %v4604_v41 }
 0x173   : > { %3471 = vmatmul.mubr.bf16.gmra.mrb[52].mxu0 %v4544_v26  ;;  %2854 = vmatprep.mubr.bf16.mxu1 %v4613_v15  ;;  %v518_v15 = vld [vmem:[%s6334_s8 + $0x740] sm:$0xff] }
 0x174   : > { %3480 = vmatprep.mubr.bf16.mxu0 %v4553_v17  ;;  %v522_v17 = vld [vmem:[%s6334_s8 + $0x760] sm:$0xff] }
 0x175   : > { %v4668_v48 = vcombine.low %v518_v15, %v522_v17 }
 0x17a   : > { %2855 = vmatmul.mubr.bf16.gmra.mrb[88].mxu1 %v4612_v36  ;;  %v4669_v36 = vcombine.high %v518_v15, %v522_v17  ;;  %v367_v15 = vld [vmem:[%s6334_s8 + $0x288] sm:$0xff] }
 0x17b   : > { %3481 = vmatmul.mubr.bf16.gmra.mrb[56].mxu0 %v4552_v38  ;;  %2864 = vmatprep.mubr.bf16.mxu1 %v4621_v40  ;;  %v4609_v38 = vcombine.high %v456_v28, %v460_v43  ;;  %v371_v17 = vld [vmem:[%s6334_s8 + $0x2a8] sm:$0xff]  ;;  %v496_v28 = vld [vmem:[%s6334_s8 + $0x690] sm:$0xff] }
 0x17c   : > { %3490 = vmatprep.mubr.bf16.mxu0 %v4561_v19  ;;  %v500_v43 = vld [vmem:[%s6334_s8 + $0x6b0] sm:$0xff] }
 0x182   : > { %2865 = vmatmul.mubr.bf16.gmra.mrb[92].mxu1 %v4620_v59  ;;  %v4677_v59 = vcombine.high %v526_v47, %v530_v54  ;;  %v4519_v47 = vcombine.high %v367_v15, %v371_v17  ;;  %v4649_v54 = vcombine.high %v496_v28, %v500_v43 }
 0x183   : > { %3491 = vmatmul.mubr.bf16.gmra.mrb[60].mxu0 %v4560_v1  ;;  %2874 = vmatprep.mubr.bf16.mxu1 %v4629_v49  ;;  %v4617_v1 = vcombine.high %v464_v42, %v468_v44 }
 0x184   : > { %3500 = vmatprep.mubr.bf16.mxu0 %v4569_v50 }
 0x18a   : > { %2875 = vmatmul.mubr.bf16.gmra.mrb[96].mxu1 %v4628_v52  ;;  %v4685_v52 = vcombine.high %v534_v51, %v538_v61 }
 0x18b   : > { %3501 = vmatmul.mubr.bf16.gmra.mrb[64].mxu0 %v4568_v6  ;;  %2884 = vmatprep.mubr.bf16.mxu1 %v4637_v53  ;;  %v4625_v6 = vcombine.high %v472_v63, %v476_v23 }
 0x18c   : > { %3510 = vmatprep.mubr.bf16.mxu0 %v4577_v27 }
 0x192   : > { %2885 = vmatmul.mubr.bf16.gmra.mrb[100].mxu1 %v4636_v29 }
 0x193   : > { %3511 = vmatmul.mubr.bf16.gmra.mrb[68].mxu0 %v4576_v60  ;;  %2894 = vmatprep.mubr.bf16.mxu1 %v4645_v7  ;;  %v4684_v60 = vcombine.low %v534_v51, %v538_v61  ;;  %v4624_v7 = vcombine.low %v472_v63, %v476_v23  ;;  %v4518_v61 = vcombine.low %v367_v15, %v371_v17  ;;  %v399_v15 = vld [vmem:[%s6334_s8 + $0x388] sm:$0xff] }
 0x194   : > { %3520 = vmatprep.mubr.bf16.mxu0 %v4585_v31  ;;  %v4648_v63 = vcombine.low %v496_v28, %v500_v43  ;;  %v403_v17 = vld [vmem:[%s6334_s8 + $0x3a8] sm:$0xff]  ;;  %v528_v28 = vld [vmem:[%s6334_s8 + $0x790] sm:$0xff] }
 0x195   : > { %v532_v43 = vld [vmem:[%s6334_s8 + $0x7b0] sm:$0xff] }
 0x19a   : > { %2895 = vmatmul.mubr.bf16.gmra.mrb[104].mxu1 %v4644_v35  ;;  %v359_v35 = vld [vmem:[%s6334_s8 + $0x248] sm:$0xff] }
 0x19b   : > { %3521 = vmatmul.mubr.bf16.gmra.mrb[72].mxu0 %v4584_v9  ;;  %2904 = vmatprep.mubr.bf16.mxu1 %v4653_v11  ;;  %v363_v9 = vld [vmem:[%s6334_s8 + $0x268] sm:$0xff]  ;;  %v488_v11 = vld [vmem:[%s6334_s8 + $0x650] sm:$0xff] }
 0x19c   : > { %3530 = vmatprep.mubr.bf16.mxu0 %v4593_v8  ;;  %v492_v8 = vld [vmem:[%s6334_s8 + $0x670] sm:$0xff] }
 0x19d   : > { %v6592_v18 = vpop.f32.mrb[0].mxu1 }
 0x19e   : > { %v6594_v39 = vpop.f32.mrb[1].mxu1 }
 0x19f   : > { %v6596_v41 = vpop.f32.mrb[2].mxu1 }
 0x1a0   : > { %v6598_v26 = vpop.f32.mrb[3].mxu1 }
 0x1a2   : > { %2905 = vmatmul.mubr.bf16.gmra.mrb[108].mxu1 %v4652_v20  ;;  %v4511_v20 = vcombine.high %v359_v35, %v363_v9 }
 0x1a3   : > { %3531 = vmatmul.mubr.bf16.gmra.mrb[76].mxu0 %v4592_v13  ;;  %2914 = vmatprep.mubr.bf16.mxu1 %v4661_v22  ;;  %v4641_v13 = vcombine.high %v488_v11, %v492_v8 }
 0x1a4   : > { %3540 = vmatprep.mubr.bf16.mxu0 %v4601_v24 }
 0x1a5   : > { %v6604_v30 = vpop.f32.mrb[4].mxu1 }
 0x1a6   : > { %v6606_v45 = vpop.f32.mrb[5].mxu1 }
 0x1a7   : > { %v6608_v40 = vpop.f32.mrb[6].mxu1 }
 0x1a8   : > { %v6610_v19 = vpop.f32.mrb[7].mxu1 }
 0x1aa   : > { %2915 = vmatmul.mubr.bf16.gmra.mrb[112].mxu1 %v4660_v32 }
 0x1ab   : > { %3541 = vmatmul.mubr.bf16.gmra.mrb[80].mxu0 %v4600_v34  ;;  %2924 = vmatprep.mubr.bf16.mxu1 %v4669_v36  ;;  %v4510_v34 = vcombine.low %v359_v35, %v363_v9  ;;  %v4640_v36 = vcombine.low %v488_v11, %v492_v8  ;;  %v391_v35 = vld [vmem:[%s6334_s8 + $0x348] sm:$0xff]  ;;  %v520_v11 = vld [vmem:[%s6334_s8 + $0x750] sm:$0xff] }
 0x1ac   : > { %3550 = vmatprep.mubr.bf16.mxu0 %v4609_v38  ;;  %v395_v9 = vld [vmem:[%s6334_s8 + $0x368] sm:$0xff]  ;;  %v524_v8 = vld [vmem:[%s6334_s8 + $0x770] sm:$0xff] }
 0x1ad   : > { %v6616_v46 = vpop.f32.mrb[8].mxu1 }
 0x1ae   : > { %v6618_v57 = vpop.f32.mrb[9].mxu1 }
 0x1af   : > { %v6620_v49 = vpop.f32.mrb[10].mxu1 }
 0x1b0   : > { %v6622_v50 = vpop.f32.mrb[11].mxu1 }
 0x1b2   : > { %2925 = vmatmul.mubr.bf16.gmra.mrb[116].mxu1 %v4668_v48  ;;  %v375_v48 = vld [vmem:[%s6334_s8 + $0x2c8] sm:$0xff] }
 0x1b3   : > { %3551 = vmatmul.mubr.bf16.gmra.mrb[84].mxu0 %v4608_v21  ;;  %2934 = vmatprep.mubr.bf16.mxu1 %v4677_v59  ;;  %v379_v21 = vld [vmem:[%s6334_s8 + $0x2e8] sm:$0xff]  ;;  %v504_v59 = vld [vmem:[%s6334_s8 + $0x6d0] sm:$0xff] }
 0x1b4   : > { %3560 = vmatprep.mubr.bf16.mxu0 %v4617_v1  ;;  %v508_v1 = vld [vmem:[%s6334_s8 + $0x6f0] sm:$0xff] }
 0x1b5   : > { %v6628_v3 = vpop.f32.mrb[12].mxu1 }
 0x1b6   : > { %v6630_v2 = vpop.f32.mrb[13].mxu1 }
 0x1b7   : > { %v6632_v53 = vpop.f32.mrb[14].mxu1 }
 0x1b8   : > { %v6634_v27 = vpop.f32.mrb[15].mxu1 }
 0x1ba   : > { %2935 = vmatmul.mubr.bf16.gmra.mrb[120].mxu1 %v4676_v25  ;;  %v4527_v25 = vcombine.high %v375_v48, %v379_v21 }
 0x1bb   : > { %3561 = vmatmul.mubr.bf16.gmra.mrb[88].mxu0 %v4616_v5  ;;  %2944 = vmatprep.mubr.bf16.mxu1 %v4685_v52  ;;  %v4657_v5 = vcombine.high %v504_v59, %v508_v1 }
 0x1bc   : > { %3570 = vmatprep.mubr.bf16.mxu0 %v4625_v6 }
 0x1bd   : > { %v6640_v29 = vpop.f32.mrb[16].mxu1 }
 0x1be   : > { %v6642_v31 = vpop.f32.mrb[17].mxu1 }
 0x1bf   : > { %v6644_v4 = vpop.f32.mrb[18].mxu1 }
 0x1c0   : > { %v6646_v33 = vpop.f32.mrb[19].mxu1 }
 0x1c2   : > { %2945 = vmatmul.mubr.bf16.gmra.mrb[124].mxu1 %v4684_v60  ;;  %v4526_v60 = vcombine.low %v375_v48, %v379_v21  ;;  %v407_v48 = vld [vmem:[%s6334_s8 + $0x3c8] sm:$0xff] }
 0x1c3   : > { %3571 = vmatmul.mubr.bf16.gmra.mrb[92].mxu0 %v4624_v7  ;;  %3067 = vmatprep.mubr.bf16.mxu1 %v4503_v62  ;;  %v4656_v7 = vcombine.low %v504_v59, %v508_v1  ;;  %v4535_v62 = vcombine.high %v383_v55, %v387_v56  ;;  %v411_v21 = vld [vmem:[%s6334_s8 + $0x3e8] sm:$0xff]  ;;  %v536_v59 = vld [vmem:[%s6334_s8 + $0x7d0] sm:$0xff] }
 0x1c4   : > { %3580 = vmatprep.mubr.bf16.mxu0 %v4633_v0  ;;  %v4665_v0 = vcombine.high %v512_v10, %v516_v58  ;;  %v540_v1 = vld [vmem:[%s6334_s8 + $0x7f0] sm:$0xff] }
 0x1c5   : > { %v6652_v12 = vpop.f32.mrb[20].mxu1 }
 0x1c6   : > { %v6654_v16 = vpop.f32.mrb[21].mxu1 }
 0x1c7   : > { %v6656_v22 = vpop.f32.mrb[22].mxu1 }
 0x1c8   : > { %v6658_v24 = vpop.f32.mrb[23].mxu1 }
 0x1ca   : > { %3068 = vmatmul.mubr.bf16.vlgmr.msra.gmra.mrb[32].mxu1 %v4502_v14  ;;  %v4534_v14 = vcombine.low %v383_v55, %v387_v56  ;;  %v415_v55 = vld [vmem:[%s6334_s8 + $0x408] sm:$0xff] }
 0x1cb   : > { %3581 = vmatmul.mubr.bf16.gmra.mrb[96].mxu0 %v4632_v37  ;;  %3077 = vmatprep.mubr.bf16.mxu1 %v4511_v20  ;;  %v4664_v37 = vcombine.low %v512_v10, %v516_v58  ;;  %v4543_v20 = vcombine.high %v391_v35, %v395_v9  ;;  %v419_v56 = vld [vmem:[%s6334_s8 + $0x428] sm:$0xff]  ;;  %v289_v10 = vld [vmem:[%s6334_s8 + $0x18] sm:$0xff] }
 0x1cc   : > { %3590 = vmatprep.mubr.bf16.mxu0 %v4641_v13  ;;  %v4673_v13 = vcombine.high %v520_v11, %v524_v8  ;;  %v293_v58 = vld [vmem:[%s6334_s8 + $0x38] sm:$0xff] }
 0x1cd   : > { %v6664_v32 = vpop.f32.mrb[24].mxu1 }
 0x1ce   : > { %v6666_v38 = vpop.f32.mrb[25].mxu1 }
 0x1cf   : > { %v6668_v42 = vpop.f32.mrb[26].mxu1 }
 0x1d0   : > { %v6670_v44 = vpop.f32.mrb[27].mxu1 }
 0x1d2   : > { %3078 = vmatmul.mubr.bf16.gmra.mrb[36].mxu1 %v4510_v34  ;;  %v4542_v34 = vcombine.low %v391_v35, %v395_v9  ;;  %v423_v35 = vld [vmem:[%s6334_s8 + $0x448] sm:$0xff] }
 0x1d3   : > { %3591 = vmatmul.mubr.bf16.gmra.mrb[100].mxu0 %v4640_v36  ;;  %3087 = vmatprep.mubr.bf16.mxu1 %v4519_v47  ;;  %v4672_v36 = vcombine.low %v520_v11, %v524_v8  ;;  %v4551_v47 = vcombine.high %v399_v15, %v403_v17  ;;  %v427_v9 = vld [vmem:[%s6334_s8 + $0x468] sm:$0xff]  ;;  %v297_v11 = vld [vmem:[%s6334_s8 + $0x58] sm:$0xff] }
 0x1d4   : > { %3600 = vmatprep.mubr.bf16.mxu0 %v4649_v54  ;;  %v4681_v54 = vcombine.high %v528_v28, %v532_v43  ;;  %v301_v8 = vld [vmem:[%s6334_s8 + $0x78] sm:$0xff] }
 0x1d5   : > { %v6676_v51 = vpop.f32.mrb[28].mxu1 }
 0x1d6   : > { %v6678_v23 = vpop.f32.mrb[29].mxu1 }
 0x1d7   : > { %v6680_v52 = vpop.f32.mrb[30].mxu1 }
 0x1d8   : > { %v6682_v6 = vpop.f32.mrb[31].mxu1 }
 0x1da   : > { %3088 = vmatmul.mubr.bf16.gmra.mrb[40].mxu1 %v4518_v61  ;;  %v4550_v61 = vcombine.low %v399_v15, %v403_v17  ;;  %v431_v15 = vld [vmem:[%s6334_s8 + $0x488] sm:$0xff] }
 0x1db   : > { %3601 = vmatmul.mubr.bf16.gmra.mrb[104].mxu0 %v4648_v63  ;;  %3097 = vmatprep.mubr.bf16.mxu1 %v4527_v25  ;;  %v4680_v63 = vcombine.low %v528_v28, %v532_v43  ;;  %v4559_v25 = vcombine.high %v407_v48, %v411_v21  ;;  %v435_v17 = vld [vmem:[%s6334_s8 + $0x4a8] sm:$0xff]  ;;  %v305_v28 = vld [vmem:[%s6334_s8 + $0x98] sm:$0xff] }
 0x1dc   : > { %3610 = vmatprep.mubr.bf16.mxu0 %v4657_v5  ;;  %v4689_v5 = vcombine.high %v536_v59, %v540_v1  ;;  %v309_v43 = vld [vmem:[%s6334_s8 + $0xb8] sm:$0xff] }
 0x1e2   : > { %3098 = vmatmul.mubr.bf16.gmra.mrb[44].mxu1 %v4526_v60  ;;  %v4558_v60 = vcombine.low %v407_v48, %v411_v21  ;;  %v439_v48 = vld [vmem:[%s6334_s8 + $0x4c8] sm:$0xff] }
 0x1e3   : > { %3611 = vmatmul.mubr.bf16.gmra.mrb[108].mxu0 %v4656_v7  ;;  %3107 = vmatprep.mubr.bf16.mxu1 %v4535_v62  ;;  %v4688_v7 = vcombine.low %v536_v59, %v540_v1  ;;  %v4567_v62 = vcombine.high %v415_v55, %v419_v56  ;;  %v443_v21 = vld [vmem:[%s6334_s8 + $0x4e8] sm:$0xff]  ;;  %v313_v59 = vld [vmem:[%s6334_s8 + $0xd8] sm:$0xff] }
 0x1e4   : > { %3620 = vmatprep.mubr.bf16.mxu0 %v4665_v0  ;;  %v4443_v0 = vcombine.high %v289_v10, %v293_v58  ;;  %v317_v1 = vld [vmem:[%s6334_s8 + $0xf8] sm:$0xff] }
 0x1ea   : > { %3108 = vmatmul.mubr.bf16.gmra.mrb[48].mxu1 %v4534_v14  ;;  %v4442_v14 = vcombine.low %v289_v10, %v293_v58  ;;  %v321_v10 = vld [vmem:[%s6334_s8 + $0x118] sm:$0xff] }
 0x1eb   : > { %3621 = vmatmul.mubr.bf16.gmra.mrb[112].mxu0 %v4664_v37  ;;  %3117 = vmatprep.mubr.bf16.mxu1 %v4543_v20  ;;  %v4566_v37 = vcombine.low %v415_v55, %v419_v56  ;;  %v4575_v20 = vcombine.high %v423_v35, %v427_v9  ;;  %v447_v55 = vld [vmem:[%s6334_s8 + $0x508] sm:$0xff]  ;;  %v325_v58 = vld [vmem:[%s6334_s8 + $0x138] sm:$0xff] }
 0x1ec   : > { %3630 = vmatprep.mubr.bf16.mxu0 %v4673_v13  ;;  %v4451_v13 = vcombine.high %v297_v11, %v301_v8  ;;  %v451_v56 = vld [vmem:[%s6334_s8 + $0x528] sm:$0xff] }
 0x1f2   : > { %3118 = vmatmul.mubr.bf16.gmra.mrb[52].mxu1 %v4542_v34  ;;  %v4574_v34 = vcombine.low %v423_v35, %v427_v9  ;;  %v455_v35 = vld [vmem:[%s6334_s8 + $0x548] sm:$0xff] }
 0x1f3   : > { %3631 = vmatmul.mubr.bf16.gmra.mrb[116].mxu0 %v4672_v36  ;;  %3127 = vmatprep.mubr.bf16.mxu1 %v4551_v47  ;;  %v4450_v36 = vcombine.low %v297_v11, %v301_v8  ;;  %v4583_v47 = vcombine.high %v431_v15, %v435_v17  ;;  %v459_v9 = vld [vmem:[%s6334_s8 + $0x568] sm:$0xff]  ;;  %v329_v11 = vld [vmem:[%s6334_s8 + $0x158] sm:$0xff] }
 0x1f4   : > { %3640 = vmatprep.mubr.bf16.mxu0 %v4681_v54  ;;  %v4459_v54 = vcombine.high %v305_v28, %v309_v43  ;;  %v333_v8 = vld [vmem:[%s6334_s8 + $0x178] sm:$0xff] }
 0x1fa   : > { %3128 = vmatmul.mubr.bf16.gmra.mrb[56].mxu1 %v4550_v61  ;;  %v4582_v61 = vcombine.low %v431_v15, %v435_v17  ;;  %v463_v15 = vld [vmem:[%s6334_s8 + $0x588] sm:$0xff] }
 0x1fb   : > { %3641 = vmatmul.mubr.bf16.gmra.mrb[120].mxu0 %v4680_v63  ;;  %3137 = vmatprep.mubr.bf16.mxu1 %v4559_v25  ;;  %v4458_v63 = vcombine.low %v305_v28, %v309_v43  ;;  %v4591_v25 = vcombine.high %v439_v48, %v443_v21  ;;  %v467_v17 = vld [vmem:[%s6334_s8 + $0x5a8] sm:$0xff]  ;;  %v337_v28 = vld [vmem:[%s6334_s8 + $0x198] sm:$0xff] }
 0x1fc   : > { %3650 = vmatprep.mubr.bf16.mxu0 %v4689_v5  ;;  %v4467_v5 = vcombine.high %v313_v59, %v317_v1  ;;  %v341_v43 = vld [vmem:[%s6334_s8 + $0x1b8] sm:$0xff] }
 0x202   : > { %3138 = vmatmul.mubr.bf16.gmra.mrb[60].mxu1 %v4558_v60  ;;  %v4590_v60 = vcombine.low %v439_v48, %v443_v21  ;;  %v471_v48 = vld [vmem:[%s6334_s8 + $0x5c8] sm:$0xff] }
 0x203   : > { %3651 = vmatmul.mubr.bf16.gmra.mrb[124].mxu0 %v4688_v7  ;;  %3147 = vmatprep.mubr.bf16.mxu1 %v4567_v62  ;;  %v4466_v7 = vcombine.low %v313_v59, %v317_v1  ;;  %v4599_v62 = vcombine.high %v447_v55, %v451_v56  ;;  %v475_v21 = vld [vmem:[%s6334_s8 + $0x5e8] sm:$0xff]  ;;  %v345_v59 = vld [vmem:[%s6334_s8 + $0x1d8] sm:$0xff] }
 0x204   : > { %3693 = vmatprep.mubr.bf16.mxu0 %v4443_v0  ;;  %v4475_v0 = vcombine.high %v321_v10, %v325_v58  ;;  %v349_v1 = vld [vmem:[%s6334_s8 + $0x1f8] sm:$0xff] }
 0x20a   : > { %3148 = vmatmul.mubr.bf16.gmra.mrb[64].mxu1 %v4566_v37  ;;  %v4474_v37 = vcombine.low %v321_v10, %v325_v58  ;;  %v353_v10 = vld [vmem:[%s6334_s8 + $0x218] sm:$0xff] }
 0x20b   : > { %3694 = vmatmul.mubr.bf16.vlgmr.msra.gmra.mrb[0].mxu0 %v4442_v14  ;;  %3157 = vmatprep.mubr.bf16.mxu1 %v4575_v20  ;;  %v4598_v14 = vcombine.low %v447_v55, %v451_v56  ;;  %v4607_v20 = vcombine.high %v455_v35, %v459_v9  ;;  %v479_v55 = vld [vmem:[%s6334_s8 + $0x608] sm:$0xff]  ;;  %v357_v58 = vld [vmem:[%s6334_s8 + $0x238] sm:$0xff] }
 0x20c   : > { %3703 = vmatprep.mubr.bf16.mxu0 %v4451_v13  ;;  %v4483_v13 = vcombine.high %v329_v11, %v333_v8  ;;  %v483_v56 = vld [vmem:[%s6334_s8 + $0x628] sm:$0xff] }
 0x212   : > { %3158 = vmatmul.mubr.bf16.gmra.mrb[68].mxu1 %v4574_v34  ;;  %v4606_v34 = vcombine.low %v455_v35, %v459_v9  ;;  %v487_v35 = vld [vmem:[%s6334_s8 + $0x648] sm:$0xff] }
 0x213   : > { %3704 = vmatmul.mubr.bf16.gmra.mrb[4].mxu0 %v4450_v36  ;;  %3167 = vmatprep.mubr.bf16.mxu1 %v4583_v47  ;;  %v4482_v36 = vcombine.low %v329_v11, %v333_v8  ;;  %v4615_v47 = vcombine.high %v463_v15, %v467_v17  ;;  %v491_v9 = vld [vmem:[%s6334_s8 + $0x668] sm:$0xff]  ;;  %v361_v11 = vld [vmem:[%s6334_s8 + $0x258] sm:$0xff] }
 0x214   : > { %3713 = vmatprep.mubr.bf16.mxu0 %v4459_v54  ;;  %v4491_v54 = vcombine.high %v337_v28, %v341_v43  ;;  %v365_v8 = vld [vmem:[%s6334_s8 + $0x278] sm:$0xff] }
 0x21a   : > { %3168 = vmatmul.mubr.bf16.gmra.mrb[72].mxu1 %v4582_v61  ;;  %v4614_v61 = vcombine.low %v463_v15, %v467_v17  ;;  %v495_v15 = vld [vmem:[%s6334_s8 + $0x688] sm:$0xff] }
 0x21b   : > { %3714 = vmatmul.mubr.bf16.gmra.mrb[8].mxu0 %v4458_v63  ;;  %3177 = vmatprep.mubr.bf16.mxu1 %v4591_v25  ;;  %v4490_v63 = vcombine.low %v337_v28, %v341_v43  ;;  %v4623_v25 = vcombine.high %v471_v48, %v475_v21  ;;  %v499_v17 = vld [vmem:[%s6334_s8 + $0x6a8] sm:$0xff]  ;;  %v369_v28 = vld [vmem:[%s6334_s8 + $0x298] sm:$0xff] }
 0x21c   : > { %3723 = vmatprep.mubr.bf16.mxu0 %v4467_v5  ;;  %v4499_v5 = vcombine.high %v345_v59, %v349_v1  ;;  %v373_v43 = vld [vmem:[%s6334_s8 + $0x2b8] sm:$0xff] }
 0x222   : > { %3178 = vmatmul.mubr.bf16.gmra.mrb[76].mxu1 %v4590_v60  ;;  %v4622_v60 = vcombine.low %v471_v48, %v475_v21  ;;  %v503_v48 = vld [vmem:[%s6334_s8 + $0x6c8] sm:$0xff] }
 0x223   : > { %3724 = vmatmul.mubr.bf16.gmra.mrb[12].mxu0 %v4466_v7  ;;  %3187 = vmatprep.mubr.bf16.mxu1 %v4599_v62  ;;  %v4498_v7 = vcombine.low %v345_v59, %v349_v1  ;;  %v4631_v62 = vcombine.high %v479_v55, %v483_v56  ;;  %v507_v21 = vld [vmem:[%s6334_s8 + $0x6e8] sm:$0xff]  ;;  %v377_v59 = vld [vmem:[%s6334_s8 + $0x2d8] sm:$0xff] }
 0x224   : > { %3733 = vmatprep.mubr.bf16.mxu0 %v4475_v0  ;;  %v4507_v0 = vcombine.high %v353_v10, %v357_v58  ;;  %v381_v1 = vld [vmem:[%s6334_s8 + $0x2f8] sm:$0xff] }
 0x22a   : > { %3188 = vmatmul.mubr.bf16.gmra.mrb[80].mxu1 %v4598_v14  ;;  %v4630_v14 = vcombine.low %v479_v55, %v483_v56  ;;  %v511_v55 = vld [vmem:[%s6334_s8 + $0x708] sm:$0xff] }
 0x22b   : > { %3734 = vmatmul.mubr.bf16.gmra.mrb[16].mxu0 %v4474_v37  ;;  %3197 = vmatprep.mubr.bf16.mxu1 %v4607_v20  ;;  %v4506_v37 = vcombine.low %v353_v10, %v357_v58  ;;  %v4639_v20 = vcombine.high %v487_v35, %v491_v9  ;;  %v515_v56 = vld [vmem:[%s6334_s8 + $0x728] sm:$0xff]  ;;  %v385_v10 = vld [vmem:[%s6334_s8 + $0x318] sm:$0xff] }
 0x22c   : > { %3743 = vmatprep.mubr.bf16.mxu0 %v4483_v13  ;;  %v4515_v13 = vcombine.high %v361_v11, %v365_v8  ;;  %v389_v58 = vld [vmem:[%s6334_s8 + $0x338] sm:$0xff] }
 0x232   : > { %3198 = vmatmul.mubr.bf16.gmra.mrb[84].mxu1 %v4606_v34  ;;  %v4638_v34 = vcombine.low %v487_v35, %v491_v9  ;;  %v519_v35 = vld [vmem:[%s6334_s8 + $0x748] sm:$0xff] }
 0x233   : > { %3744 = vmatmul.mubr.bf16.gmra.mrb[20].mxu0 %v4482_v36  ;;  %3207 = vmatprep.mubr.bf16.mxu1 %v4615_v47  ;;  %v4514_v36 = vcombine.low %v361_v11, %v365_v8  ;;  %v4647_v47 = vcombine.high %v495_v15, %v499_v17  ;;  %v523_v9 = vld [vmem:[%s6334_s8 + $0x768] sm:$0xff]  ;;  %v393_v11 = vld [vmem:[%s6334_s8 + $0x358] sm:$0xff] }
 0x234   : > { %3753 = vmatprep.mubr.bf16.mxu0 %v4491_v54  ;;  %v4523_v54 = vcombine.high %v369_v28, %v373_v43  ;;  %v397_v8 = vld [vmem:[%s6334_s8 + $0x378] sm:$0xff] }
 0x23a   : > { %3208 = vmatmul.mubr.bf16.gmra.mrb[88].mxu1 %v4614_v61  ;;  %v4646_v61 = vcombine.low %v495_v15, %v499_v17  ;;  %v527_v15 = vld [vmem:[%s6334_s8 + $0x788] sm:$0xff] }
 0x23b   : > { %3754 = vmatmul.mubr.bf16.gmra.mrb[24].mxu0 %v4490_v63  ;;  %3217 = vmatprep.mubr.bf16.mxu1 %v4623_v25  ;;  %v4522_v63 = vcombine.low %v369_v28, %v373_v43  ;;  %v4655_v25 = vcombine.high %v503_v48, %v507_v21  ;;  %v531_v17 = vld [vmem:[%s6334_s8 + $0x7a8] sm:$0xff]  ;;  %v401_v28 = vld [vmem:[%s6334_s8 + $0x398] sm:$0xff] }
 0x23c   : > { %3763 = vmatprep.mubr.bf16.mxu0 %v4499_v5  ;;  %v4531_v5 = vcombine.high %v377_v59, %v381_v1  ;;  %v405_v43 = vld [vmem:[%s6334_s8 + $0x3b8] sm:$0xff] }
 0x242   : > { %3218 = vmatmul.mubr.bf16.gmra.mrb[92].mxu1 %v4622_v60  ;;  %v4654_v60 = vcombine.low %v503_v48, %v507_v21  ;;  %v535_v48 = vld [vmem:[%s6334_s8 + $0x7c8] sm:$0xff] }
 0x243   : > { %3764 = vmatmul.mubr.bf16.gmra.mrb[28].mxu0 %v4498_v7  ;;  %3227 = vmatprep.mubr.bf16.mxu1 %v4631_v62  ;;  %v4530_v7 = vcombine.low %v377_v59, %v381_v1  ;;  %v4663_v62 = vcombine.high %v511_v55, %v515_v56  ;;  %v539_v21 = vld [vmem:[%s6334_s8 + $0x7e8] sm:$0xff]  ;;  %v409_v59 = vld [vmem:[%s6334_s8 + $0x3d8] sm:$0xff] }
 0x244   : > { %3773 = vmatprep.mubr.bf16.mxu0 %v4507_v0  ;;  %v4539_v0 = vcombine.high %v385_v10, %v389_v58  ;;  %v413_v1 = vld [vmem:[%s6334_s8 + $0x3f8] sm:$0xff] }
 0x24a   : > { %3228 = vmatmul.mubr.bf16.gmra.mrb[96].mxu1 %v4630_v14  ;;  %v4662_v14 = vcombine.low %v511_v55, %v515_v56  ;;  %v417_v55 = vld [vmem:[%s6334_s8 + $0x418] sm:$0xff] }
 0x24b   : > { %3774 = vmatmul.mubr.bf16.gmra.mrb[32].mxu0 %v4506_v37  ;;  %3237 = vmatprep.mubr.bf16.mxu1 %v4639_v20  ;;  %v4538_v37 = vcombine.low %v385_v10, %v389_v58  ;;  %v4671_v20 = vcombine.high %v519_v35, %v523_v9  ;;  %v421_v56 = vld [vmem:[%s6334_s8 + $0x438] sm:$0xff]  ;;  %v4686_v10 = vcombine.low %v535_v48, %v539_v21 }
 0x24c   : > { %3783 = vmatprep.mubr.bf16.mxu0 %v4515_v13  ;;  %v4547_v13 = vcombine.high %v393_v11, %v397_v8  ;;  %v4562_v58 = vcombine.low %v409_v59, %v413_v1 }
 0x252   : > { %3238 = vmatmul.mubr.bf16.gmra.mrb[100].mxu1 %v4638_v34  ;;  %v4670_v34 = vcombine.low %v519_v35, %v523_v9  ;;  %v433_v9 = vld [vmem:[%s6334_s8 + $0x498] sm:$0xff] }
 0x253   : > { %3784 = vmatmul.mubr.bf16.gmra.mrb[36].mxu0 %v4514_v36  ;;  %3247 = vmatprep.mubr.bf16.mxu1 %v4647_v47  ;;  %v4546_v36 = vcombine.low %v393_v11, %v397_v8  ;;  %v4679_v47 = vcombine.high %v527_v15, %v531_v17  ;;  %v437_v11 = vld [vmem:[%s6334_s8 + $0x4b8] sm:$0xff] }
 0x254   : > { %3793 = vmatprep.mubr.bf16.mxu0 %v4523_v54  ;;  %v4555_v54 = vcombine.high %v401_v28, %v405_v43 }
 0x25a   : > { %3248 = vmatmul.mubr.bf16.gmra.mrb[104].mxu1 %v4646_v61  ;;  %v4678_v61 = vcombine.low %v527_v15, %v531_v17  ;;  %v449_v17 = vld [vmem:[%s6334_s8 + $0x518] sm:$0xff] }
 0x25b   : > { %3794 = vmatmul.mubr.bf16.gmra.mrb[40].mxu0 %v4522_v63  ;;  %3257 = vmatprep.mubr.bf16.mxu1 %v4655_v25  ;;  %v4554_v63 = vcombine.low %v401_v28, %v405_v43  ;;  %v4687_v25 = vcombine.high %v535_v48, %v539_v21  ;;  %v453_v28 = vld [vmem:[%s6334_s8 + $0x538] sm:$0xff] }
 0x25c   : > { %3803 = vmatprep.mubr.bf16.mxu0 %v4531_v5  ;;  %v4563_v5 = vcombine.high %v409_v59, %v413_v1  ;;  %v457_v21 = vld [vmem:[%s6334_s8 + $0x558] sm:$0xff] }
 0x25d   : > { %v461_v59 = vld [vmem:[%s6334_s8 + $0x578] sm:$0xff] }
 0x262   : > { %3258 = vmatmul.mubr.bf16.gmra.mrb[108].mxu1 %v4654_v60  ;;  %v4571_v60 = vcombine.high %v417_v55, %v421_v56 }
 0x263   : > { %3804 = vmatmul.mubr.bf16.gmra.mrb[44].mxu0 %v4530_v7  ;;  %3267 = vmatprep.mubr.bf16.mxu1 %v4663_v62  ;;  %v425_v7 = vld [vmem:[%s6334_s8 + $0x458] sm:$0xff] }
 0x264   : > { %3813 = vmatprep.mubr.bf16.mxu0 %v4539_v0  ;;  %v429_v62 = vld [vmem:[%s6334_s8 + $0x478] sm:$0xff]  ;;  %v4570_v0 = vcombine.low %v417_v55, %v421_v56 }
 0x265   : > { %v4579_v35 = vcombine.high %v425_v7, %v429_v62  ;;  %v4578_v8 = vcombine.low %v425_v7, %v429_v62  ;;  %v465_v56 = vld [vmem:[%s6334_s8 + $0x598] sm:$0xff]  ;;  %v4610_v7 = vcombine.low %v457_v21, %v461_v59 }
 0x26a   : > { %3268 = vmatmul.mubr.bf16.gmra.mrb[112].mxu1 %v4662_v14  ;;  %v4587_v14 = vcombine.high %v433_v9, %v437_v11 }
 0x26b   : > { %3814 = vmatmul.mubr.bf16.gmra.mrb[48].mxu0 %v4538_v37  ;;  %3277 = vmatprep.mubr.bf16.mxu1 %v4671_v20  ;;  %v441_v37 = vld [vmem:[%s6334_s8 + $0x4d8] sm:$0xff] }
 0x26c   : > { %3823 = vmatprep.mubr.bf16.mxu0 %v4547_v13  ;;  %v445_v20 = vld [vmem:[%s6334_s8 + $0x4f8] sm:$0xff]  ;;  %v4586_v13 = vcombine.low %v433_v9, %v437_v11 }
 0x26d   : > { %v4595_v15 = vcombine.high %v441_v37, %v445_v20  ;;  %v473_v9 = vld [vmem:[%s6334_s8 + $0x5d8] sm:$0xff] }
 0x26e   : > { %v477_v11 = vld [vmem:[%s6334_s8 + $0x5f8] sm:$0xff] }
 0x272   : > { %3278 = vmatmul.mubr.bf16.gmra.mrb[116].mxu1 %v4670_v34 }
 0x273   : > { %3824 = vmatmul.mubr.bf16.gmra.mrb[52].mxu0 %v4546_v36  ;;  %3287 = vmatprep.mubr.bf16.mxu1 %v4679_v47  ;;  %v4594_v36 = vcombine.low %v441_v37, %v445_v20 }
 0x274   : > { %3833 = vmatprep.mubr.bf16.mxu0 %v4555_v54  ;;  %v4603_v54 = vcombine.high %v449_v17, %v453_v28 }
 0x27a   : > { %3288 = vmatmul.mubr.bf16.gmra.mrb[120].mxu1 %v4678_v61 }
 0x27b   : > { %3834 = vmatmul.mubr.bf16.gmra.mrb[56].mxu0 %v4554_v63  ;;  %3297 = vmatprep.mubr.bf16.mxu1 %v4687_v25  ;;  %v4602_v63 = vcombine.low %v449_v17, %v453_v28  ;;  %v481_v17 = vld [vmem:[%s6334_s8 + $0x618] sm:$0xff] }
 0x27c   : > { %3843 = vmatprep.mubr.bf16.mxu0 %v4563_v5  ;;  %v4611_v5 = vcombine.high %v457_v21, %v461_v59  ;;  %v485_v28 = vld [vmem:[%s6334_s8 + $0x638] sm:$0xff]  ;;  %v4626_v21 = vcombine.low %v473_v9, %v477_v11 }
 0x282   : > { %3298 = vmatmul.mubr.bf16.gmra.mrb[124].mxu1 %v4686_v10  ;;  %v469_v10 = vld [vmem:[%s6334_s8 + $0x5b8] sm:$0xff] }
 0x283   : > { %3844 = vmatmul.mubr.bf16.gmra.mrb[60].mxu0 %v4562_v58  ;;  %v4618_v37 = vcombine.low %v465_v56, %v469_v10 }
 0x284   : > { %3853 = vmatprep.mubr.bf16.mxu0 %v4571_v60 }
 0x28b   : > { %3854 = vmatmul.mubr.bf16.gmra.mrb[64].mxu0 %v4570_v0  ;;  %v4619_v0 = vcombine.high %v465_v56, %v469_v10  ;;  %v489_v56 = vld [vmem:[%s6334_s8 + $0x658] sm:$0xff] }
 0x28c   : > { %3863 = vmatprep.mubr.bf16.mxu0 %v4579_v35  ;;  %v493_v10 = vld [vmem:[%s6334_s8 + $0x678] sm:$0xff] }
 0x293   : > { %3864 = vmatmul.mubr.bf16.gmra.mrb[68].mxu0 %v4578_v8 }
 0x294   : > { %3873 = vmatprep.mubr.bf16.mxu0 %v4587_v14 }
 0x29b   : > { %3874 = vmatmul.mubr.bf16.gmra.mrb[72].mxu0 %v4586_v13  ;;  %v4627_v13 = vcombine.high %v473_v9, %v477_v11  ;;  %v672_v11 = vlaneseq }
 0x29c   : > { %3883 = vmatprep.mubr.bf16.mxu0 %v4595_v15 }
 0x29d   : > { %v6774_v43 = vpop.f32.mrb[32].mxu1 }
 0x29e   : > { %v6776_v34 = vpop.f32.mrb[33].mxu1 }
 0x29f   : > { %v6778_v47 = vpop.f32.mrb[34].mxu1 }
 0x2a0   : > { %v6780_v48 = vpop.f32.mrb[35].mxu1 }
 0x2a3   : > { %3884 = vmatmul.mubr.bf16.gmra.mrb[76].mxu0 %v4594_v36 }
 0x2a4   : > { %3893 = vmatprep.mubr.bf16.mxu0 %v4603_v54 }
 0x2a5   : > { %v6784_v1 = vpop.f32.mrb[36].mxu1 }
 0x2a6   : > { %v6786_v61 = vpop.f32.mrb[37].mxu1 }
 0x2a7   : > { %v6788_v25 = vpop.f32.mrb[38].mxu1 }
 0x2a8   : > { %v6790_v55 = vpop.f32.mrb[39].mxu1 }
 0x2ab   : > { %3894 = vmatmul.mubr.bf16.gmra.mrb[80].mxu0 %v4602_v63  ;;  %v4635_v63 = vcombine.high %v481_v17, %v485_v28 }
 0x2ac   : > { %3903 = vmatprep.mubr.bf16.mxu0 %v4611_v5 }
 0x2ad   : > { %v6794_v58 = vpop.f32.mrb[40].mxu1 }
 0x2ae   : > { %v6796_v60 = vpop.f32.mrb[41].mxu1 }
 0x2af   : > { %v6798_v62 = vpop.f32.mrb[42].mxu1 }
 0x2b0   : > { %v6800_v35 = vpop.f32.mrb[43].mxu1 }
 0x2b3   : > { %3904 = vmatmul.mubr.bf16.gmra.mrb[84].mxu0 %v4610_v7 }
 0x2b4   : > { %3913 = vmatprep.mubr.bf16.mxu0 %v4619_v0 }
 0x2b5   : > { %v6804_v8 = vpop.f32.mrb[44].mxu1 }
 0x2b6   : > { %v6806_v14 = vpop.f32.mrb[45].mxu1 }
 0x2b7   : > { %7346 = vst [vmem:[#allocation15_spill] sm:$0xff] %v6806_v14  ;;  %v6808_v20 = vpop.f32.mrb[46].mxu1 }
 0x2b8   : > { %7347 = vst [vmem:[#allocation16_spill] sm:$0xff] %v6808_v20  ;;  %v6810_v15 = vpop.f32.mrb[47].mxu1 }
 0x2b9   : > { %7348 = vst [vmem:[#allocation17_spill] sm:$0xff] %v6810_v15 }
 0x2bb   : > { %3914 = vmatmul.mubr.bf16.gmra.mrb[88].mxu0 %v4618_v37  ;;  %v4634_v37 = vcombine.low %v481_v17, %v485_v28  ;;  %v673_v28 = vshrl.u32 %v672_v11, 7 }
 0x2bc   : > { %3923 = vmatprep.mubr.bf16.mxu0 %v4627_v13 }
 0x2bd   : > { %v6814_v36 = vpop.f32.mrb[48].mxu1  ;;  %v678_v15 = vsub.s32 1, %v673_v28 }
 0x2be   : > { %7349 = vst [vmem:[#allocation18_spill] sm:$0xff] %v6814_v36  ;;  %v6816_v54 = vpop.f32.mrb[49].mxu1 }
 0x2bf   : > { %7350 = vst [vmem:[#allocation19_spill] sm:$0xff] %v6816_v54  ;;  %v6818_v59 = vpop.f32.mrb[50].mxu1  ;;  %v4643_v54 = vcombine.high %v489_v56, %v493_v10 }
 0x2c0   : > { %7351 = vst [vmem:[#allocation20_spill] sm:$0xff] %v6818_v59  ;;  %v6820_v5 = vpop.f32.mrb[51].mxu1 }
 0x2c1   : > { %7352 = vst [vmem:[#allocation21_spill] sm:$0xff] %v6820_v5  ;;  %v497_v5 = vld [vmem:[%s6334_s8 + $0x698] sm:$0xff] }
 0x2c3   : > { %3924 = vmatmul.mubr.bf16.gmra.mrb[92].mxu0 %v4626_v21  ;;  %v501_v21 = vld [vmem:[%s6334_s8 + $0x6b8] sm:$0xff] }
 0x2c4   : > { %3933 = vmatprep.mubr.bf16.mxu0 %v4635_v63  ;;  %v4651_v17 = vcombine.high %v497_v5, %v501_v21 }
 0x2c5   : > { %v6824_v7 = vpop.f32.mrb[52].mxu1 }
 0x2c6   : > { %7353 = vst [vmem:[#allocation22_spill] sm:$0xff] %v6824_v7  ;;  %v6826_v0 = vpop.f32.mrb[53].mxu1  ;;  %v4642_v7 = vcombine.low %v489_v56, %v493_v10  ;;  %v4650_v56 = vcombine.low %v497_v5, %v501_v21 }
 0x2c7   : > { %7354 = vst [vmem:[#allocation23_spill] sm:$0xff] %v6826_v0  ;;  %v6828_v13 = vpop.f32.mrb[54].mxu1  ;;  %v670_v0 = vld [vmem:[#allocation7] sm:$0x3] }
 0x2c8   : > { %7355 = vst [vmem:[#allocation24_spill] sm:$0xff] %v6828_v13  ;;  %v6830_v9 = vpop.f32.mrb[55].mxu1 }
 0x2c9   : > { %7356 = vst [vmem:[#allocation25_spill] sm:$0xff] %v6830_v9  ;;  %v674_v9 = vsub.s32 0, %v673_v28  ;;  %v513_v28 = vld [vmem:[%s6334_s8 + $0x718] sm:$0xff] }
 0x2cb   : > { %3934 = vmatmul.mubr.bf16.gmra.mrb[96].mxu0 %v4634_v37  ;;  %v505_v37 = vld [vmem:[%s6334_s8 + $0x6d8] sm:$0xff]  ;;  %v6850_v11 = vrot.slane %v670_v0, %v674_v9 }
 0x2cc   : > { %3943 = vmatprep.mubr.bf16.mxu0 %v4643_v54  ;;  %v509_v54 = vld [vmem:[%s6334_s8 + $0x6f8] sm:$0xff] }
 0x2cd   : > { %v6834_v63 = vpop.f32.mrb[56].mxu1  ;;  %v2641_v9 = vadd.f32 %v6596_v41, %v6850_v11 }
 0x2ce   : > { %7357 = vst [vmem:[#allocation26_spill] sm:$0xff] %v6834_v63  ;;  %v6836_v59 = vpop.f32.mrb[57].mxu1 }
 0x2cf   : > { %7358 = vst [vmem:[#allocation27_spill] sm:$0xff] %v6836_v59  ;;  %v6838_v36 = vpop.f32.mrb[58].mxu1  ;;  %v517_v59 = vld [vmem:[%s6334_s8 + $0x738] sm:$0xff] }
 0x2d0   : > { %7359 = vst [vmem:[#allocation28_spill] sm:$0xff] %v6838_v36  ;;  %v6840_v13 = vpop.f32.mrb[59].mxu1  ;;  %v4659_v36 = vcombine.high %v505_v37, %v509_v54 }
 0x2d1   : > { %7360 = vst [vmem:[#allocation29_spill] sm:$0xff] %v6840_v13 }
 0x2d3   : > { %3944 = vmatmul.mubr.bf16.gmra.mrb[100].mxu0 %v4642_v7  ;;  %v6854_v7 = vrot.slane %v670_v0, %v678_v15  ;;  %v4658_v0 = vcombine.low %v505_v37, %v509_v54  ;;  %v525_v37 = vld [vmem:[%s6334_s8 + $0x778] sm:$0xff] }
 0x2d4   : > { %3953 = vmatprep.mubr.bf16.mxu0 %v4651_v17  ;;  %v2637_v17 = vadd.f32 %v6592_v18, %v6850_v11 }
 0x2d5   : > { %v6844_v20 = vpop.f32.mrb[60].mxu1  ;;  %v2649_v54 = vadd.f32 %v6606_v45, %v6854_v7 }
 0x2d6   : > { %7361 = vst [vmem:[#allocation30_spill] sm:$0xff] %v6844_v20  ;;  %v6846_v63 = vpop.f32.mrb[61].mxu1  ;;  %v4667_v20 = vcombine.high %v513_v28, %v517_v59 }
 0x2d7   : > { %7362 = vst [vmem:[#allocation31_spill] sm:$0xff] %v6846_v63  ;;  %v6848_v10 = vpop.f32.mrb[62].mxu1  ;;  %v2639_v63 = vadd.f32 %v6594_v39, %v6854_v7 }
 0x2d8   : > { %7363 = vst [vmem:[#allocation32_spill] sm:$0xff] %v6848_v10  ;;  %v6852_v13 = vpop.f32.mrb[63].mxu1 }
 0x2d9   : > { %7364 = vst [vmem:[#allocation33_spill] sm:$0xff] %v6852_v13 }
 0x2db   : > { %3954 = vmatmul.mubr.bf16.gmra.mrb[104].mxu0 %v4650_v56 }
 0x2dc   : > { %3963 = vmatprep.mubr.bf16.mxu0 %v4659_v36  ;;  %v2643_v36 = vadd.f32 %v6598_v26, %v6854_v7  ;;  %v2647_v26 = vadd.f32 %v6604_v30, %v6850_v11 }
 0x2dd   : > { %v6862_v5 = vpop.f32.mrb[64].mxu1 }
 0x2de   : > { %7365 = vst [vmem:[#allocation34_spill] sm:$0xff] %v6862_v5  ;;  %v3695_v21 = vpop.f32.mrb[0].mxu0  ;;  %v6866_v13 = vpop.f32.mrb[65].mxu1 }
 0x2df   : > { %v4863_v10 = vadd.f32 %v3695_v21, %v2637_v17  ;;  %v3697_v15 = vpop.f32.mrb[1].mxu0  ;;  %v6870_v56 = vpop.f32.mrb[66].mxu1 }
 0x2e0   : > { %v4865_v18 = vadd.f32 %v3697_v15, %v2639_v63  ;;  %v3699_v39 = vpop.f32.mrb[2].mxu0  ;;  %v6872_v14 = vpop.f32.mrb[67].mxu1  ;;  %v521_v63 = vld [vmem:[%s6334_s8 + $0x758] sm:$0xff] }
 0x2e1   : > { %5651 = vtanh.f32 %v4863_v10  ;;  %v4867_v5 = vadd.f32 %v3699_v39, %v2641_v9  ;;  %v3701_v41 = vpop.f32.mrb[3].mxu0  ;;  %v2651_v9 = vadd.f32 %v6608_v40, %v6850_v11  ;;  %v4675_v45 = vcombine.high %v521_v63, %v525_v37 }
 0x2e2   : > { %5653 = vtanh.f32 %v4865_v18  ;;  %v4869_v17 = vadd.f32 %v3701_v41, %v2643_v36 }
 0x2e3   : > { %5655 = vtanh.f32 %v4867_v5  ;;  %3964 = vmatmul.mubr.bf16.gmra.mrb[108].mxu0 %v4658_v0  ;;  %v4666_v0 = vcombine.low %v513_v28, %v517_v59  ;;  %v2657_v28 = vadd.f32 %v6616_v46, %v6850_v11  ;;  %v2661_v46 = vadd.f32 %v6620_v49, %v6850_v11 }
 0x2e4   : > { %5657 = vtanh.f32 %v4869_v17  ;;  %3973 = vmatprep.mubr.bf16.mxu0 %v4667_v20  ;;  %v2653_v20 = vadd.f32 %v6610_v19, %v6854_v7 }
 0x2e5   : > { %v6880_v21 = vpop.f32.mrb[68].mxu1 }
 0x2e6   : > { %v3705_v10 = vpop.f32.mrb[4].mxu0  ;;  %v6884_v36 = vpop.f32.mrb[69].mxu1 }
 0x2e7   : > { %v4871_v15 = vadd.f32 %v3705_v10, %v2647_v26  ;;  %7366 = vst [vmem:[#allocation35_spill] sm:$0xff] %v6884_v36  ;;  %v3707_v5 = vpop.f32.mrb[5].mxu0  ;;  %v6888_v18 = vpop.f32.mrb[70].mxu1 }
 0x2e8   : > { %v4873_v30 = vadd.f32 %v3707_v5, %v2649_v54  ;;  %7367 = vst [vmem:[#allocation36_spill] sm:$0xff] %v6888_v18  ;;  %v3709_v39 = vpop.f32.mrb[6].mxu0  ;;  %v6890_v17 = vpop.f32.mrb[71].mxu1  ;;  %v6895_v54 = vld [vmem:[%s6334_s8 + $0x798] sm:$0xff]  ;;  %v4674_v18 = vcombine.low %v521_v63, %v525_v37 }
 0x2e9   : > { %5659 = vtanh.f32 %v4871_v15  ;;  %v4875_v41 = vadd.f32 %v3709_v39, %v2651_v9  ;;  %7368 = vst [vmem:[#allocation37_spill] sm:$0xff] %v6890_v17  ;;  %v3711_v40 = vpop.f32.mrb[7].mxu0  ;;  %v6898_v5 = vld [vmem:[%s6334_s8 + $0x7b8] sm:$0xff]  ;;  %v6900_v9 = vld [vmem:[#allocation8] sm:$0xff] }
 0x2ea   : > { %5661 = vtanh.f32 %v4873_v30  ;;  %v4877_v26 = vadd.f32 %v3711_v40, %v2653_v20  ;;  %v2659_v20 = vadd.f32 %v6618_v57, %v6854_v7  ;;  %v2663_v57 = vadd.f32 %v6622_v50, %v6854_v7 }
 0x2eb   : > { %v5652_v10 = vpop.eup %5651  ;;  %5663 = vtanh.f32 %v4875_v41  ;;  %3974 = vmatmul.mubr.bf16.gmra.mrb[112].mxu0 %v4666_v0 }
 0x2ec   : > { %v5654_v59 = vpop.eup %5653  ;;  %5665 = vtanh.f32 %v4877_v26  ;;  %3983 = vmatprep.mubr.bf16.mxu0 %v4675_v45  ;;  %v6908_v45 = vcombine.high %v6900_v9, %v6900_v9 }
 0x2ed   : > { %v5656_v19 = vpop.eup %5655  ;;  %v6904_v30 = vpop.f32.mrb[72].mxu1 }
 0x2ee   : > { %v5658_v15 = vpop.eup %5657  ;;  %7369 = vst [vmem:[#allocation38_spill] sm:$0xff] %v6904_v30  ;;  %v3715_v0 = vpop.f32.mrb[8].mxu0  ;;  %v4143_v39 = vpack.c.bf16 %v5656_v19, %v5652_v10  ;;  %7370 = vst [vmem:[#allocation39_spill] sm:$0xff] %v6908_v45  ;;  %v4683_v19 = vcombine.high %v6895_v54, %v6898_v5  ;;  %4252 = vmatprep.mubr.bf16.mxu1 %v6908_v45 }
 0x2ef   : > { %v4879_v41 = vadd.f32 %v3715_v0, %v2657_v28  ;;  %v6912_v40 = vpop.f32.mrb[73].mxu1  ;;  %v3717_v26 = vpop.f32.mrb[9].mxu0  ;;  %v4144_v17 = vpack.c.bf16 %v5658_v15, %v5654_v59  ;;  %v537_v0 = vld [vmem:[%s6334_s8 + $0x7d8] sm:$0xff] }
 0x2f0   : > { %v4881_v36 = vadd.f32 %v3717_v26, %v2659_v20  ;;  %v6916_v30 = vpop.f32.mrb[74].mxu1  ;;  %v3719_v10 = vpop.f32.mrb[10].mxu0  ;;  %v2667_v20 = vadd.f32 %v6628_v3, %v6850_v11  ;;  %v2669_v26 = vadd.f32 %v6630_v2, %v6854_v7  ;;  %v4682_v3 = vcombine.low %v6895_v54, %v6898_v5 }
 0x2f1   : > { %5667 = vtanh.f32 %v4879_v41  ;;  %v4883_v49 = vadd.f32 %v3719_v10, %v2661_v46  ;;  %v6921_v28 = vpop.f32.mrb[75].mxu1  ;;  %v3721_v59 = vpop.f32.mrb[11].mxu0  ;;  %4220 = vmatprep.subr.bf16.mxu1 %v4144_v17  ;;  %v541_v46 = vld [vmem:[%s6334_s8 + $0x7f8] sm:$0xff]  ;;  %v2677_v5 = vadd.f32 %v6640_v29, %v6850_v11  ;;  %v2683_v29 = vadd.f32 %v6646_v33, %v6854_v7 }
 0x2f2   : > { %5669 = vtanh.f32 %v4881_v36  ;;  %v4885_v63 = vadd.f32 %v3721_v59, %v2663_v57  ;;  %4221 = vmatpush1.bf16.xpose.msra.mxu1 %v4143_v39  ;;  %v2673_v59 = vadd.f32 %v6634_v27, %v6854_v7  ;;  %v4691_v45 = vcombine.high %v537_v0, %v541_v46 }
 0x2f3   : > { %v5660_v50 = vpop.eup %5659  ;;  %5671 = vtanh.f32 %v4883_v49  ;;  %3984 = vmatmul.mubr.bf16.gmra.mrb[116].mxu0 %v4674_v18  ;;  %v2671_v18 = vadd.f32 %v6632_v53, %v6850_v11  ;;  %v2687_v33 = vadd.f32 %v6652_v12, %v6850_v11 }
 0x2f4   : > { %v5662_v37 = vpop.eup %5661  ;;  %5673 = vtanh.f32 %v4885_v63  ;;  %3993 = vmatprep.mubr.bf16.mxu0 %v4683_v19 }
 0x2f5   : > { %v5664_v15 = vpop.eup %5663  ;;  %v6929_v17 = vpop.f32.mrb[76].mxu1 }
 0x2f6   : > { %v5666_v41 = vpop.eup %5665  ;;  %7371 = vst [vmem:[#allocation40_spill] sm:$0xff] %v6929_v17  ;;  %v3725_v36 = vpop.f32.mrb[12].mxu0  ;;  %v4145_v39 = vpack.c.bf16 %v5664_v15, %v5660_v50 }
 0x2f7   : > { %v4887_v57 = vadd.f32 %v3725_v36, %v2667_v20  ;;  %v6933_v10 = vpop.f32.mrb[77].mxu1  ;;  %v3727_v19 = vpop.f32.mrb[13].mxu0  ;;  %v4146_v49 = vpack.c.bf16 %v5666_v41, %v5662_v37 }
 0x2f8   : > { %v4889_v63 = vadd.f32 %v3727_v19, %v2669_v26  ;;  %v6939_v2 = vpop.f32.mrb[78].mxu1  ;;  %v3729_v17 = vpop.f32.mrb[14].mxu0  ;;  %v2679_v26 = vadd.f32 %v6642_v31, %v6854_v7 }
 0x2f9   : > { %5675 = vtanh.f32 %v4887_v57  ;;  %v4891_v50 = vadd.f32 %v3729_v17, %v2671_v18  ;;  %v6941_v15 = vpop.f32.mrb[79].mxu1  ;;  %v3731_v53 = vpop.f32.mrb[15].mxu0  ;;  %4222 = vmatprep.subr.bf16.mxu1 %v4146_v49 }
 0x2fa   : > { %5677 = vtanh.f32 %v4889_v63  ;;  %v4893_v20 = vadd.f32 %v3731_v53, %v2673_v59  ;;  %4223 = vmatpush1.bf16.xpose.msra.mxu1 %v4145_v39  ;;  %v2681_v39 = vadd.f32 %v6644_v4, %v6850_v11 }
 0x2fb   : > { %v5668_v37 = vpop.eup %5667  ;;  %5679 = vtanh.f32 %v4891_v50  ;;  %3994 = vmatmul.mubr.bf16.gmra.mrb[120].mxu0 %v4682_v3  ;;  %v4690_v3 = vcombine.low %v537_v0, %v541_v46 }
 0x2fc   : > { %v5670_v54 = vpop.eup %5669  ;;  %5681 = vtanh.f32 %v4893_v20  ;;  %4003 = vmatprep.mubr.bf16.mxu0 %v4691_v45 }
 0x2fd   : > { %v5672_v27 = vpop.eup %5671  ;;  %v6947_v17 = vpop.f32.mrb[80].mxu1 }
 0x2fe   : > { %v5674_v41 = vpop.eup %5673  ;;  %v3735_v36 = vpop.f32.mrb[16].mxu0  ;;  %v4147_v18 = vpack.c.bf16 %v5672_v27, %v5668_v37  ;;  %v2689_v27 = vadd.f32 %v6654_v16, %v6854_v7 }
 0x2ff   : > { %v4895_v57 = vadd.f32 %v3735_v36, %v2677_v5  ;;  %v6951_v19 = vpop.f32.mrb[81].mxu1  ;;  %v3737_v49 = vpop.f32.mrb[17].mxu0  ;;  %v4148_v45 = vpack.c.bf16 %v5674_v41, %v5670_v54  ;;  %v2691_v36 = vadd.f32 %v6656_v22, %v6850_v11 }
 0x300   : > { %v4897_v59 = vadd.f32 %v3737_v49, %v2679_v26  ;;  %v6955_v63 = vpop.f32.mrb[82].mxu1  ;;  %v3739_v31 = vpop.f32.mrb[18].mxu0 }
 0x301   : > { %5683 = vtanh.f32 %v4895_v57  ;;  %v4899_v50 = vadd.f32 %v3739_v31, %v2681_v39  ;;  %v6957_v53 = vpop.f32.mrb[83].mxu1  ;;  %v3741_v20 = vpop.f32.mrb[19].mxu0  ;;  %4224 = vmatprep.subr.bf16.mxu1 %v4148_v45  ;;  %v2693_v45 = vadd.f32 %v6658_v24, %v6854_v7  ;;  %v2697_v24 = vadd.f32 %v6664_v32, %v6850_v11 }
 0x302   : > { %5685 = vtanh.f32 %v4897_v59  ;;  %v4901_v4 = vadd.f32 %v3741_v20, %v2683_v29  ;;  %4225 = vmatpush1.bf16.xpose.msra.mxu1 %v4147_v18 }
 0x303   : > { %v5676_v37 = vpop.eup %5675  ;;  %5687 = vtanh.f32 %v4899_v50  ;;  %4004 = vmatmul.mubr.bf16.gmra.mrb[124].mxu0 %v4690_v3 }
 0x304   : > { %v5678_v0 = vpop.eup %5677  ;;  %5689 = vtanh.f32 %v4901_v4 }
 0x305   : > { %v5680_v46 = vpop.eup %5679  ;;  %v6963_v5 = vpop.f32.mrb[84].mxu1 }
 0x306   : > { %v5682_v54 = vpop.eup %5681  ;;  %v3745_v41 = vpop.f32.mrb[20].mxu0  ;;  %v4149_v26 = vpack.c.bf16 %v5680_v46, %v5676_v37 }
 0x307   : > { %v4903_v18 = vadd.f32 %v3745_v41, %v2687_v33  ;;  %v6967_v39 = vpop.f32.mrb[85].mxu1  ;;  %v3747_v57 = vpop.f32.mrb[21].mxu0  ;;  %v4150_v49 = vpack.c.bf16 %v5682_v54, %v5678_v0  ;;  %v2699_v0 = vadd.f32 %v6666_v38, %v6854_v7 }
 0x308   : > { %v4905_v12 = vadd.f32 %v3747_v57, %v2689_v27  ;;  %v6971_v3 = vpop.f32.mrb[86].mxu1  ;;  %v3749_v29 = vpop.f32.mrb[22].mxu0  ;;  %v2701_v27 = vadd.f32 %v6668_v42, %v6850_v11  ;;  %v2703_v57 = vadd.f32 %v6670_v44, %v6854_v7  ;;  %v2707_v44 = vadd.f32 %v6676_v51, %v6850_v11 }
 0x309   : > { %5691 = vtanh.f32 %v4903_v18  ;;  %v4907_v16 = vadd.f32 %v3749_v29, %v2691_v36  ;;  %v6973_v59 = vpop.f32.mrb[87].mxu1  ;;  %v3751_v31 = vpop.f32.mrb[23].mxu0  ;;  %4226 = vmatprep.subr.bf16.mxu1 %v4150_v49 }
 0x30a   : > { %5693 = vtanh.f32 %v4905_v12  ;;  %v4909_v22 = vadd.f32 %v3751_v31, %v2693_v45  ;;  %4227 = vmatpush1.bf16.xpose.msra.mxu1 %v4149_v26 }
 0x30b   : > { %v5684_v50 = vpop.eup %5683  ;;  %5695 = vtanh.f32 %v4907_v16 }
 0x30c   : > { %v5686_v20 = vpop.eup %5685  ;;  %5697 = vtanh.f32 %v4909_v22 }
 0x30d   : > { %v5688_v4 = vpop.eup %5687  ;;  %v6979_v46 = vpop.f32.mrb[88].mxu1 }
 0x30e   : > { %v5690_v37 = vpop.eup %5689  ;;  %v3755_v33 = vpop.f32.mrb[24].mxu0  ;;  %v4151_v54 = vpack.c.bf16 %v5688_v4, %v5684_v50 }
 0x30f   : > { %v4911_v41 = vadd.f32 %v3755_v33, %v2697_v24  ;;  %v6983_v26 = vpop.f32.mrb[89].mxu1  ;;  %v3757_v36 = vpop.f32.mrb[25].mxu0  ;;  %v4152_v18 = vpack.c.bf16 %v5690_v37, %v5686_v20  ;;  %v2709_v20 = vadd.f32 %v6678_v23, %v6854_v7 }
 0x310   : > { %v4913_v32 = vadd.f32 %v3757_v36, %v2699_v0  ;;  %v6987_v49 = vpop.f32.mrb[90].mxu1  ;;  %v3759_v45 = vpop.f32.mrb[26].mxu0  ;;  %v2711_v0 = vadd.f32 %v6680_v52, %v6850_v11  ;;  %v2713_v36 = vadd.f32 %v6682_v6, %v6854_v7  ;;  %v4926_v6 = vadd.f32 %v6774_v43, %v6850_v11 }
 0x311   : > { %5699 = vtanh.f32 %v4911_v41  ;;  %v4915_v38 = vadd.f32 %v3759_v45, %v2701_v27  ;;  %v6989_v12 = vpop.f32.mrb[91].mxu1  ;;  %v3761_v29 = vpop.f32.mrb[27].mxu0  ;;  %4228 = vmatprep.subr.bf16.mxu1 %v4152_v18 }
 0x312   : > { %5701 = vtanh.f32 %v4913_v32  ;;  %v4917_v42 = vadd.f32 %v3761_v29, %v2703_v57  ;;  %4229 = vmatpush1.bf16.xpose.msra.mxu1 %v4151_v54 }
 0x313   : > { %v5692_v16 = vpop.eup %5691  ;;  %5703 = vtanh.f32 %v4915_v38 }
 0x314   : > { %v5694_v31 = vpop.eup %5693  ;;  %5705 = vtanh.f32 %v4917_v42 }
 0x315   : > { %v5696_v22 = vpop.eup %5695  ;;  %v6995_v4 = vpop.f32.mrb[92].mxu1 }
 0x316   : > { %v5698_v50 = vpop.eup %5697  ;;  %v3765_v24 = vpop.f32.mrb[28].mxu0  ;;  %v4153_v37 = vpack.c.bf16 %v5696_v22, %v5692_v16 }
 0x317   : > { %v4919_v33 = vadd.f32 %v3765_v24, %v2707_v44  ;;  %v6999_v54 = vpop.f32.mrb[93].mxu1  ;;  %v3767_v27 = vpop.f32.mrb[29].mxu0  ;;  %v4154_v41 = vpack.c.bf16 %v5698_v50, %v5694_v31  ;;  %v4928_v31 = vadd.f32 %v6776_v34, %v6854_v7 }
 0x318   : > { %v4921_v51 = vadd.f32 %v3767_v27, %v2709_v20  ;;  %v7003_v18 = vpop.f32.mrb[94].mxu1  ;;  %v3769_v57 = vpop.f32.mrb[30].mxu0  ;;  %v4930_v20 = vadd.f32 %v6778_v47, %v6850_v11  ;;  %v4932_v27 = vadd.f32 %v6780_v48, %v6854_v7  ;;  %v4934_v48 = vadd.f32 %v6784_v1, %v6850_v11 }
 0x319   : > { %5707 = vtanh.f32 %v4919_v33  ;;  %v4923_v23 = vadd.f32 %v3769_v57, %v2711_v0  ;;  %v7005_v32 = vpop.f32.mrb[95].mxu1  ;;  %v3771_v45 = vpop.f32.mrb[31].mxu0  ;;  %4230 = vmatprep.subr.bf16.mxu1 %v4154_v41 }
 0x31a   : > { %5709 = vtanh.f32 %v4921_v51  ;;  %v4925_v52 = vadd.f32 %v3771_v45, %v2713_v36  ;;  %4231 = vmatpush1.bf16.xpose.msra.mxu1 %v4153_v37 }
 0x31b   : > { %v5700_v38 = vpop.eup %5699  ;;  %5711 = vtanh.f32 %v4923_v23 }
 0x31c   : > { %v5702_v29 = vpop.eup %5701  ;;  %5713 = vtanh.f32 %v4925_v52 }
 0x31d   : > { %v5704_v42 = vpop.eup %5703  ;;  %v7011_v22 = vpop.f32.mrb[96].mxu1 }
 0x31e   : > { %v5706_v16 = vpop.eup %5705  ;;  %v3775_v44 = vpop.f32.mrb[32].mxu0  ;;  %v4155_v50 = vpack.c.bf16 %v5704_v42, %v5700_v38 }
 0x31f   : > { %v4927_v24 = vadd.f32 %v4926_v6, %v3775_v44  ;;  %v7015_v37 = vpop.f32.mrb[97].mxu1  ;;  %v3777_v0 = vpop.f32.mrb[33].mxu0  ;;  %v4156_v33 = vpack.c.bf16 %v5706_v16, %v5702_v29  ;;  %v4936_v29 = vadd.f32 %v6786_v61, %v6854_v7 }
 0x320   : > { %v4929_v43 = vadd.f32 %v4928_v31, %v3777_v0  ;;  %v7019_v41 = vpop.f32.mrb[98].mxu1  ;;  %v3779_v36 = vpop.f32.mrb[34].mxu0  ;;  %v4938_v31 = vadd.f32 %v6788_v25, %v6850_v11  ;;  %v4940_v0 = vadd.f32 %v6790_v55, %v6854_v7  ;;  %v4942_v55 = vadd.f32 %v6794_v58, %v6850_v11 }
 0x321   : > { %5715 = vtanh.f32 %v4927_v24  ;;  %v4931_v34 = vadd.f32 %v4930_v20, %v3779_v36  ;;  %v7021_v51 = vpop.f32.mrb[99].mxu1  ;;  %v3781_v57 = vpop.f32.mrb[35].mxu0  ;;  %4232 = vmatprep.subr.bf16.mxu1 %v4156_v33 }
 0x322   : > { %5717 = vtanh.f32 %v4929_v43  ;;  %v4933_v47 = vadd.f32 %v4932_v27, %v3781_v57  ;;  %4233 = vmatpush1.bf16.xpose.msra.mxu1 %v4155_v50 }
 0x323   : > { %v5708_v23 = vpop.eup %5707  ;;  %5719 = vtanh.f32 %v4931_v34 }
 0x324   : > { %v5710_v45 = vpop.eup %5709  ;;  %5721 = vtanh.f32 %v4933_v47 }
 0x325   : > { %v5712_v52 = vpop.eup %5711  ;;  %v7027_v42 = vpop.f32.mrb[100].mxu1 }
 0x326   : > { %v5714_v38 = vpop.eup %5713  ;;  %v3785_v6 = vpop.f32.mrb[36].mxu0  ;;  %v4157_v16 = vpack.c.bf16 %v5712_v52, %v5708_v23 }
 0x327   : > { %v4935_v44 = vadd.f32 %v4934_v48, %v3785_v6  ;;  %v7031_v50 = vpop.f32.mrb[101].mxu1  ;;  %v3787_v20 = vpop.f32.mrb[37].mxu0  ;;  %v4158_v24 = vpack.c.bf16 %v5714_v38, %v5710_v45  ;;  %v4944_v45 = vadd.f32 %v6796_v60, %v6854_v7 }
 0x328   : > { %v4937_v1 = vadd.f32 %v4936_v29, %v3787_v20  ;;  %v7035_v33 = vpop.f32.mrb[102].mxu1  ;;  %v3789_v27 = vpop.f32.mrb[38].mxu0  ;;  %v4946_v29 = vadd.f32 %v6798_v62, %v6850_v11  ;;  %v4948_v20 = vadd.f32 %v6800_v35, %v6854_v7  ;;  %v4950_v35 = vadd.f32 %v6804_v8, %v6850_v11 }
 0x329   : > { %5723 = vtanh.f32 %v4935_v44  ;;  %v4939_v61 = vadd.f32 %v4938_v31, %v3789_v27  ;;  %v7037_v43 = vpop.f32.mrb[103].mxu1  ;;  %v3791_v36 = vpop.f32.mrb[39].mxu0  ;;  %4234 = vmatprep.subr.bf16.mxu1 %v4158_v24 }
 0x32a   : > { %5725 = vtanh.f32 %v4937_v1  ;;  %v4941_v25 = vadd.f32 %v4940_v0, %v3791_v36  ;;  %4235 = vmatpush1.bf16.xpose.msra.mxu1 %v4157_v16 }
 0x32b   : > { %v5716_v34 = vpop.eup %5715  ;;  %5727 = vtanh.f32 %v4939_v61 }
 0x32c   : > { %v5718_v57 = vpop.eup %5717  ;;  %5729 = vtanh.f32 %v4941_v25 }
 0x32d   : > { %v5720_v47 = vpop.eup %5719  ;;  %v7043_v52 = vpop.f32.mrb[104].mxu1 }
 0x32e   : > { %v5722_v23 = vpop.eup %5721  ;;  %v3795_v48 = vpop.f32.mrb[40].mxu0  ;;  %v4159_v38 = vpack.c.bf16 %v5720_v47, %v5716_v34 }
 0x32f   : > { %v4943_v6 = vadd.f32 %v4942_v55, %v3795_v48  ;;  %v7047_v16 = vpop.f32.mrb[105].mxu1  ;;  %v3797_v31 = vpop.f32.mrb[41].mxu0  ;;  %v4160_v44 = vpack.c.bf16 %v5722_v23, %v5718_v57  ;;  %v7372_v57 = vld [vmem:[#allocation15_spill] sm:$0xff]  ;;  %v7373_v48 = vld [vmem:[#allocation16_spill] sm:$0xff] }
 0x330   : > { %v4945_v58 = vadd.f32 %v4944_v45, %v3797_v31  ;;  %v7051_v24 = vpop.f32.mrb[106].mxu1  ;;  %v3799_v0 = vpop.f32.mrb[42].mxu0  ;;  %v4952_v47 = vadd.f32 %v7372_v57, %v6854_v7 }
 0x331   : > { %5731 = vtanh.f32 %v4943_v6  ;;  %v4947_v60 = vadd.f32 %v4946_v29, %v3799_v0  ;;  %v7053_v1 = vpop.f32.mrb[107].mxu1  ;;  %v3801_v27 = vpop.f32.mrb[43].mxu0  ;;  %4236 = vmatprep.subr.bf16.mxu1 %v4160_v44  ;;  %v4954_v29 = vadd.f32 %v7373_v48, %v6850_v11  ;;  %v7379_v48 = vld [vmem:[#allocation19_spill] sm:$0xff] }
 0x332   : > { %5733 = vtanh.f32 %v4945_v58  ;;  %v4949_v62 = vadd.f32 %v4948_v20, %v3801_v27  ;;  %4237 = vmatpush1.bf16.xpose.msra.mxu1 %v4159_v38  ;;  %v7375_v20 = vld [vmem:[#allocation17_spill] sm:$0xff] }
 0x333   : > { %v5724_v61 = vpop.eup %5723  ;;  %5735 = vtanh.f32 %v4947_v60  ;;  %v4956_v58 = vadd.f32 %v7375_v20, %v6854_v7 }
 0x334   : > { %v5726_v36 = vpop.eup %5725  ;;  %5737 = vtanh.f32 %v4949_v62 }
 0x335   : > { %v5728_v25 = vpop.eup %5727  ;;  %v7059_v55 = vpop.f32.mrb[108].mxu1 }
 0x336   : > { %v5730_v34 = vpop.eup %5729  ;;  %v3805_v23 = vpop.f32.mrb[44].mxu0  ;;  %v4161_v45 = vpack.c.bf16 %v5728_v25, %v5724_v61 }
 0x337   : > { %v4951_v38 = vadd.f32 %v4950_v35, %v3805_v23  ;;  %v7063_v6 = vpop.f32.mrb[109].mxu1  ;;  %v3807_v31 = vpop.f32.mrb[45].mxu0  ;;  %v4162_v44 = vpack.c.bf16 %v5730_v34, %v5726_v36  ;;  %v7378_v34 = vld [vmem:[#allocation18_spill] sm:$0xff] }
 0x338   : > { %7374 = vst [vmem:[#allocation15_spill] sm:$0xff] %v7063_v6  ;;  %v4953_v8 = vadd.f32 %v4952_v47, %v3807_v31  ;;  %v7067_v0 = vpop.f32.mrb[110].mxu1  ;;  %v3809_v60 = vpop.f32.mrb[46].mxu0  ;;  %v4958_v47 = vadd.f32 %v7378_v34, %v6850_v11 }
 0x339   : > { %7376 = vst [vmem:[#allocation16_spill] sm:$0xff] %v7067_v0  ;;  %5739 = vtanh.f32 %v4951_v38  ;;  %v4955_v27 = vadd.f32 %v4954_v29, %v3809_v60  ;;  %v7069_v62 = vpop.f32.mrb[111].mxu1  ;;  %v3811_v61 = vpop.f32.mrb[47].mxu0  ;;  %4238 = vmatprep.subr.bf16.mxu1 %v4162_v44  ;;  %v4960_v38 = vadd.f32 %v7379_v48, %v6854_v7  ;;  %v7381_v44 = vld [vmem:[#allocation20_spill] sm:$0xff] }
 0x33a   : > { %7377 = vst [vmem:[#allocation17_spill] sm:$0xff] %v7069_v62  ;;  %5741 = vtanh.f32 %v4953_v8  ;;  %v4957_v25 = vadd.f32 %v4956_v58, %v3811_v61  ;;  %4239 = vmatpush1.bf16.xpose.msra.mxu1 %v4161_v45  ;;  %v4962_v58 = vadd.f32 %v7381_v44, %v6850_v11  ;;  %v7383_v61 = vld [vmem:[#allocation21_spill] sm:$0xff]  ;;  %v6105_v44 = vmov 0  }
 0x33b   : > { %v5732_v35 = vpop.eup %5731  ;;  %5743 = vtanh.f32 %v4955_v27  ;;  %5456 = vset.pattern.permute.xlu0 %v6105_v44  ;;  %v7390_v44 = vld [vmem:[#allocation25_spill] sm:$0xff] }
 0x33c   : > { %v5734_v57 = vpop.eup %5733  ;;  %5745 = vtanh.f32 %v4957_v25  ;;  %v4964_v25 = vadd.f32 %v7383_v61, %v6854_v7 }
 0x33d   : > { %v5736_v36 = vpop.eup %5735  ;;  %v7075_v29 = vpop.f32.mrb[112].mxu1 }
 0x33e   : > { %v5738_v23 = vpop.eup %5737  ;;  %7380 = vst [vmem:[#allocation18_spill] sm:$0xff] %v7075_v29  ;;  %v3815_v31 = vpop.f32.mrb[48].mxu0  ;;  %v4163_v20 = vpack.c.bf16 %v5736_v36, %v5732_v35 }
 0x33f   : > { %v4959_v45 = vadd.f32 %v4958_v47, %v3815_v31  ;;  %v7079_v8 = vpop.f32.mrb[113].mxu1  ;;  %v3817_v60 = vpop.f32.mrb[49].mxu0  ;;  %v4164_v27 = vpack.c.bf16 %v5738_v23, %v5734_v57  ;;  %v7386_v23 = vld [vmem:[#allocation22_spill] sm:$0xff] }
 0x340   : > { %7382 = vst [vmem:[#allocation19_spill] sm:$0xff] %v7079_v8  ;;  %v4961_v34 = vadd.f32 %v4960_v38, %v3817_v60  ;;  %v7083_v62 = vpop.f32.mrb[114].mxu1  ;;  %v3819_v0 = vpop.f32.mrb[50].mxu0  ;;  %v4966_v38 = vadd.f32 %v7386_v23, %v6850_v11 }
 0x341   : > { %7384 = vst [vmem:[#allocation20_spill] sm:$0xff] %v7083_v62  ;;  %5747 = vtanh.f32 %v4959_v45  ;;  %v4963_v48 = vadd.f32 %v4962_v58, %v3819_v0  ;;  %v7085_v29 = vpop.f32.mrb[115].mxu1  ;;  %v3821_v35 = vpop.f32.mrb[51].mxu0  ;;  %4240 = vmatprep.subr.bf16.mxu1 %v4164_v27  ;;  %v4207_v0 = vld [vmem:[%s7326_s4] sm:$0xff]  ;;  %v7387_v45 = vld [vmem:[#allocation23_spill] sm:$0xff] }
 0x342   : > { %7385 = vst [vmem:[#allocation21_spill] sm:$0xff] %v7085_v29  ;;  %5749 = vtanh.f32 %v4961_v34  ;;  %v4965_v36 = vadd.f32 %v4964_v25, %v3821_v35  ;;  %4241 = vmatpush1.bf16.xpose.msra.mxu1 %v4163_v20  ;;  %v4968_v60 = vadd.f32 %v7387_v45, %v6854_v7  ;;  %4210 = vperm.xlu0 %5456, %v4207_v0   ;;  %v7389_v25 = vld [vmem:[#allocation24_spill] sm:$0xff] }
 0x343   : > { %v5740_v47 = vpop.eup %5739  ;;  %5751 = vtanh.f32 %v4963_v48  ;;  %v4970_v34 = vadd.f32 %v7389_v25, %v6850_v11  ;;  %v4972_v29 = vadd.f32 %v7390_v44, %v6854_v7  ;;  %v7394_v25 = vld [vmem:[#allocation27_spill] sm:$0xff] }
 0x344   : > { %v5742_v31 = vpop.eup %5741  ;;  %5753 = vtanh.f32 %v4965_v36 }
 0x345   : > { %v5744_v57 = vpop.eup %5743  ;;  %v7094_v27 = vpop.f32.mrb[116].mxu1 }
 0x346   : > { %v5746_v58 = vpop.eup %5745  ;;  %7388 = vst [vmem:[#allocation22_spill] sm:$0xff] %v7094_v27  ;;  %v3825_v20 = vpop.f32.mrb[52].mxu0  ;;  %v4165_v61 = vpack.c.bf16 %v5744_v57, %v5740_v47 }
 0x347   : > { %v4967_v48 = vadd.f32 %v4966_v38, %v3825_v20  ;;  %v7098_v35 = vpop.f32.mrb[117].mxu1  ;;  %v3827_v36 = vpop.f32.mrb[53].mxu0  ;;  %v4166_v23 = vpack.c.bf16 %v5746_v58, %v5742_v31  ;;  %v7393_v58 = vld [vmem:[#allocation26_spill] sm:$0xff] }
 0x348   : > { %v4969_v62 = vadd.f32 %v4968_v60, %v3827_v36  ;;  %v7102_v8 = vpop.f32.mrb[118].mxu1  ;;  %v3829_v45 = vpop.f32.mrb[54].mxu0  ;;  %v4974_v60 = vadd.f32 %v7393_v58, %v6850_v11 }
 0x349   : > { %7391 = vst [vmem:[#allocation23_spill] sm:$0xff] %v7102_v8  ;;  %5755 = vtanh.f32 %v4967_v48  ;;  %v4971_v27 = vadd.f32 %v4970_v34, %v3829_v45  ;;  %v7104_v6 = vpop.f32.mrb[119].mxu1  ;;  %v3831_v47 = vpop.f32.mrb[55].mxu0  ;;  %4242 = vmatprep.subr.bf16.mxu1 %v4166_v23  ;;  %v4976_v48 = vadd.f32 %v7394_v25, %v6854_v7 }
 0x34a   : > { %7392 = vst [vmem:[#allocation24_spill] sm:$0xff] %v7104_v6  ;;  %5757 = vtanh.f32 %v4969_v62  ;;  %v4973_v57 = vadd.f32 %v4972_v29, %v3831_v47  ;;  %4243 = vmatpush1.bf16.xpose.msra.mxu1 %v4165_v61  ;;  %v7396_v62 = vld [vmem:[#allocation28_spill] sm:$0xff]  ;;  %v7398_v47 = vld [vmem:[#allocation29_spill] sm:$0xff] }
 0x34b   : > { %v5748_v38 = vpop.eup %5747  ;;  %5759 = vtanh.f32 %v4971_v27  ;;  %v4978_v29 = vadd.f32 %v7396_v62, %v6850_v11 }
 0x34c   : > { %v5750_v0 = vpop.eup %5749  ;;  %5761 = vtanh.f32 %v4973_v57  ;;  %v4980_v57 = vadd.f32 %v7398_v47, %v6854_v7 }
 0x34d   : > { %v5752_v31 = vpop.eup %5751  ;;  %v7110_v34 = vpop.f32.mrb[120].mxu1 }
 0x34e   : > { %v5754_v20 = vpop.eup %5753  ;;  %7395 = vst [vmem:[#allocation25_spill] sm:$0xff] %v7110_v34  ;;  %v3835_v36 = vpop.f32.mrb[56].mxu0  ;;  %v4167_v44 = vpack.c.bf16 %v5752_v31, %v5748_v38 }
 0x34f   : > { %v4975_v61 = vadd.f32 %v4974_v60, %v3835_v36  ;;  %v7114_v23 = vpop.f32.mrb[121].mxu1  ;;  %v3837_v27 = vpop.f32.mrb[57].mxu0  ;;  %v4168_v45 = vpack.c.bf16 %v5754_v20, %v5750_v0  ;;  %v7401_v20 = vld [vmem:[#allocation30_spill] sm:$0xff] }
 0x350   : > { %7397 = vst [vmem:[#allocation26_spill] sm:$0xff] %v7114_v23  ;;  %v4977_v58 = vadd.f32 %v4976_v48, %v3837_v27  ;;  %v7118_v6 = vpop.f32.mrb[122].mxu1  ;;  %v3839_v8 = vpop.f32.mrb[58].mxu0  ;;  %v4982_v48 = vadd.f32 %v7401_v20, %v6850_v11  ;;  %v7402_v27 = vld [vmem:[#allocation31_spill] sm:$0xff] }
 0x351   : > { %7399 = vst [vmem:[#allocation27_spill] sm:$0xff] %v7118_v6  ;;  %5763 = vtanh.f32 %v4975_v61  ;;  %v4979_v25 = vadd.f32 %v4978_v29, %v3839_v8  ;;  %v7120_v34 = vpop.f32.mrb[123].mxu1  ;;  %v3841_v38 = vpop.f32.mrb[59].mxu0  ;;  %4244 = vmatprep.subr.bf16.mxu1 %v4168_v45  ;;  %v4984_v61 = vadd.f32 %v7402_v27, %v6854_v7  ;;  %v7404_v45 = vld [vmem:[#allocation32_spill] sm:$0xff] }
 0x352   : > { %7400 = vst [vmem:[#allocation28_spill] sm:$0xff] %v7120_v34  ;;  %5765 = vtanh.f32 %v4977_v58  ;;  %v4981_v31 = vadd.f32 %v4980_v57, %v3841_v38  ;;  %4245 = vmatpush1.bf16.xpose.msra.mxu1 %v4167_v44  ;;  %v4986_v57 = vadd.f32 %v7404_v45, %v6850_v11 }
 0x353   : > { %v5756_v60 = vpop.eup %5755  ;;  %5767 = vtanh.f32 %v4979_v25 }
 0x354   : > { %v5758_v36 = vpop.eup %5757  ;;  %5769 = vtanh.f32 %v4981_v31  ;;  %v7405_v31 = vld [vmem:[#allocation33_spill] sm:$0xff] }
 0x355   : > { %v5760_v0 = vpop.eup %5759  ;;  %v7126_v8 = vpop.f32.mrb[124].mxu1  ;;  %v4988_v34 = vadd.f32 %v7405_v31, %v6854_v7  ;;  %v4996_v31 = vadd.f32 %v6872_v14, %v6854_v7  ;;  %v7407_v14 = vld [vmem:[#allocation35_spill] sm:$0xff] }
 0x356   : > { %v5762_v62 = vpop.eup %5761  ;;  %7403 = vst [vmem:[#allocation29_spill] sm:$0xff] %v7126_v8  ;;  %v3845_v29 = vpop.f32.mrb[60].mxu0  ;;  %v4169_v47 = vpack.c.bf16 %v5760_v0, %v5756_v60 }
 0x357   : > { %v4983_v44 = vadd.f32 %v4982_v48, %v3845_v29  ;;  %v7130_v58 = vpop.f32.mrb[125].mxu1  ;;  %v3847_v25 = vpop.f32.mrb[61].mxu0  ;;  %v4170_v38 = vpack.c.bf16 %v5762_v62, %v5758_v36  ;;  %v7406_v62 = vld [vmem:[#allocation34_spill] sm:$0xff] }
 0x358   : > { %v4985_v20 = vadd.f32 %v4984_v61, %v3847_v25  ;;  %v7134_v6 = vpop.f32.mrb[126].mxu1  ;;  %v3849_v23 = vpop.f32.mrb[62].mxu0  ;;  %v4990_v61 = vadd.f32 %v7406_v62, %v6850_v11  ;;  %v4994_v25 = vadd.f32 %v6870_v56, %v6850_v11 }
 0x359   : > { %5771 = vtanh.f32 %v4983_v44  ;;  %v4987_v27 = vadd.f32 %v4986_v57, %v3849_v23  ;;  %v7136_v8 = vpop.f32.mrb[127].mxu1  ;;  %v3851_v60 = vpop.f32.mrb[63].mxu0  ;;  %4246 = vmatprep.subr.bf16.mxu1 %v4170_v38  ;;  %v4992_v44 = vadd.f32 %v6866_v13, %v6854_v7 }
 0x35a   : > { %5773 = vtanh.f32 %v4985_v20  ;;  %v4989_v0 = vadd.f32 %v4988_v34, %v3851_v60  ;;  %4247 = vmatpush1.bf16.xpose.msra.mxu1 %v4169_v47 }
 0x35b   : > { %v5764_v48 = vpop.eup %5763  ;;  %5775 = vtanh.f32 %v4987_v27 }
 0x35c   : > { %v5766_v29 = vpop.eup %5765  ;;  %5777 = vtanh.f32 %v4989_v0 }
 0x35d   : > { %v5768_v36 = vpop.eup %5767 }
 0x35e   : > { %v5770_v45 = vpop.eup %5769  ;;  %v3855_v23 = vpop.f32.mrb[64].mxu0  ;;  %v4171_v57 = vpack.c.bf16 %v5768_v36, %v5764_v48 }
 0x35f   : > { %v4991_v38 = vadd.f32 %v4990_v61, %v3855_v23  ;;  %v3857_v34 = vpop.f32.mrb[65].mxu0  ;;  %v4172_v47 = vpack.c.bf16 %v5770_v45, %v5766_v29  ;;  %v4998_v29 = vadd.f32 %v6880_v21, %v6850_v11  ;;  %v5000_v61 = vadd.f32 %v7407_v14, %v6854_v7  ;;  %v7408_v23 = vld [vmem:[#allocation36_spill] sm:$0xff] }
 0x360   : > { %v4993_v20 = vadd.f32 %v4992_v44, %v3857_v34  ;;  %v3859_v27 = vpop.f32.mrb[66].mxu0 }
 0x361   : > { %5779 = vtanh.f32 %v4991_v38  ;;  %v4995_v60 = vadd.f32 %v4994_v25, %v3859_v27  ;;  %v3861_v0 = vpop.f32.mrb[67].mxu0  ;;  %4248 = vmatprep.subr.bf16.mxu1 %v4172_v47  ;;  %v5002_v25 = vadd.f32 %v7408_v23, %v6850_v11  ;;  %v7409_v47 = vld [vmem:[#allocation37_spill] sm:$0xff] }
 0x362   : > { %5781 = vtanh.f32 %v4993_v20  ;;  %v4997_v62 = vadd.f32 %v4996_v31, %v3861_v0  ;;  %4249 = vmatpush1.bf16.xpose.msra.mxu1 %v4171_v57  ;;  %v5004_v31 = vadd.f32 %v7409_v47, %v6854_v7 }
 0x363   : > { %v5772_v13 = vpop.eup %5771  ;;  %5783 = vtanh.f32 %v4995_v60 }
 0x364   : > { %v5774_v48 = vpop.eup %5773  ;;  %5785 = vtanh.f32 %v4997_v62 }
 0x365   : > { %v5776_v56 = vpop.eup %5775 }
 0x366   : > { %v5778_v36 = vpop.eup %5777  ;;  %v3865_v45 = vpop.f32.mrb[68].mxu0  ;;  %v4173_v44 = vpack.c.bf16 %v5776_v56, %v5772_v13 }
 0x367   : > { %v4999_v38 = vadd.f32 %v4998_v29, %v3865_v45  ;;  %v3867_v34 = vpop.f32.mrb[69].mxu0  ;;  %v4174_v57 = vpack.c.bf16 %v5778_v36, %v5774_v48  ;;  %v7410_v29 = vld [vmem:[#allocation38_spill] sm:$0xff]  ;;  %v7158_v36 = vcombine.low %v6900_v9, %v6900_v9 }
 0x368   : > { %v5001_v20 = vadd.f32 %v5000_v61, %v3867_v34  ;;  %v3869_v27 = vpop.f32.mrb[70].mxu0  ;;  %v5006_v48 = vadd.f32 %v7410_v29, %v6850_v11  ;;  %v5008_v61 = vadd.f32 %v6912_v40, %v6854_v7 }
 0x369   : > { %5787 = vtanh.f32 %v4999_v38  ;;  %v5003_v60 = vadd.f32 %v5002_v25, %v3869_v27  ;;  %v3871_v21 = vpop.f32.mrb[71].mxu0  ;;  %4250 = vmatprep.subr.bf16.mxu1 %v4174_v57  ;;  %v5012_v57 = vadd.f32 %v6921_v28, %v6854_v7  ;;  %v7411_v27 = vld [vmem:[#allocation39_spill] sm:$0xff]  ;;  %v7412_v28 = vld [vmem:[#allocation40_spill] sm:$0xff] }
 0x36a   : > { %5789 = vtanh.f32 %v5001_v20  ;;  %v5005_v0 = vadd.f32 %v5004_v31, %v3871_v21  ;;  %4251 = vmatpush1.bf16.xpose.msra.mxu1 %v4173_v44  ;;  %v5010_v44 = vadd.f32 %v6916_v30, %v6850_v11 }
 0x36b   : > { %v5780_v62 = vpop.eup %5779  ;;  %5791 = vtanh.f32 %v5003_v60 }
 0x36c   : > { %v5782_v13 = vpop.eup %5781  ;;  %5793 = vtanh.f32 %v5005_v0  ;;  %v5014_v0 = vadd.f32 %v7412_v28, %v6850_v11  ;;  %v5028_v28 = vadd.f32 %v6957_v53, %v6854_v7  ;;  %v5032_v53 = vadd.f32 %v6967_v39, %v6854_v7 }
 0x36d   : > { %v5784_v56 = vpop.eup %5783 }
 0x36e   : > { %v5786_v14 = vpop.eup %5785  ;;  %v3875_v45 = vpop.f32.mrb[72].mxu0  ;;  %v4175_v23 = vpack.c.bf16 %v5784_v56, %v5780_v62 }
 0x36f   : > { %v5007_v25 = vadd.f32 %v5006_v48, %v3875_v45  ;;  %v3877_v38 = vpop.f32.mrb[73].mxu0  ;;  %v4176_v34 = vpack.c.bf16 %v5786_v14, %v5782_v13  ;;  %v5016_v13 = vadd.f32 %v6933_v10, %v6854_v7  ;;  %v5018_v48 = vadd.f32 %v6939_v2, %v6850_v11 }
 0x370   : > { %v5009_v47 = vadd.f32 %v5008_v61, %v3877_v38  ;;  %v3879_v31 = vpop.f32.mrb[74].mxu0 }
 0x371   : > { %5795 = vtanh.f32 %v5007_v25  ;;  %v5011_v9 = vadd.f32 %v5010_v44, %v3879_v31  ;;  %v3881_v20 = vpop.f32.mrb[75].mxu0  ;;  %4261 = vmatprep.subr.bf16.mxu1 %v4176_v34  ;;  %4253 = vmatmul.mubr.bf16.vlgmr.msra.gmra.mrb[128].mxu1 %v7158_v36  ;;  %v5022_v31 = vadd.f32 %v6947_v17, %v6850_v11 }
 0x372   : > { %5797 = vtanh.f32 %v5009_v47  ;;  %v5013_v40 = vadd.f32 %v5012_v57, %v3881_v20  ;;  %4262 = vmatpush1.bf16.xpose.msra.mxu1 %v4175_v23  ;;  %4293 = vmatprep.mubr.bf16.mxu1 %v7411_v27  ;;  %v5020_v23 = vadd.f32 %v6941_v15, %v6854_v7  ;;  %v5024_v15 = vadd.f32 %v6951_v19, %v6854_v7 }
 0x373   : > { %v5788_v30 = vpop.eup %5787  ;;  %5799 = vtanh.f32 %v5011_v9  ;;  %v5026_v27 = vadd.f32 %v6955_v63, %v6850_v11 }
 0x374   : > { %v5790_v60 = vpop.eup %5789  ;;  %5801 = vtanh.f32 %v5013_v40 }
 0x375   : > { %v5792_v21 = vpop.eup %5791 }
 0x376   : > { %v5794_v62 = vpop.eup %5793  ;;  %v3885_v56 = vpop.f32.mrb[76].mxu0  ;;  %v4177_v29 = vpack.c.bf16 %v5792_v21, %v5788_v30 }
 0x377   : > { %v5015_v14 = vadd.f32 %v5014_v0, %v3885_v56  ;;  %v3887_v61 = vpop.f32.mrb[77].mxu0  ;;  %v4178_v45 = vpack.c.bf16 %v5794_v62, %v5790_v60 }
 0x378   : > { %v5017_v44 = vadd.f32 %v5016_v13, %v3887_v61  ;;  %v3889_v25 = vpop.f32.mrb[78].mxu0 }
 0x379   : > { %5803 = vtanh.f32 %v5015_v14  ;;  %v5019_v38 = vadd.f32 %v5018_v48, %v3889_v25  ;;  %v3891_v34 = vpop.f32.mrb[79].mxu0  ;;  %4263 = vmatprep.subr.bf16.mxu1 %v4178_v45  ;;  %v5030_v48 = vadd.f32 %v6963_v5, %v6850_v11 }
 0x37a   : > { %5805 = vtanh.f32 %v5017_v44  ;;  %v5021_v57 = vadd.f32 %v5020_v23, %v3891_v34  ;;  %4264 = vmatpush1.bf16.xpose.msra.mxu1 %v4177_v29  ;;  %v5034_v23 = vadd.f32 %v6971_v3, %v6850_v11  ;;  %v5036_v34 = vadd.f32 %v6973_v59, %v6854_v7 }
 0x37b   : > { %v5796_v10 = vpop.eup %5795  ;;  %5807 = vtanh.f32 %v5019_v38  ;;  %v5040_v59 = vadd.f32 %v6983_v26, %v6854_v7 }
 0x37c   : > { %v5798_v47 = vpop.eup %5797  ;;  %5809 = vtanh.f32 %v5021_v57 }
 0x37d   : > { %v5800_v2 = vpop.eup %5799 }
 0x37e   : > { %v5802_v9 = vpop.eup %5801  ;;  %v3895_v20 = vpop.f32.mrb[80].mxu0  ;;  %v4179_v40 = vpack.c.bf16 %v5800_v2, %v5796_v10 }
 0x37f   : > { %v5023_v30 = vadd.f32 %v5022_v31, %v3895_v20  ;;  %v3897_v60 = vpop.f32.mrb[81].mxu0  ;;  %v4180_v21 = vpack.c.bf16 %v5802_v9, %v5798_v47  ;;  %v5038_v9 = vadd.f32 %v6979_v46, %v6850_v11 }
 0x380   : > { %v5025_v0 = vadd.f32 %v5024_v15, %v3897_v60  ;;  %v3899_v62 = vpop.f32.mrb[82].mxu0 }
 0x381   : > { %5811 = vtanh.f32 %v5023_v30  ;;  %v5027_v13 = vadd.f32 %v5026_v27, %v3899_v62  ;;  %v3901_v17 = vpop.f32.mrb[83].mxu0  ;;  %4265 = vmatprep.subr.bf16.mxu1 %v4180_v21  ;;  %v5042_v27 = vadd.f32 %v6987_v49, %v6850_v11 }
 0x382   : > { %5813 = vtanh.f32 %v5025_v0  ;;  %v5029_v56 = vadd.f32 %v5028_v28, %v3901_v17  ;;  %4266 = vmatpush1.bf16.xpose.msra.mxu1 %v4179_v40  ;;  %v5044_v28 = vadd.f32 %v6989_v12, %v6854_v7  ;;  %v5048_v12 = vadd.f32 %v6999_v54, %v6854_v7 }
 0x383   : > { %v5804_v19 = vpop.eup %5803  ;;  %5815 = vtanh.f32 %v5027_v13 }
 0x384   : > { %v5806_v29 = vpop.eup %5805  ;;  %5817 = vtanh.f32 %v5029_v56 }
 0x385   : > { %v5808_v63 = vpop.eup %5807 }
 0x386   : > { %v5810_v14 = vpop.eup %5809  ;;  %v3905_v61 = vpop.f32.mrb[84].mxu0  ;;  %v4181_v45 = vpack.c.bf16 %v5808_v63, %v5804_v19  ;;  %v5046_v19 = vadd.f32 %v6995_v4, %v6850_v11 }
 0x387   : > { %v5031_v44 = vadd.f32 %v5030_v48, %v3905_v61  ;;  %v3907_v25 = vpop.f32.mrb[85].mxu0  ;;  %v4182_v38 = vpack.c.bf16 %v5810_v14, %v5806_v29  ;;  %v5050_v14 = vadd.f32 %v7003_v18, %v6850_v11 }
 0x388   : > { %v5033_v57 = vadd.f32 %v5032_v53, %v3907_v25  ;;  %v3909_v10 = vpop.f32.mrb[86].mxu0 }
 0x389   : > { %5819 = vtanh.f32 %v5031_v44  ;;  %v5035_v47 = vadd.f32 %v5034_v23, %v3909_v10  ;;  %v3911_v5 = vpop.f32.mrb[87].mxu0  ;;  %4267 = vmatprep.subr.bf16.mxu1 %v4182_v38  ;;  %v5052_v23 = vadd.f32 %v7005_v32, %v6854_v7  ;;  %v5054_v10 = vadd.f32 %v7011_v22, %v6850_v11 }
 0x38a   : > { %5821 = vtanh.f32 %v5033_v57  ;;  %v5037_v2 = vadd.f32 %v5036_v34, %v3911_v5  ;;  %4268 = vmatpush1.bf16.xpose.msra.mxu1 %v4181_v45  ;;  %v5056_v32 = vadd.f32 %v7015_v37, %v6854_v7 }
 0x38b   : > { %v5812_v39 = vpop.eup %5811  ;;  %5823 = vtanh.f32 %v5035_v47 }
 0x38c   : > { %v5814_v31 = vpop.eup %5813  ;;  %5825 = vtanh.f32 %v5037_v2 }
 0x38d   : > { %v5816_v3 = vpop.eup %5815 }
 0x38e   : > { %v5818_v15 = vpop.eup %5817  ;;  %v3915_v20 = vpop.f32.mrb[88].mxu0  ;;  %v4183_v40 = vpack.c.bf16 %v5816_v3, %v5812_v39  ;;  %v5058_v39 = vadd.f32 %v7019_v41, %v6850_v11 }
 0x38f   : > { %v5039_v30 = vadd.f32 %v5038_v9, %v3915_v20  ;;  %v3917_v60 = vpop.f32.mrb[89].mxu0  ;;  %v4184_v21 = vpack.c.bf16 %v5818_v15, %v5814_v31  ;;  %v5060_v15 = vadd.f32 %v7021_v51, %v6854_v7  ;;  %v5064_v51 = vadd.f32 %v7031_v50, %v6854_v7 }
 0x390   : > { %v5041_v0 = vadd.f32 %v5040_v59, %v3917_v60  ;;  %v3919_v62 = vpop.f32.mrb[90].mxu0  ;;  %v5062_v60 = vadd.f32 %v7027_v42, %v6850_v11 }
 0x391   : > { %5827 = vtanh.f32 %v5039_v30  ;;  %v5043_v13 = vadd.f32 %v5042_v27, %v3919_v62  ;;  %v3921_v46 = vpop.f32.mrb[91].mxu0  ;;  %4269 = vmatprep.subr.bf16.mxu1 %v4184_v21  ;;  %v5066_v62 = vadd.f32 %v7035_v33, %v6850_v11 }
 0x392   : > { %5829 = vtanh.f32 %v5041_v0  ;;  %v5045_v17 = vadd.f32 %v5044_v28, %v3921_v46  ;;  %4270 = vmatpush1.bf16.xpose.msra.mxu1 %v4183_v40 }
 0x393   : > { %v5820_v26 = vpop.eup %5819  ;;  %5831 = vtanh.f32 %v5043_v13 }
 0x394   : > { %v5822_v56 = vpop.eup %5821  ;;  %5833 = vtanh.f32 %v5045_v17 }
 0x395   : > { %v5824_v49 = vpop.eup %5823 }
 0x396   : > { %v5826_v29 = vpop.eup %5825  ;;  %v3925_v63 = vpop.f32.mrb[92].mxu0  ;;  %v4185_v48 = vpack.c.bf16 %v5824_v49, %v5820_v26  ;;  %v5068_v26 = vadd.f32 %v7037_v43, %v6854_v7  ;;  %v5072_v43 = vadd.f32 %v7047_v16, %v6854_v7 }
 0x397   : > { %v5047_v53 = vadd.f32 %v5046_v19, %v3925_v63  ;;  %v3927_v61 = vpop.f32.mrb[93].mxu0  ;;  %v4186_v45 = vpack.c.bf16 %v5826_v29, %v5822_v56  ;;  %v5070_v63 = vadd.f32 %v7043_v52, %v6850_v11 }
 0x398   : > { %v5049_v44 = vadd.f32 %v5048_v12, %v3927_v61  ;;  %v3929_v25 = vpop.f32.mrb[94].mxu0  ;;  %v5074_v61 = vadd.f32 %v7051_v24, %v6850_v11 }
 0x399   : > { %5835 = vtanh.f32 %v5047_v53  ;;  %v5051_v38 = vadd.f32 %v5050_v14, %v3929_v25  ;;  %v3931_v4 = vpop.f32.mrb[95].mxu0  ;;  %4271 = vmatprep.subr.bf16.mxu1 %v4186_v45  ;;  %v5076_v25 = vadd.f32 %v7053_v1, %v6854_v7  ;;  %v7413_v1 = vld [vmem:[#allocation15_spill] sm:$0xff] }
 0x39a   : > { %5837 = vtanh.f32 %v5049_v44  ;;  %v5053_v34 = vadd.f32 %v5052_v23, %v3931_v4  ;;  %4272 = vmatpush1.bf16.xpose.msra.mxu1 %v4185_v48 }
 0x39b   : > { %v5828_v54 = vpop.eup %5827  ;;  %5839 = vtanh.f32 %v5051_v38 }
 0x39c   : > { %v5830_v57 = vpop.eup %5829  ;;  %5841 = vtanh.f32 %v5053_v34 }
 0x39d   : > { %v5832_v18 = vpop.eup %5831 }
 0x39e   : > { %v5834_v47 = vpop.eup %5833  ;;  %v3935_v5 = vpop.f32.mrb[96].mxu0  ;;  %v4187_v2 = vpack.c.bf16 %v5832_v18, %v5828_v54  ;;  %v5078_v18 = vadd.f32 %v7059_v55, %v6850_v11 }
 0x39f   : > { %v5055_v31 = vadd.f32 %v5054_v10, %v3935_v5  ;;  %v3937_v3 = vpop.f32.mrb[97].mxu0  ;;  %v4188_v9 = vpack.c.bf16 %v5834_v47, %v5830_v57  ;;  %v5080_v47 = vadd.f32 %v7413_v1, %v6854_v7 }
 0x3a0   : > { %v5057_v59 = vadd.f32 %v5056_v32, %v3937_v3  ;;  %v3939_v20 = vpop.f32.mrb[98].mxu0 }
 0x3a1   : > { %5843 = vtanh.f32 %v5055_v31  ;;  %v5059_v40 = vadd.f32 %v5058_v39, %v3939_v20  ;;  %v3941_v22 = vpop.f32.mrb[99].mxu0  ;;  %4273 = vmatprep.subr.bf16.mxu1 %v4188_v9 }
 0x3a2   : > { %5845 = vtanh.f32 %v5057_v59  ;;  %v5061_v27 = vadd.f32 %v5060_v15, %v3941_v22  ;;  %4274 = vmatpush1.bf16.xpose.msra.mxu1 %v4187_v2  ;;  %v7414_v2 = vld [vmem:[#allocation16_spill] sm:$0xff]  ;;  %v7415_v15 = vld [vmem:[#allocation17_spill] sm:$0xff] }
 0x3a3   : > { %v5836_v37 = vpop.eup %5835  ;;  %5847 = vtanh.f32 %v5059_v40  ;;  %v5082_v39 = vadd.f32 %v7414_v2, %v6850_v11  ;;  %v5084_v59 = vadd.f32 %v7415_v15, %v6854_v7  ;;  %v7423_v2 = vld [vmem:[#allocation25_spill] sm:$0xff] }
 0x3a4   : > { %v5838_v30 = vpop.eup %5837  ;;  %5849 = vtanh.f32 %v5061_v27 }
 0x3a5   : > { %v5840_v41 = vpop.eup %5839 }
 0x3a6   : > { %v5842_v21 = vpop.eup %5841  ;;  %v3945_v28 = vpop.f32.mrb[100].mxu0  ;;  %v4189_v0 = vpack.c.bf16 %v5840_v41, %v5836_v37 }
 0x3a7   : > { %v5063_v13 = vadd.f32 %v5062_v60, %v3945_v28  ;;  %v3947_v46 = vpop.f32.mrb[101].mxu0  ;;  %v4190_v17 = vpack.c.bf16 %v5842_v21, %v5838_v30  ;;  %v7416_v60 = vld [vmem:[#allocation18_spill] sm:$0xff]  ;;  %v7417_v28 = vld [vmem:[#allocation19_spill] sm:$0xff] }
 0x3a8   : > { %v5065_v56 = vadd.f32 %v5064_v51, %v3947_v46  ;;  %v3949_v49 = vpop.f32.mrb[102].mxu0  ;;  %v5086_v21 = vadd.f32 %v7416_v60, %v6850_v11  ;;  %v7418_v46 = vld [vmem:[#allocation20_spill] sm:$0xff] }
 0x3a9   : > { %5851 = vtanh.f32 %v5063_v13  ;;  %v5067_v19 = vadd.f32 %v5066_v62, %v3949_v49  ;;  %v3951_v42 = vpop.f32.mrb[103].mxu0  ;;  %4275 = vmatprep.subr.bf16.mxu1 %v4190_v17  ;;  %v5090_v17 = vadd.f32 %v7418_v46, %v6850_v11  ;;  %v7427_v46 = vld [vmem:[#allocation29_spill] sm:$0xff] }
 0x3aa   : > { %5853 = vtanh.f32 %v5065_v56  ;;  %v5069_v29 = vadd.f32 %v5068_v26, %v3951_v42  ;;  %4276 = vmatpush1.bf16.xpose.msra.mxu1 %v4189_v0  ;;  %v5088_v0 = vadd.f32 %v7417_v28, %v6854_v7 }
 0x3ab   : > { %v5844_v50 = vpop.eup %5843  ;;  %5855 = vtanh.f32 %v5067_v19  ;;  %v7419_v19 = vld [vmem:[#allocation21_spill] sm:$0xff] }
 0x3ac   : > { %v5846_v12 = vpop.eup %5845  ;;  %5857 = vtanh.f32 %v5069_v29  ;;  %v5092_v42 = vadd.f32 %v7419_v19, %v6854_v7 }
 0x3ad   : > { %v5848_v33 = vpop.eup %5847 }
 0x3ae   : > { %v5850_v48 = vpop.eup %5849  ;;  %v3955_v14 = vpop.f32.mrb[104].mxu0  ;;  %v4191_v53 = vpack.c.bf16 %v5848_v33, %v5844_v50 }
 0x3af   : > { %v5071_v45 = vadd.f32 %v5070_v63, %v3955_v14  ;;  %v3957_v23 = vpop.f32.mrb[105].mxu0  ;;  %v4192_v44 = vpack.c.bf16 %v5850_v48, %v5846_v12 }
 0x3b0   : > { %v5073_v38 = vadd.f32 %v5072_v43, %v3957_v23  ;;  %v3959_v4 = vpop.f32.mrb[106].mxu0  ;;  %v5096_v23 = vadd.f32 %v7098_v35, %v6854_v7 }
 0x3b1   : > { %5859 = vtanh.f32 %v5071_v45  ;;  %v5075_v34 = vadd.f32 %v5074_v61, %v3959_v4  ;;  %v3961_v52 = vpop.f32.mrb[107].mxu0  ;;  %4277 = vmatprep.subr.bf16.mxu1 %v4192_v44 }
 0x3b2   : > { %5861 = vtanh.f32 %v5073_v38  ;;  %v5077_v54 = vadd.f32 %v5076_v25, %v3961_v52  ;;  %4278 = vmatpush1.bf16.xpose.msra.mxu1 %v4191_v53  ;;  %v7420_v53 = vld [vmem:[#allocation22_spill] sm:$0xff]  ;;  %v7421_v38 = vld [vmem:[#allocation23_spill] sm:$0xff] }
 0x3b3   : > { %v5852_v16 = vpop.eup %5851  ;;  %5863 = vtanh.f32 %v5075_v34  ;;  %v5094_v61 = vadd.f32 %v7420_v53, %v6850_v11  ;;  %v5098_v4 = vadd.f32 %v7421_v38, %v6850_v11 }
 0x3b4   : > { %v5854_v57 = vpop.eup %5853  ;;  %5865 = vtanh.f32 %v5077_v54 }
 0x3b5   : > { %v5856_v24 = vpop.eup %5855 }
 0x3b6   : > { %v5858_v10 = vpop.eup %5857  ;;  %v3965_v32 = vpop.f32.mrb[108].mxu0  ;;  %v4193_v5 = vpack.c.bf16 %v5856_v24, %v5852_v16  ;;  %v7422_v16 = vld [vmem:[#allocation24_spill] sm:$0xff] }
 0x3b7   : > { %v5079_v31 = vadd.f32 %v5078_v18, %v3965_v32  ;;  %v3967_v3 = vpop.f32.mrb[109].mxu0  ;;  %v4194_v9 = vpack.c.bf16 %v5858_v10, %v5854_v57  ;;  %v5100_v57 = vadd.f32 %v7422_v16, %v6854_v7 }
 0x3b8   : > { %v5081_v20 = vadd.f32 %v5080_v47, %v3967_v3  ;;  %v3969_v40 = vpop.f32.mrb[110].mxu0  ;;  %v7424_v3 = vld [vmem:[#allocation26_spill] sm:$0xff] }
 0x3b9   : > { %5867 = vtanh.f32 %v5079_v31  ;;  %v5083_v22 = vadd.f32 %v5082_v39, %v3969_v40  ;;  %v3971_v55 = vpop.f32.mrb[111].mxu0  ;;  %4279 = vmatprep.subr.bf16.mxu1 %v4194_v9  ;;  %v5102_v39 = vadd.f32 %v7423_v2, %v6850_v11  ;;  %v5104_v9 = vadd.f32 %v7424_v3, %v6854_v7 }
 0x3ba   : > { %5869 = vtanh.f32 %v5081_v20  ;;  %v5085_v27 = vadd.f32 %v5084_v59, %v3971_v55  ;;  %4280 = vmatpush1.bf16.xpose.msra.mxu1 %v4193_v5  ;;  %v7425_v20 = vld [vmem:[#allocation27_spill] sm:$0xff] }
 0x3bb   : > { %v5860_v37 = vpop.eup %5859  ;;  %5871 = vtanh.f32 %v5083_v22  ;;  %v5106_v40 = vadd.f32 %v7425_v20, %v6850_v11 }
 0x3bc   : > { %v5862_v30 = vpop.eup %5861  ;;  %5873 = vtanh.f32 %v5085_v27 }
 0x3bd   : > { %v5864_v41 = vpop.eup %5863 }
 0x3be   : > { %v5866_v51 = vpop.eup %5865  ;;  %v3975_v62 = vpop.f32.mrb[112].mxu0  ;;  %v4195_v13 = vpack.c.bf16 %v5864_v41, %v5860_v37  ;;  %v7426_v37 = vld [vmem:[#allocation28_spill] sm:$0xff] }
 0x3bf   : > { %v5087_v26 = vadd.f32 %v5086_v21, %v3975_v62  ;;  %v3977_v56 = vpop.f32.mrb[113].mxu0  ;;  %v4196_v49 = vpack.c.bf16 %v5866_v51, %v5862_v30  ;;  %v5108_v30 = vadd.f32 %v7426_v37, %v6854_v7 }
 0x3c0   : > { %v5089_v29 = vadd.f32 %v5088_v0, %v3977_v56  ;;  %v3979_v50 = vpop.f32.mrb[114].mxu0  ;;  %v5112_v56 = vadd.f32 %v7130_v58, %v6854_v7 }
 0x3c1   : > { %5875 = vtanh.f32 %v5087_v26  ;;  %v5091_v12 = vadd.f32 %v5090_v17, %v3979_v50  ;;  %v3981_v33 = vpop.f32.mrb[115].mxu0  ;;  %4281 = vmatprep.subr.bf16.mxu1 %v4196_v49  ;;  %v5110_v17 = vadd.f32 %v7427_v46, %v6850_v11 }
 0x3c2   : > { %5877 = vtanh.f32 %v5089_v29  ;;  %v5093_v63 = vadd.f32 %v5092_v42, %v3981_v33  ;;  %4282 = vmatpush1.bf16.xpose.msra.mxu1 %v4195_v13  ;;  %v5114_v42 = vadd.f32 %v7134_v6, %v6850_v11  ;;  %v5116_v33 = vadd.f32 %v7136_v8, %v6854_v7 }
 0x3c3   : > { %v5868_v48 = vpop.eup %5867  ;;  %5879 = vtanh.f32 %v5091_v12 }
 0x3c4   : > { %v5870_v43 = vpop.eup %5869  ;;  %5881 = vtanh.f32 %v5093_v63 }
 0x3c5   : > { %v5872_v14 = vpop.eup %5871 }
 0x3c6   : > { %v5874_v45 = vpop.eup %5873  ;;  %v3985_v44 = vpop.f32.mrb[116].mxu0  ;;  %v4197_v25 = vpack.c.bf16 %v5872_v14, %v5868_v48 }
 0x3c7   : > { %v5095_v34 = vadd.f32 %v5094_v61, %v3985_v44  ;;  %v3987_v52 = vpop.f32.mrb[117].mxu0  ;;  %v4198_v54 = vpack.c.bf16 %v5874_v45, %v5870_v43 }
 0x3c8   : > { %v5097_v24 = vadd.f32 %v5096_v23, %v3987_v52  ;;  %v3989_v18 = vpop.f32.mrb[118].mxu0 }
 0x3c9   : > { %5883 = vtanh.f32 %v5095_v34  ;;  %v5099_v10 = vadd.f32 %v5098_v4, %v3989_v18  ;;  %v3991_v1 = vpop.f32.mrb[119].mxu0  ;;  %4283 = vmatprep.subr.bf16.mxu1 %v4198_v54  ;;  %v4211_v34 = vpop.permute.xlu0 %4210 }
 0x3ca   : > { %5885 = vtanh.f32 %v5097_v24  ;;  %v5101_v47 = vadd.f32 %v5100_v57, %v3991_v1  ;;  %4284 = vmatpush1.bf16.xpose.msra.mxu1 %v4197_v25 }
 0x3cb   : > { %v5876_v35 = vpop.eup %5875  ;;  %5887 = vtanh.f32 %v5099_v10 }
 0x3cc   : > { %v5878_v32 = vpop.eup %5877  ;;  %5889 = vtanh.f32 %v5101_v47 }
 0x3cd   : > { %v5880_v5 = vpop.eup %5879 }
 0x3ce   : > { %v5882_v31 = vpop.eup %5881  ;;  %v3995_v15 = vpop.f32.mrb[120].mxu0  ;;  %v4199_v59 = vpack.c.bf16 %v5880_v5, %v5876_v35 }
 0x3cf   : > { %v5103_v22 = vadd.f32 %v5102_v39, %v3995_v15  ;;  %v3997_v55 = vpop.f32.mrb[121].mxu0  ;;  %v4200_v27 = vpack.c.bf16 %v5882_v31, %v5878_v32 }
 0x3d0   : > { %v5105_v41 = vadd.f32 %v5104_v9, %v3997_v55  ;;  %v3999_v60 = vpop.f32.mrb[122].mxu0 }
 0x3d1   : > { %5891 = vtanh.f32 %v5103_v22  ;;  %v5107_v21 = vadd.f32 %v5106_v40, %v3999_v60  ;;  %v4001_v51 = vpop.f32.mrb[123].mxu0  ;;  %4285 = vmatprep.subr.bf16.mxu1 %v4200_v27 }
 0x3d2   : > { %5893 = vtanh.f32 %v5105_v41  ;;  %v5109_v28 = vadd.f32 %v5108_v30, %v4001_v51  ;;  %4286 = vmatpush1.bf16.xpose.msra.mxu1 %v4199_v59 }
 0x3d3   : > { %v5884_v0 = vpop.eup %5883  ;;  %5895 = vtanh.f32 %v5107_v21 }
 0x3d4   : > { %v5886_v62 = vpop.eup %5885  ;;  %5897 = vtanh.f32 %v5109_v28 }
 0x3d5   : > { %v5888_v13 = vpop.eup %5887 }
 0x3d6   : > { %v5890_v26 = vpop.eup %5889  ;;  %v4005_v49 = vpop.f32.mrb[124].mxu0  ;;  %v4201_v19 = vpack.c.bf16 %v5888_v13, %v5884_v0 }
 0x3d7   : > { %v5111_v29 = vadd.f32 %v5110_v17, %v4005_v49  ;;  %v4007_v50 = vpop.f32.mrb[125].mxu0  ;;  %v4202_v12 = vpack.c.bf16 %v5890_v26, %v5886_v62 }
 0x3d8   : > { %v5113_v63 = vadd.f32 %v5112_v56, %v4007_v50  ;;  %v4009_v48 = vpop.f32.mrb[126].mxu0 }
 0x3d9   : > { %5899 = vtanh.f32 %v5111_v29  ;;  %v5115_v43 = vadd.f32 %v5114_v42, %v4009_v48  ;;  %v4011_v14 = vpop.f32.mrb[127].mxu0  ;;  %4287 = vmatprep.subr.bf16.mxu1 %v4202_v12 }
 0x3da   : > { %5901 = vtanh.f32 %v5113_v63  ;;  %v5117_v53 = vadd.f32 %v5116_v33, %v4011_v14  ;;  %4288 = vmatpush1.bf16.xpose.msra.mxu1 %v4201_v19 }
 0x3db   : > { %v5892_v58 = vpop.eup %5891  ;;  %5903 = vtanh.f32 %v5115_v43 }
 0x3dc   : > { %v5894_v61 = vpop.eup %5893  ;;  %5905 = vtanh.f32 %v5117_v53 }
 0x3dd   : > { %v5896_v11 = vpop.eup %5895 }
 0x3de   : > { %v5898_v6 = vpop.eup %5897  ;;  %v4203_v45 = vpack.c.bf16 %v5896_v11, %v5892_v58 }
 0x3df   : > { %v4204_v23 = vpack.c.bf16 %v5898_v6, %v5894_v61 }
 0x3e1   : > { %4289 = vmatprep.subr.bf16.mxu1 %v4204_v23 }
 0x3e2   : > { %4290 = vmatpush1.bf16.xpose.msra.mxu1 %v4203_v45 }
 0x3e3   : > { %v5900_v7 = vpop.eup %5899 }
 0x3e4   : > { %v5902_v8 = vpop.eup %5901 }
 0x3e5   : > { %v5904_v44 = vpop.eup %5903 }
 0x3e6   : > { %v5906_v25 = vpop.eup %5905  ;;  %v4205_v38 = vpack.c.bf16 %v5904_v44, %v5900_v7 }
 0x3e7   : > { %v4206_v4 = vpack.c.bf16 %v5906_v25, %v5902_v8 }
 0x3e9   : > { %4291 = vmatprep.subr.bf16.mxu1 %v4206_v4 }
 0x3ea   : > { %4292 = vmatpush1.bf16.xpose.msra.mxu1 %v4205_v38 }
 0x3f1   : > { %4294 = vmatmul.mubr.bf16.vlgmr.msra.gmra.mrb[132].mxu1 %v7158_v36 }
 0x444   : > { %v4254_v52 = vpop.f32.mrb[128].mxu1 }
 0x445   : > { %v4256_v54 = vpop.f32.mrb[129].mxu1  ;;  %v4255_v16 = vadd.f32 %v4254_v52, %v4211_v34 }
 0x446   : > { %v4258_v57 = vpop.f32.mrb[130].mxu1  ;;  %v4257_v24 = vadd.f32 %v4256_v54, %v4211_v34 }
 0x447   : > { %4302 = vst [vmem:[%s283_s11] sm:$0xff] %v4255_v16  ;;  %v4259_v18 = vpop.f32.mrb[131].mxu1 }
 0x448   : > { %4303 = vst [vmem:[%s283_s11 + $0x8] sm:$0xff] %v4257_v24 }
 0x4c4   : > { %v4295_v10 = vpop.f32.mrb[132].mxu1 }
 0x4c5   : > { %v4296_v1 = vadd.f32 %v4295_v10, %v4211_v34  ;;  %v4297_v47 = vpop.f32.mrb[133].mxu1 }
 0x4c6   : > { %v4298_v35 = vadd.f32 %v4297_v47, %v4211_v34  ;;  %v4299_v36 = vpop.f32.mrb[134].mxu1 }
 0x4c7   : > { %4304 = vst [vmem:[%s283_s11 + $0x10] sm:$0xff] %v4296_v1  ;;  %v4300_v32 = vpop.f32.mrb[135].mxu1 }
 0x4c8   : > { %4305 = vst [vmem:[%s283_s11 + $0x18] sm:$0xff] %v4298_v35 }
 0x4c9   : > { %6034 = shalt.err (!%p6031_p4)
}
 0x4ca   : > { %s6035_s16 = scalar_lea.hbm %s7278_s7, 512  ;;  %s6039_s24 = scalar_lea.hbm %s7327_s5, 1024 }
 0x4cb   : > { %p6036_p9 = scmp.ne.s32.totalorder %s7278_s7, %s6035_s16  ;;  %p6040_p8 = scmp.lt.u32.totalorder %s7278_s7, %s7327_s5 }
 0x4cc   : > { %p6041_p13 = scmp.lt.u32.totalorder %s6039_s24, %s6035_s16  ;;  %p6043_p10 = scmp.lt.u32.totalorder %s6035_s16, %s7278_s7 }
 0x4cd   : > { %p6037_p0 = pnand %p6036_p9, %p6282_p5 }
 0x4ce   : > { %p6042_p6 = por %p6041_p13, %p6040_p8 }
 0x4cf   : > { %p6038_p11 = pneg %p6037_p0 }
 0x4d0   : > { %p6044_p3 = por %p6043_p10, %p6042_p6 }
 0x4d2   : > { %p6045_p7 = pnand %p6044_p3, %p6038_p11 }
 0x4d4   : > { %6048 = shalt.err (!%p6045_p7)
}
 0x4d5   : > { %5388 = dma.vmem_to_hbm [thread:$0]  (%p6282_p5), %s7280_s13, 512, %s7278_s7, %s4307_s22  }
 0x4d6 PF: > { %s4333_s11 = sand.u32 1, %s6083_s18   ;;  %p7428_p12 = scmp.ne.s32.totalorder %s7333_s25, 0 }
 0x4d7   : > { %p7429_p2 = scmp.ge.s32.totalorder %s6095_s21, 2  ;;  %s4334_s12 = scalar_lea.sflag [#allocation4], %s4333_s11 }
 0x4d9   : > { %p5405_p1 = pnand %p7429_p2, %p7428_p12 }
 0x4db   : > { %6078 = dma.done.wait (!%p5405_p1), %s4334_s12, 512  }
 0x4dc   : > { %6080 = vsyncadd (!%p5405_p1), %s4334_s12, 4294966784  ;;  %p20_p4 = scmp.ge.s32.totalorder %s6268_s14, 4   ;;  %s7430_s18 = smov %s6087_s19 }
 0x4dd   : > { %s7431_s19 = smov %s6091_s20  ;;  %s7432_s20 = smov %s6278_s28 }
 0x4de   : > { %s7433_s21 = smov %s6268_s14  ;;  %22 = sbr.rel (!%p20_p4) target bundleno = 7 (0x7), region = 97 }
 0x4e5   :  { %4339 = vsyncpa [#allocation3], 1 }
 0x4e6   :  { %4341 = vsyncpa [#allocation3 + $0x1], 1 }
 0x4e7   :  { %4342 = vsyncpa [#allocation6], 1 }
 0x4e8   :  { %4343 = vsyncpa [#allocation9], 1 }
 0x4e9   :  { %4344 = vsyncpa [#allocation4], 1 }
 0x4ea   :  { %4346 = vsyncpa [#allocation4 + $0x1], 1 }

</bundles_post_ra>
